<compile_context>
chip_gen: v7x
topology: tpu7x:2x2x1
jax: 0.10.0
libtpu: 0.0.40
codegen_flags: <defaults>
</compile_context>

<pallas_src>
import functools

import numpy as np
import jax
import jax.numpy as jnp
from jax import lax
from jax.experimental import pallas as pl
from jax.experimental.pallas import tpu as pltpu

BN_EPS = 1e-5


def _double_conv_kernel(x_ref, m1_ref, m2_ref,
                        w1_ref, g1_ref, b1_ref,
                        w2_ref, g2_ref, b2_ref,
                        out_ref,
                        xp_s, y1p_s, *,
                        wpad, nhwp, l1, l2, lp1, lp2,
                        cin, cmid, cout, count1, count2, compute_dtype):
    """Fused (3x3 valid conv -> BN(batch stats) -> ReLU) x 2.

    x_ref   : [nhwp, Cin]      flattened NHWC rows (row stride = wpad), compute_dtype.
    m1_ref  : [1, l1] f32      validity mask for stage-1 rows (excludes wrap rows/cols).
    m2_ref  : [1, l2] f32      validity mask for stage-2 rows.
    w*_ref  : [3, 3*Cin_prev, Cout]  dy-indexed, dx packed into K, compute_dtype.
    g*/b*   : [1, C] f32       BN gamma / beta.
    out_ref : [l2, Cout] f32   raw stage-2 output (wrap rows/cols included).
    xp_s    : [lp1, 3*Cin]     scratch: dx-packed input.
    y1p_s   : [lp2, 3*Cmid]    scratch: dx-packed stage-1 activations.
    """
    f32 = jnp.float32
    cd = compute_dtype

    def bn_relu(conv, mask_row, count, gamma, beta):
        # Masked one-pass batch stats via MXU row-vector matmuls; BN folded to
        # one per-channel scale/bias; fused ReLU.  All BN math in f32.
        inv_n = 1.0 / count
        s = jnp.dot(mask_row, conv, preferred_element_type=f32)            # [1, C]
        sq = jnp.dot(mask_row, conv * conv, preferred_element_type=f32)    # [1, C]
        mean = s * inv_n
        var = jnp.maximum(sq * inv_n - mean * mean, 0.0)
        a = gamma * lax.rsqrt(var + BN_EPS)
        b = beta - mean * a
        return jnp.maximum(conv * a + b, 0.0)

    # ---- stage 1: dx-pack the input once into VMEM scratch ------------------
    # xp_s[r, dx*cin:(dx+1)*cin] = x[r + dx].  Rows >= nhwp-2 are only ever read
    # by wrap (masked) outputs -> zero-fill them so everything stays finite
    # (this replaces the old wrapper-side concatenate-with-zeros HBM pass).
    tail = lp1 - (nhwp - 2)                                   # 4 slack rows
    xp_s[pl.ds(nhwp - 2, tail), :] = jnp.zeros((tail, 3 * cin), cd)
    for dx in range(3):                                       # 2 misaligned shifts total
        cnt = nhwp - dx
        xp_s[pl.ds(0, cnt), pl.ds(dx * cin, cin)] = x_ref[pl.ds(dx, cnt), :]

    # 3 accumulating MXU matmuls, K = 3*cin; all dy*wpad offsets sublane-aligned.
    acc1 = jnp.zeros((l1, cmid), f32)
    for dy in range(3):
        acc1 = acc1 + jnp.dot(xp_s[pl.ds(dy * wpad, l1), :], w1_ref[dy],
                              preferred_element_type=f32)

    y1 = bn_relu(acc1, m1_ref[...], count1, g1_ref[...], b1_ref[...]).astype(cd)

    # ---- stage 2: dx-pack the stage-1 activations into VMEM scratch ---------
    # (y1's live range ends at these three stores; it never leaves VMEM.)
    for dx in range(3):                                       # 2 misaligned shifts total
        y1p_s[pl.ds(0, lp2), pl.ds(dx * cmid, cmid)] = y1[dx:dx + lp2, :]

    acc2 = jnp.zeros((l2, cout), f32)
    for dy in range(3):
        acc2 = acc2 + jnp.dot(y1p_s[pl.ds(dy * wpad, l2), :], w2_ref[dy],
                              preferred_element_type=f32)

    out_ref[...] = bn_relu(acc2, m2_ref[...], count2, g2_ref[...], b2_ref[...])
    # TODO(synk): with Cout < 128 this store is lane-sparse (masked vst).  For
    # production make Cout a multiple of 128, or fold W into the lane axis
    # (store [l2/wpad, wpad*Cout]) once the cross-lane reshape is worth it.


def _valid_mask(length, n, h, w, wpad, shrink):
    """[1, L] f32 mask over flattened tall-image rows after `shrink` valid 3x3
    convs (1.0 = real output pixel, 0.0 = row/image-wrap garbage or width pad).
    Built with host numpy at trace time -> a tiny embedded constant."""
    k = 2 * shrink
    r = np.arange(length)
    ok = ((r % wpad) < (w - k)) & (((r // wpad) % h) < (h - k)) \
        & (r < (n * h - k) * wpad)
    return jnp.asarray(ok.astype(np.float32).reshape(1, length))


def double_conv_nhwc(x_nhwc, w1, g1, b1, w2, g2, b2, *,
                     compute_dtype=jnp.bfloat16):
    """Fused DoubleConv forward.  x_nhwc: [N, H, W, Cin] f32.
    Returns [N, H-4, W-4, Cout] f32 (NHWC is the kernel-native layout)."""
    n, h, w, cin = x_nhwc.shape
    cmid, cout = w1.shape[0], w2.shape[0]
    assert w1.shape == (cmid, cin, 3, 3) and w2.shape == (cout, cmid, 3, 3)
    assert h >= 5 and w >= 5
    ho, wo = h - 4, w - 4

    # Pad the row stride to a multiple of 8 so every dy*wpad slice offset inside
    # the kernel is sublane-aligned (no-op when W % 8 == 0, as in the demo).
    wpad = -(-w // 8) * 8
    if wpad != w:
        x_nhwc = jnp.pad(x_nhwc, ((0, 0), (0, 0), (0, wpad - w), (0, 0)))

    nhwp = n * h * wpad                  # real flattened rows (no slack)
    l2 = (n * h - 4) * wpad              # stage-2 rows incl. wrap garbage
    l1 = l2 + 2 * wpad + 2               # stage-1 rows needed by stage-2
    lp1 = l1 + 2 * wpad                  # dx-packed stage-1 input rows
    lp2 = l2 + 2 * wpad                  # dx-packed stage-2 input rows
    assert lp1 == nhwp + 2               # guard: flattened row stride == wpad

    # Flatten once, in the MXU compute dtype (halves input-side HBM DMA in
    # bf16).  No zero-slack concat: slack rows are handled inside the kernel.
    x_flat = x_nhwc.reshape(nhwp, cin).astype(compute_dtype)

    # OIHW -> [dy, dx*Cin + ci, co] packed weights (dx folded into K).
    w1p = jnp.transpose(w1, (2, 3, 1, 0)).reshape(3, 3 * cin, cmid).astype(compute_dtype)
    w2p = jnp.transpose(w2, (2, 3, 1, 0)).reshape(3, 3 * cmid, cout).astype(compute_dtype)

    m1 = _valid_mask(l1, n, h, w, wpad, 1)
    m2 = _valid_mask(l2, n, h, w, wpad, 2)

    kernel = functools.partial(
        _double_conv_kernel,
        wpad=wpad, nhwp=nhwp, l1=l1, l2=l2, lp1=lp1, lp2=lp2,
        cin=cin, cmid=cmid, cout=cout,
        count1=float(n * (h - 2) * (w - 2)),
        count2=float(n * ho * wo),
        compute_dtype=compute_dtype)

    # Explicit scoped-VMEM budget (v5e's default is only 16 MiB).  Rough upper
    # bound with (8,128) lane padding, x2 headroom, clamped under v7x's 64 MiB.
    cbytes = jnp.dtype(compute_dtype).itemsize

    def _arr_bytes(rows, cols, itemsize):
        return -(-rows // 8) * 8 * max(cols, 128) * itemsize

    vmem_need = (_arr_bytes(nhwp, cin, cbytes)
                 + _arr_bytes(lp1, 3 * cin, cbytes)
                 + _arr_bytes(lp2, 3 * cmid, cbytes)
                 + _arr_bytes(l1, cmid, 4)
                 + 3 * _arr_bytes(l2, cout, 4)
                 + _arr_bytes(1, l1, 4) + _arr_bytes(1, l2, 4))
    vmem_limit = int(min(max(2 * vmem_need, 16 * 1024 * 1024), 48 * 1024 * 1024))

    vmem = pl.BlockSpec(memory_space=pltpu.MemorySpace.VMEM)
    out_flat = pl.pallas_call(
        kernel,
        out_shape=jax.ShapeDtypeStruct((l2, cout), jnp.float32),
        in_specs=[vmem] * 9,
        out_specs=vmem,
        scratch_shapes=[
            pltpu.VMEM((lp1, 3 * cin), compute_dtype),    # dx-packed input
            pltpu.VMEM((lp2, 3 * cmid), compute_dtype),   # dx-packed stage-1 act
        ],
        compiler_params=pltpu.CompilerParams(vmem_limit_bytes=vmem_limit),
    )(x_flat, m1, m2,
      w1p,
      g1.reshape(1, cmid).astype(jnp.float32),
      b1.reshape(1, cmid).astype(jnp.float32),
      w2p,
      g2.reshape(1, cout).astype(jnp.float32),
      b2.reshape(1, cout).astype(jnp.float32))

    # Un-wrap the tall image with a single gather (keep rows i*h..i*h+ho-1 of
    # each image, cols < wo) instead of a per-image Python slice list + stack.
    out_tall = out_flat.reshape(n * h - 4, wpad, cout)
    rows = (np.arange(n)[:, None] * h + np.arange(ho)[None, :]).reshape(-1)
    y = jnp.take(out_tall, jnp.asarray(rows), axis=0)
    return y.reshape(n, ho, wpad, cout)[:, :, :wo, :]


def double_conv(x_nchw, w1, g1, b1, w2, g2, b2, *, compute_dtype=jnp.bfloat16):
    """NCHW adapter matching the PyTorch module interface (demo glue only;
    keep activations NHWC between blocks in a full UNet to drop these)."""
    y = double_conv_nhwc(jnp.transpose(x_nchw, (0, 2, 3, 1)),
                         w1, g1, b1, w2, g2, b2, compute_dtype=compute_dtype)
    return jnp.transpose(y, (0, 3, 1, 2))


# ---------------- pure-JAX reference (for correctness check) ----------------
def _ref_conv_bn_relu(x, w, gamma, beta):
    y = lax.conv_general_dilated(
        x, w, window_strides=(1, 1), padding='VALID',
        dimension_numbers=('NCHW', 'OIHW', 'NCHW'))
    mean = jnp.mean(y, axis=(0, 2, 3), keepdims=True)
    var = jnp.mean((y - mean) ** 2, axis=(0, 2, 3), keepdims=True)
    y = (y - mean) * lax.rsqrt(var + BN_EPS)
    y = y * gamma.reshape(1, -1, 1, 1) + beta.reshape(1, -1, 1, 1)
    return jnp.maximum(y, 0.0)


def _ref_double_conv(x, w1, g1, b1, w2, g2, b2):
    return _ref_conv_bn_relu(_ref_conv_bn_relu(x, w1, g1, b1), w2, g2, b2)


if __name__ == "__main__":
    # Small shapes: batch=2, in_channels=4, H=W=16, mid=out=8.
    N, CIN, H, W = 2, 4, 16, 16
    MID, COUT = 8, 8

    key = jax.random.PRNGKey(0)
    kx, kw1, kw2, kg1, kb1, kg2, kb2 = jax.random.split(key, 7)

    x = jax.random.normal(kx, (N, CIN, H, W), dtype=jnp.float32)
    w1 = 0.1 * jax.random.normal(kw1, (MID, CIN, 3, 3), dtype=jnp.float32)
    w2 = 0.1 * jax.random.normal(kw2, (COUT, MID, 3, 3), dtype=jnp.float32)
    g1 = 1.0 + 0.1 * jax.random.normal(kg1, (MID,), dtype=jnp.float32)
    b1 = 0.1 * jax.random.normal(kb1, (MID,), dtype=jnp.float32)
    g2 = 1.0 + 0.1 * jax.random.normal(kg2, (COUT,), dtype=jnp.float32)
    b2 = 0.1 * jax.random.normal(kb2, (COUT,), dtype=jnp.float32)

    run_f32 = jax.jit(functools.partial(double_conv, compute_dtype=jnp.float32))
    run_bf16 = jax.jit(functools.partial(double_conv, compute_dtype=jnp.bfloat16))

    ref = _ref_double_conv(x, w1, g1, b1, w2, g2, b2)

    # Exact-dtype (f32 MXU) path: tight check against the reference.
    out = jax.block_until_ready(run_f32(x, w1, g1, b1, w2, g2, b2))
    assert out.shape == (N, COUT, H - 4, W - 4), out.shape
    assert jnp.allclose(out, ref, atol=1e-4, rtol=1e-4), \
        float(jnp.max(jnp.abs(out - ref)))

    # bf16-MXU path (default; v5e/v6e/v7x throughput mode): loose relative check.
    out_bf16 = jax.block_until_ready(run_bf16(x, w1, g1, b1, w2, g2, b2))
    rel_err = jnp.linalg.norm(out_bf16 - ref) / jnp.linalg.norm(ref)
    assert out_bf16.shape == ref.shape and bool(rel_err < 0.05), float(rel_err)

    print("KERNEL_OK")
</pallas_src>

<mosaic_0001>
module attributes {stable_mosaic.version = 11 : i64} {
  func.func @_double_conv_kernel(%arg0: memref<512x4xf32, #tpu.memory_space<vmem>>, %arg1: memref<1x482xf32, #tpu.memory_space<vmem>>, %arg2: memref<1x448xf32, #tpu.memory_space<vmem>>, %arg3: memref<3x12x8xf32, #tpu.memory_space<vmem>>, %arg4: memref<1x8xf32, #tpu.memory_space<vmem>>, %arg5: memref<1x8xf32, #tpu.memory_space<vmem>>, %arg6: memref<3x24x8xf32, #tpu.memory_space<vmem>>, %arg7: memref<1x8xf32, #tpu.memory_space<vmem>>, %arg8: memref<1x8xf32, #tpu.memory_space<vmem>>, %arg9: memref<448x8xf32, #tpu.memory_space<vmem>>, %arg10: memref<514x12xf32, #tpu.memory_space<vmem>>, %arg11: memref<480x24xf32, #tpu.memory_space<vmem>>) attributes {dimension_semantics = [], scalar_prefetch = 0 : i64, scratch_operands = 2 : i64, tpu.core_type = #tpu.core_type<tc>} {
    %cst = arith.constant 0.000000e+00 : f32
    %0 = vector.broadcast %cst : f32 to vector<4x12xf32>
    %c510 = arith.constant 510 : index
    %c0 = arith.constant 0 : index
    %1 = vector.load %arg10[%c510, %c0] : memref<514x12xf32, #tpu.memory_space<vmem>>, vector<4x12xf32>
    tpu.vector_store %arg10[%c510, %c0], %0 {strides = array<i32>} : memref<514x12xf32, #tpu.memory_space<vmem>>, vector<4x12xf32>,
    %c0_0 = arith.constant 0 : index
    %c0_1 = arith.constant 0 : index
    %2 = vector.load %arg0[%c0_0, %c0_1] : memref<512x4xf32, #tpu.memory_space<vmem>>, vector<512x4xf32>
    %c0_2 = arith.constant 0 : index
    %c0_3 = arith.constant 0 : index
    %3 = vector.load %arg10[%c0_2, %c0_3] : memref<514x12xf32, #tpu.memory_space<vmem>>, vector<512x4xf32>
    tpu.vector_store %arg10[%c0_2, %c0_3], %2 {strides = array<i32>} : memref<514x12xf32, #tpu.memory_space<vmem>>, vector<512x4xf32>,
    %c1 = arith.constant 1 : index
    %c0_4 = arith.constant 0 : index
    %4 = vector.load %arg0[%c1, %c0_4] : memref<512x4xf32, #tpu.memory_space<vmem>>, vector<511x4xf32>
    %c0_5 = arith.constant 0 : index
    %c4 = arith.constant 4 : index
    %5 = vector.load %arg10[%c0_5, %c4] : memref<514x12xf32, #tpu.memory_space<vmem>>, vector<511x4xf32>
    tpu.vector_store %arg10[%c0_5, %c4], %4 {strides = array<i32>} : memref<514x12xf32, #tpu.memory_space<vmem>>, vector<511x4xf32>,
    %c2 = arith.constant 2 : index
    %c0_6 = arith.constant 0 : index
    %6 = vector.load %arg0[%c2, %c0_6] : memref<512x4xf32, #tpu.memory_space<vmem>>, vector<510x4xf32>
    %c0_7 = arith.constant 0 : index
    %c8 = arith.constant 8 : index
    %7 = vector.load %arg10[%c0_7, %c8] : memref<514x12xf32, #tpu.memory_space<vmem>>, vector<510x4xf32>
    tpu.vector_store %arg10[%c0_7, %c8], %6 {strides = array<i32>} : memref<514x12xf32, #tpu.memory_space<vmem>>, vector<510x4xf32>,
    %cst_8 = arith.constant 0.000000e+00 : f32
    %8 = vector.broadcast %cst_8 : f32 to vector<482x8xf32>
    %c0_9 = arith.constant 0 : index
    %c0_10 = arith.constant 0 : index
    %9 = vector.load %arg10[%c0_9, %c0_10] : memref<514x12xf32, #tpu.memory_space<vmem>>, vector<482x12xf32>
    %c0_11 = arith.constant 0 : index
    %c0_12 = arith.constant 0 : index
    %c0_13 = arith.constant 0 : index
    %10 = vector.load %arg3[%c0_11, %c0_12, %c0_13] : memref<3x12x8xf32, #tpu.memory_space<vmem>>, vector<1x12x8xf32>
    %11 = vector.shape_cast %10 : vector<1x12x8xf32> to vector<12x8xf32>
    %cst_14 = arith.constant dense<0.000000e+00> : vector<482x8xf32>
    %12 = tpu.matmul %9, %11, %cst_14 {dimension_numbers = #tpu.dot_dimension_numbers<[1], [0], [0], [1], [0, 0, 1, 1], [], []>} : vector<482x12xf32>, vector<12x8xf32>, vector<482x8xf32> -> vector<482x8xf32>
    %13 = arith.addf %8, %12 : vector<482x8xf32>
    %c16 = arith.constant 16 : index
    %c0_15 = arith.constant 0 : index
    %14 = vector.load %arg10[%c16, %c0_15] : memref<514x12xf32, #tpu.memory_space<vmem>>, vector<482x12xf32>
    %c1_16 = arith.constant 1 : index
    %c0_17 = arith.constant 0 : index
    %c0_18 = arith.constant 0 : index
    %15 = vector.load %arg3[%c1_16, %c0_17, %c0_18] : memref<3x12x8xf32, #tpu.memory_space<vmem>>, vector<1x12x8xf32>
    %16 = vector.shape_cast %15 : vector<1x12x8xf32> to vector<12x8xf32>
    %cst_19 = arith.constant dense<0.000000e+00> : vector<482x8xf32>
    %17 = tpu.matmul %14, %16, %cst_19 {dimension_numbers = #tpu.dot_dimension_numbers<[1], [0], [0], [1], [0, 0, 1, 1], [], []>} : vector<482x12xf32>, vector<12x8xf32>, vector<482x8xf32> -> vector<482x8xf32>
    %18 = arith.addf %13, %17 : vector<482x8xf32>
    %c32 = arith.constant 32 : index
    %c0_20 = arith.constant 0 : index
    %19 = vector.load %arg10[%c32, %c0_20] : memref<514x12xf32, #tpu.memory_space<vmem>>, vector<482x12xf32>
    %c2_21 = arith.constant 2 : index
    %c0_22 = arith.constant 0 : index
    %c0_23 = arith.constant 0 : index
    %20 = vector.load %arg3[%c2_21, %c0_22, %c0_23] : memref<3x12x8xf32, #tpu.memory_space<vmem>>, vector<1x12x8xf32>
    %21 = vector.shape_cast %20 : vector<1x12x8xf32> to vector<12x8xf32>
    %cst_24 = arith.constant dense<0.000000e+00> : vector<482x8xf32>
    %22 = tpu.matmul %19, %21, %cst_24 {dimension_numbers = #tpu.dot_dimension_numbers<[1], [0], [0], [1], [0, 0, 1, 1], [], []>} : vector<482x12xf32>, vector<12x8xf32>, vector<482x8xf32> -> vector<482x8xf32>
    %23 = arith.addf %18, %22 : vector<482x8xf32>
    %c0_25 = arith.constant 0 : index
    %c0_26 = arith.constant 0 : index
    %24 = vector.load %arg1[%c0_25, %c0_26] : memref<1x482xf32, #tpu.memory_space<vmem>>, vector<1x482xf32>
    %c0_27 = arith.constant 0 : index
    %c0_28 = arith.constant 0 : index
    %25 = vector.load %arg4[%c0_27, %c0_28] : memref<1x8xf32, #tpu.memory_space<vmem>>, vector<1x8xf32>
    %c0_29 = arith.constant 0 : index
    %c0_30 = arith.constant 0 : index
    %26 = vector.load %arg5[%c0_29, %c0_30] : memref<1x8xf32, #tpu.memory_space<vmem>>, vector<1x8xf32>
    %cst_31 = arith.constant dense<0.000000e+00> : vector<1x8xf32>
    %27 = tpu.matmul %24, %23, %cst_31 {dimension_numbers = #tpu.dot_dimension_numbers<[1], [0], [0], [1], [0, 0, 1, 1], [], []>} : vector<1x482xf32>, vector<482x8xf32>, vector<1x8xf32> -> vector<1x8xf32>
    %28 = arith.mulf %23, %23 : vector<482x8xf32>
    %cst_32 = arith.constant dense<0.000000e+00> : vector<1x8xf32>
    %29 = tpu.matmul %24, %28, %cst_32 {dimension_numbers = #tpu.dot_dimension_numbers<[1], [0], [0], [1], [0, 0, 1, 1], [], []>} : vector<1x482xf32>, vector<482x8xf32>, vector<1x8xf32> -> vector<1x8xf32>
    %cst_33 = arith.constant 0.00255102036 : f32
    %30 = vector.broadcast %cst_33 : f32 to vector<1x8xf32>
    %31 = arith.mulf %27, %30 : vector<1x8xf32>
    %cst_34 = arith.constant 0.00255102036 : f32
    %32 = vector.broadcast %cst_34 : f32 to vector<1x8xf32>
    %33 = arith.mulf %29, %32 : vector<1x8xf32>
    %34 = arith.mulf %31, %31 : vector<1x8xf32>
    %35 = arith.subf %33, %34 : vector<1x8xf32>
    %cst_35 = arith.constant 0.000000e+00 : f32
    %36 = vector.broadcast %cst_35 : f32 to vector<1x8xf32>
    %37 = arith.maximumf %35, %36 : vector<1x8xf32>
    %cst_36 = arith.constant 9.99999974E-6 : f32
    %38 = vector.broadcast %cst_36 : f32 to vector<1x8xf32>
    %39 = arith.addf %37, %38 : vector<1x8xf32>
    %40 = math.rsqrt %39 : vector<1x8xf32>
    %41 = arith.mulf %25, %40 : vector<1x8xf32>
    %42 = arith.mulf %31, %41 : vector<1x8xf32>
    %43 = arith.subf %26, %42 : vector<1x8xf32>
    %44 = vector.broadcast %41 : vector<1x8xf32> to vector<482x8xf32>
    %45 = arith.mulf %23, %44 : vector<482x8xf32>
    %46 = vector.broadcast %43 : vector<1x8xf32> to vector<482x8xf32>
    %47 = arith.addf %45, %46 : vector<482x8xf32>
    %cst_37 = arith.constant 0.000000e+00 : f32
    %48 = vector.broadcast %cst_37 : f32 to vector<482x8xf32>
    %49 = arith.maximumf %47, %48 : vector<482x8xf32>
    %50 = vector.extract_strided_slice %49 {offsets = [0, 0], sizes = [480, 8], strides = [1, 1]} : vector<482x8xf32> to vector<480x8xf32>
    %c0_38 = arith.constant 0 : index
    %c0_39 = arith.constant 0 : index
    %51 = vector.load %arg11[%c0_38, %c0_39] : memref<480x24xf32, #tpu.memory_space<vmem>>, vector<480x8xf32>
    tpu.vector_store %arg11[%c0_38, %c0_39], %50 {strides = array<i32>} : memref<480x24xf32, #tpu.memory_space<vmem>>, vector<480x8xf32>,
    %52 = vector.extract_strided_slice %49 {offsets = [1, 0], sizes = [480, 8], strides = [1, 1]} : vector<482x8xf32> to vector<480x8xf32>
    %c0_40 = arith.constant 0 : index
    %c8_41 = arith.constant 8 : index
    %53 = vector.load %arg11[%c0_40, %c8_41] : memref<480x24xf32, #tpu.memory_space<vmem>>, vector<480x8xf32>
    tpu.vector_store %arg11[%c0_40, %c8_41], %52 {strides = array<i32>} : memref<480x24xf32, #tpu.memory_space<vmem>>, vector<480x8xf32>,
    %54 = vector.extract_strided_slice %49 {offsets = [2, 0], sizes = [480, 8], strides = [1, 1]} : vector<482x8xf32> to vector<480x8xf32>
    %c0_42 = arith.constant 0 : index
    %c16_43 = arith.constant 16 : index
    %55 = vector.load %arg11[%c0_42, %c16_43] : memref<480x24xf32, #tpu.memory_space<vmem>>, vector<480x8xf32>
    tpu.vector_store %arg11[%c0_42, %c16_43], %54 {strides = array<i32>} : memref<480x24xf32, #tpu.memory_space<vmem>>, vector<480x8xf32>,
    %cst_44 = arith.constant 0.000000e+00 : f32
    %56 = vector.broadcast %cst_44 : f32 to vector<448x8xf32>
    %c0_45 = arith.constant 0 : index
    %c0_46 = arith.constant 0 : index
    %57 = vector.load %arg11[%c0_45, %c0_46] : memref<480x24xf32, #tpu.memory_space<vmem>>, vector<448x24xf32>
    %c0_47 = arith.constant 0 : index
    %c0_48 = arith.constant 0 : index
    %c0_49 = arith.constant 0 : index
    %58 = vector.load %arg6[%c0_47, %c0_48, %c0_49] : memref<3x24x8xf32, #tpu.memory_space<vmem>>, vector<1x24x8xf32>
    %59 = vector.shape_cast %58 : vector<1x24x8xf32> to vector<24x8xf32>
    %cst_50 = arith.constant dense<0.000000e+00> : vector<448x8xf32>
    %60 = tpu.matmul %57, %59, %cst_50 {dimension_numbers = #tpu.dot_dimension_numbers<[1], [0], [0], [1], [0, 0, 1, 1], [], []>} : vector<448x24xf32>, vector<24x8xf32>, vector<448x8xf32> -> vector<448x8xf32>
    %61 = arith.addf %56, %60 : vector<448x8xf32>
    %c16_51 = arith.constant 16 : index
    %c0_52 = arith.constant 0 : index
    %62 = vector.load %arg11[%c16_51, %c0_52] : memref<480x24xf32, #tpu.memory_space<vmem>>, vector<448x24xf32>
    %c1_53 = arith.constant 1 : index
    %c0_54 = arith.constant 0 : index
    %c0_55 = arith.constant 0 : index
    %63 = vector.load %arg6[%c1_53, %c0_54, %c0_55] : memref<3x24x8xf32, #tpu.memory_space<vmem>>, vector<1x24x8xf32>
    %64 = vector.shape_cast %63 : vector<1x24x8xf32> to vector<24x8xf32>
    %cst_56 = arith.constant dense<0.000000e+00> : vector<448x8xf32>
    %65 = tpu.matmul %62, %64, %cst_56 {dimension_numbers = #tpu.dot_dimension_numbers<[1], [0], [0], [1], [0, 0, 1, 1], [], []>} : vector<448x24xf32>, vector<24x8xf32>, vector<448x8xf32> -> vector<448x8xf32>
    %66 = arith.addf %61, %65 : vector<448x8xf32>
    %c32_57 = arith.constant 32 : index
    %c0_58 = arith.constant 0 : index
    %67 = vector.load %arg11[%c32_57, %c0_58] : memref<480x24xf32, #tpu.memory_space<vmem>>, vector<448x24xf32>
    %c2_59 = arith.constant 2 : index
    %c0_60 = arith.constant 0 : index
    %c0_61 = arith.constant 0 : index
    %68 = vector.load %arg6[%c2_59, %c0_60, %c0_61] : memref<3x24x8xf32, #tpu.memory_space<vmem>>, vector<1x24x8xf32>
    %69 = vector.shape_cast %68 : vector<1x24x8xf32> to vector<24x8xf32>
    %cst_62 = arith.constant dense<0.000000e+00> : vector<448x8xf32>
    %70 = tpu.matmul %67, %69, %cst_62 {dimension_numbers = #tpu.dot_dimension_numbers<[1], [0], [0], [1], [0, 0, 1, 1], [], []>} : vector<448x24xf32>, vector<24x8xf32>, vector<448x8xf32> -> vector<448x8xf32>
    %71 = arith.addf %66, %70 : vector<448x8xf32>
    %c0_63 = arith.constant 0 : index
    %c0_64 = arith.constant 0 : index
    %72 = vector.load %arg2[%c0_63, %c0_64] : memref<1x448xf32, #tpu.memory_space<vmem>>, vector<1x448xf32>
    %c0_65 = arith.constant 0 : index
    %c0_66 = arith.constant 0 : index
    %73 = vector.load %arg7[%c0_65, %c0_66] : memref<1x8xf32, #tpu.memory_space<vmem>>, vector<1x8xf32>
    %c0_67 = arith.constant 0 : index
    %c0_68 = arith.constant 0 : index
    %74 = vector.load %arg8[%c0_67, %c0_68] : memref<1x8xf32, #tpu.memory_space<vmem>>, vector<1x8xf32>
    %cst_69 = arith.constant dense<0.000000e+00> : vector<1x8xf32>
    %75 = tpu.matmul %72, %71, %cst_69 {dimension_numbers = #tpu.dot_dimension_numbers<[1], [0], [0], [1], [0, 0, 1, 1], [], []>} : vector<1x448xf32>, vector<448x8xf32>, vector<1x8xf32> -> vector<1x8xf32>
    %76 = arith.mulf %71, %71 : vector<448x8xf32>
    %cst_70 = arith.constant dense<0.000000e+00> : vector<1x8xf32>
    %77 = tpu.matmul %72, %76, %cst_70 {dimension_numbers = #tpu.dot_dimension_numbers<[1], [0], [0], [1], [0, 0, 1, 1], [], []>} : vector<1x448xf32>, vector<448x8xf32>, vector<1x8xf32> -> vector<1x8xf32>
    %cst_71 = arith.constant 0.00347222225 : f32
    %78 = vector.broadcast %cst_71 : f32 to vector<1x8xf32>
    %79 = arith.mulf %75, %78 : vector<1x8xf32>
    %cst_72 = arith.constant 0.00347222225 : f32
    %80 = vector.broadcast %cst_72 : f32 to vector<1x8xf32>
    %81 = arith.mulf %77, %80 : vector<1x8xf32>
    %82 = arith.mulf %79, %79 : vector<1x8xf32>
    %83 = arith.subf %81, %82 : vector<1x8xf32>
    %cst_73 = arith.constant 0.000000e+00 : f32
    %84 = vector.broadcast %cst_73 : f32 to vector<1x8xf32>
    %85 = arith.maximumf %83, %84 : vector<1x8xf32>
    %cst_74 = arith.constant 9.99999974E-6 : f32
    %86 = vector.broadcast %cst_74 : f32 to vector<1x8xf32>
    %87 = arith.addf %85, %86 : vector<1x8xf32>
    %88 = math.rsqrt %87 : vector<1x8xf32>
    %89 = arith.mulf %73, %88 : vector<1x8xf32>
    %90 = arith.mulf %79, %89 : vector<1x8xf32>
    %91 = arith.subf %74, %90 : vector<1x8xf32>
    %92 = vector.broadcast %89 : vector<1x8xf32> to vector<448x8xf32>
    %93 = arith.mulf %71, %92 : vector<448x8xf32>
    %94 = vector.broadcast %91 : vector<1x8xf32> to vector<448x8xf32>
    %95 = arith.addf %93, %94 : vector<448x8xf32>
    %cst_75 = arith.constant 0.000000e+00 : f32
    %96 = vector.broadcast %cst_75 : f32 to vector<448x8xf32>
    %97 = arith.maximumf %95, %96 : vector<448x8xf32>
    %c0_76 = arith.constant 0 : index
    %c0_77 = arith.constant 0 : index
    %98 = vector.load %arg9[%c0_76, %c0_77] : memref<448x8xf32, #tpu.memory_space<vmem>>, vector<448x8xf32>
    tpu.vector_store %arg9[%c0_76, %c0_77], %97 {strides = array<i32>} : memref<448x8xf32, #tpu.memory_space<vmem>>, vector<448x8xf32>,
    return
  }
}

</mosaic_0001>

<bundles_post_ra>
// kernel: double_conv.1
= control target key start
LH: loop header
LB: loop body
LE: loop exit
PB: predicated region body
PF: predicated region fallthrough
CT: control target
= control target key end

     0   :  { %v13277_v2 = vmov 0.0|0.0   ;;  %s8366_s13 = smov 4   ;;  %vm8367_vm0 = vmmov 0   ;;  %v13275_v5 = vmov 0.0   ;;  %s8369_s18 = smov 8   ;;  %vm98_vm1 = vcmask 31744   ;;  %s13264_s0 = inlined_call_operand.vmem [shape: f32[512,4], index: 0, kind: input, shape index: {}]   ;;  %s13265_s3 = inlined_call_operand.vmem [shape: f32[3,12,8], index: 3, kind: input, shape index: {}]   ;;  %s13266_s1 = inlined_call_operand.vmem [shape: f32[1,482], index: 1, kind: input, shape index: {}]   ;;  %s13267_s4 = inlined_call_operand.vmem [shape: f32[1,8], index: 4, kind: input, shape index: {}]   ;;  %s13268_s5 = inlined_call_operand.vmem [shape: f32[1,8], index: 5, kind: input, shape index: {}]   ;;  %s13269_s6 = inlined_call_operand.vmem [shape: f32[3,24,8], index: 6, kind: input, shape index: {}]   ;;  %s13270_s2 = inlined_call_operand.vmem [shape: f32[1,448], index: 2, kind: input, shape index: {}]   ;;  %s13271_s7 = inlined_call_operand.vmem [shape: f32[1,8], index: 7, kind: input, shape index: {}]   ;;  %s13272_s8 = inlined_call_operand.vmem [shape: f32[1,8], index: 8, kind: input, shape index: {}]   ;;  %s13273_s9 = inlined_call_operand.vmem [shape: f32[448,8], index: 9, kind: output, shape index: {}]  }
   0x1   :  { %v165_v0 = vld [vmem:[%s13264_s0 + $0x11] sm:$0xff]  ;;  %v166_v1 = vld [vmem:[%s13264_s0 + $0x19] sm:$0xff]  ;;  %7698 = vmatprep.subr.bf16.mxu0 %v13277_v2  ;;  %8006 = vmatprep.subr.bf16.mxu1 %v13277_v2  ;;  %v167_v6 = vld [vmem:[%s13264_s0 + $0x21] sm:$0xff]  ;;  %vm1188_vm2 = vcmask 1043456   ;;  %vm8370_vm3 = vmmov 1   ;;  %vm483_vm5 = vcmask 64544  }
   0x2   :  { %295 = vrot.lane.b32.xlu0 %v165_v0, %s8366_s13  ;;  %297 = vrot.lane.b32.xlu1 %v166_v1, %s8366_s13  ;;  %v551_v3 = vld [vmem:[%s13264_s0 + $0x12] sm:$0xff]  ;;  %v552_v4 = vld [vmem:[%s13264_s0 + $0x1a] sm:$0xff]  ;;  %vm8496_vm4 = vmpackc.low %vm1188_vm2, %vm8370_vm3  ;;  %vm869_vm6 = vcmask 97344   ;;  %vm1004_vm7 = vcmask 97280   ;;  %vm32_vm8 = vcmask 93184   ;;  %vm547_vm9 = vcmask 63520  }
   0x3   :  { %6871 = vmatprep.mubr.msk.f32.mxu0 %vm8367_vm0, %v13275_v5  ;;  %7015 = vmatprep.mubr.msk.f32.mxu1 %vm8367_vm0, %v13275_v5  ;;  %v553_v7 = vld [vmem:[%s13264_s0 + $0x22] sm:$0xff]  ;;  %v554_v9 = vld [vmem:[%s13264_s0 + $0x2a] sm:$0xff]  ;;  %v555_v11 = vld [vmem:[%s13264_s0 + $0x32] sm:$0xff]  ;;  %33 = vst.msk [vmem:[#allocation2 + $0x1fe] sm:$0xf] %vm32_vm8, %v13275_v5  ;;  %vm933_vm10 = vcmask 95296  }
   0x4   :  { %v168_v8 = vld [vmem:[%s13264_s0 + $0x29] sm:$0xff]  ;;  %v169_v10 = vld [vmem:[%s13264_s0 + $0x31] sm:$0xff]  ;;  %v170_v12 = vld [vmem:[%s13264_s0 + $0x39] sm:$0xff]  ;;  %vm2648_vm11 = vcmask 801792   ;;  %vm2651_vm12 = vcmask 1041408   ;;  %vm3204_vm13 = vcmask 64512  }
   0x5   :  { %v556_v13 = vld [vmem:[%s13264_s0 + $0x3a] sm:$0xff]  ;;  %v36_v14 = vld [vmem:[%s13264_s0 + $0x10] sm:$0xff]  ;;  %v557_v17 = vld [vmem:[%s13264_s0 + $0x42] sm:$0xff]  ;;  %s8371_s29 = smov 16   ;;  %vm3511_vm14 = vcmask 130112   ;;  %vm3758_vm15 = vcmask 195712  }
   0x6   :  { %681 = vrot.lane.b32.xlu0 %v551_v3, %s8369_s18  ;;  %683 = vrot.lane.b32.xlu1 %v552_v4, %s8369_s18  ;;  %101 = vst.msk [vmem:[#allocation2 + $0x10] sm:$0xff] %vm98_vm1, %v36_v14  ;;  %v37_v15 = vld [vmem:[%s13264_s0 + $0x18] sm:$0xff]  ;;  %v171_v16 = vld [vmem:[%s13264_s0 + $0x41] sm:$0xff]  ;;  %vm3756_vm2 = vcmask 195714   ;;  %vm3571_vm3 = vcmask 122944  }
   0x7   :  { %102 = vst.msk [vmem:[#allocation2 + $0x18] sm:$0xff] %vm98_vm1, %v37_v15  ;;  %v5991_v18 = vld [vmem:[%s13265_s3 + $0x10] sm:$0xff]  ;;  %v5992_v19 = vld [vmem:[%s13265_s3 + $0x18] sm:$0xf]  ;;  %v38_v22 = vld [vmem:[%s13264_s0 + $0x20] sm:$0xff] }
   0x8   :  { %v7699_v21 = vpack.c.bf16 %v5992_v19, %v5991_v18  ;;  %103 = vst.msk [vmem:[#allocation2 + $0x20] sm:$0xff] %vm98_vm1, %v38_v22  ;;  %v39_v23 = vld [vmem:[%s13264_s0 + $0x28] sm:$0xff]  ;;  %v40_v26 = vld [vmem:[%s13264_s0 + $0x30] sm:$0xff]  ;;  %v41_v27 = vld [vmem:[%s13264_s0 + $0x38] sm:$0xff] }
   0x9   :  { %v172_v24 = vld [vmem:[%s13264_s0 + $0x49] sm:$0xff]  ;;  %104 = vst.msk [vmem:[#allocation2 + $0x28] sm:$0xff] %vm98_vm1, %v39_v23  ;;  %105 = vst.msk [vmem:[#allocation2 + $0x30] sm:$0xff] %vm98_vm1, %v40_v26  ;;  %v42_v28 = vld [vmem:[%s13264_s0 + $0x40] sm:$0xff] }
   0xa   :  { %299 = vrot.lane.b32.xlu0 %v167_v6, %s8366_s13  ;;  %685 = vrot.lane.b32.xlu1 %v553_v7, %s8369_s18  ;;  %v558_v25 = vld [vmem:[%s13264_s0 + $0x4a] sm:$0xff]  ;;  %106 = vst.msk [vmem:[#allocation2 + $0x38] sm:$0xff] %vm98_vm1, %v41_v27  ;;  %107 = vst.msk [vmem:[#allocation2 + $0x40] sm:$0xff] %vm98_vm1, %v42_v28  ;;  %v559_v31 = vld [vmem:[%s13264_s0 + $0x52] sm:$0xff] }
   0xb   :  { %7701 = vmatpush3.bf16.msk.msra.mxu0 %vm8496_vm4, %v7699_v21  ;;  %8007 = vmatpush3.bf16.msk.msra.mxu1 %vm8496_vm4, %v7699_v21  ;;  %v43_v29 = vld [vmem:[%s13264_s0 + $0x48] sm:$0xff]  ;;  %v173_v30 = vld [vmem:[%s13264_s0 + $0x51] sm:$0xff]  ;;  %v46_v34 = vld [vmem:[%s13264_s0 + $0x60] sm:$0xff] }
   0xc   :  { %7702 = vmatprep.subr.bf16.mxu0 %v13277_v2  ;;  %108 = vst.msk [vmem:[#allocation2 + $0x48] sm:$0xff] %vm98_vm1, %v43_v29  ;;  %v44_v32 = vld [vmem:[%s13264_s0 + $0x50] sm:$0xff]  ;;  %v45_v33 = vld [vmem:[%s13264_s0 + $0x58] sm:$0xff]  ;;  %111 = vst.msk [vmem:[#allocation2 + $0x60] sm:$0xff] %vm98_vm1, %v46_v34 }
   0xd   :  { %109 = vst.msk [vmem:[#allocation2 + $0x50] sm:$0xff] %vm98_vm1, %v44_v32  ;;  %110 = vst.msk [vmem:[#allocation2 + $0x58] sm:$0xff] %vm98_vm1, %v45_v33  ;;  %v174_v35 = vld [vmem:[%s13264_s0 + $0x59] sm:$0xff]  ;;  %v47_v37 = vld [vmem:[%s13264_s0 + $0x68] sm:$0xff] }
   0xe   :  { %301 = vrot.lane.b32.xlu0 %v168_v8, %s8366_s13  ;;  %687 = vrot.lane.b32.xlu1 %v554_v9, %s8369_s18  ;;  %v560_v36 = vld [vmem:[%s13264_s0 + $0x5a] sm:$0xff]  ;;  %112 = vst.msk [vmem:[#allocation2 + $0x68] sm:$0xff] %vm98_vm1, %v47_v37  ;;  %v48_v38 = vld [vmem:[%s13264_s0 + $0x70] sm:$0xff] }
   0xf   :  { %113 = vst.msk [vmem:[#allocation2 + $0x70] sm:$0xff] %vm98_vm1, %v48_v38  ;;  %v175_v39 = vld [vmem:[%s13264_s0 + $0x61] sm:$0xff]  ;;  %v49_v41 = vld [vmem:[%s13264_s0 + $0x78] sm:$0xff]  ;;  %v176_v42 = vld [vmem:[%s13264_s0 + $0x69] sm:$0xff] }
  0x10   :  { %v561_v40 = vld [vmem:[%s13264_s0 + $0x62] sm:$0xff]  ;;  %114 = vst.msk [vmem:[#allocation2 + $0x78] sm:$0xff] %vm98_vm1, %v49_v41  ;;  %v562_v43 = vld [vmem:[%s13264_s0 + $0x6a] sm:$0xff]  ;;  %v563_v46 = vld [vmem:[%s13264_s0 + $0x72] sm:$0xff] }
  0x11   :  { %v50_v44 = vld [vmem:[%s13264_s0 + $0x80] sm:$0xff]  ;;  %v177_v45 = vld [vmem:[%s13264_s0 + $0x71] sm:$0xff]  ;;  %v51_v47 = vld [vmem:[%s13264_s0 + $0x88] sm:$0xff] }
  0x12   :  { %303 = vrot.lane.b32.xlu0 %v169_v10, %s8366_s13  ;;  %689 = vrot.lane.b32.xlu1 %v555_v11, %s8369_s18  ;;  %115 = vst.msk [vmem:[#allocation2 + $0x80] sm:$0xff] %vm98_vm1, %v50_v44  ;;  %116 = vst.msk [vmem:[#allocation2 + $0x88] sm:$0xff] %vm98_vm1, %v51_v47  ;;  %v178_v48 = vld [vmem:[%s13264_s0 + $0x79] sm:$0xff]  ;;  %v52_v50 = vld [vmem:[%s13264_s0 + $0x90] sm:$0xff] }
  0x13   :  { %v564_v49 = vld [vmem:[%s13264_s0 + $0x7a] sm:$0xff]  ;;  %117 = vst.msk [vmem:[#allocation2 + $0x90] sm:$0xff] %vm98_vm1, %v52_v50  ;;  %v565_v52 = vld [vmem:[%s13264_s0 + $0x82] sm:$0xff]  ;;  %v566_v55 = vld [vmem:[%s13264_s0 + $0x8a] sm:$0xff] }
  0x14   :  { %v179_v51 = vld [vmem:[%s13264_s0 + $0x81] sm:$0xff]  ;;  %v53_v53 = vld [vmem:[%s13264_s0 + $0x98] sm:$0xff]  ;;  %v180_v54 = vld [vmem:[%s13264_s0 + $0x89] sm:$0xff] }
  0x15   :  { %118 = vst.msk [vmem:[#allocation2 + $0x98] sm:$0xff] %vm98_vm1, %v53_v53  ;;  %v54_v56 = vld [vmem:[%s13264_s0 + $0xa0] sm:$0xff]  ;;  %v181_v57 = vld [vmem:[%s13264_s0 + $0x91] sm:$0xff]  ;;  %v55_v59 = vld [vmem:[%s13264_s0 + $0xa8] sm:$0xff] }
  0x16   :  { %305 = vrot.lane.b32.xlu0 %v170_v12, %s8366_s13  ;;  %691 = vrot.lane.b32.xlu1 %v556_v13, %s8369_s18  ;;  %119 = vst.msk [vmem:[#allocation2 + $0xa0] sm:$0xff] %vm98_vm1, %v54_v56  ;;  %v567_v58 = vld [vmem:[%s13264_s0 + $0x92] sm:$0xff]  ;;  %120 = vst.msk [vmem:[#allocation2 + $0xa8] sm:$0xff] %vm98_vm1, %v55_v59  ;;  %v568_v61 = vld [vmem:[%s13264_s0 + $0x9a] sm:$0xff] }
  0x17   :  { %v182_v60 = vld [vmem:[%s13264_s0 + $0x99] sm:$0xff]  ;;  %v56_v62 = vld [vmem:[%s13264_s0 + $0xb0] sm:$0xff]  ;;  %v183_v63 = vld [vmem:[%s13264_s0 + $0xa1] sm:$0xff] }
  0x18   :  { %121 = vst.msk [vmem:[#allocation2 + $0xb0] sm:$0xff] %vm98_vm1, %v56_v62  ;;  %v569_v0 = vld [vmem:[%s13264_s0 + $0xa2] sm:$0xff]  ;;  %v57_v1 = vld [vmem:[%s13264_s0 + $0xb8] sm:$0xff]  ;;  %v570_v4 = vld [vmem:[%s13264_s0 + $0xaa] sm:$0xff] }
  0x19   :  { %122 = vst.msk [vmem:[#allocation2 + $0xb8] sm:$0xff] %vm98_vm1, %v57_v1  ;;  %v184_v3 = vld [vmem:[%s13264_s0 + $0xa9] sm:$0xff]  ;;  %v58_v6 = vld [vmem:[%s13264_s0 + $0xc0] sm:$0xff]  ;;  %v185_v7 = vld [vmem:[%s13264_s0 + $0xb1] sm:$0xff] }
  0x1a   :  { %307 = vrot.lane.b32.xlu0 %v171_v16, %s8366_s13  ;;  %693 = vrot.lane.b32.xlu1 %v557_v17, %s8369_s18  ;;  %123 = vst.msk [vmem:[#allocation2 + $0xc0] sm:$0xff] %vm98_vm1, %v58_v6  ;;  %v571_v8 = vld [vmem:[%s13264_s0 + $0xb2] sm:$0xff]  ;;  %v59_v9 = vld [vmem:[%s13264_s0 + $0xc8] sm:$0xff] }
  0x1b   :  { %124 = vst.msk [vmem:[#allocation2 + $0xc8] sm:$0xff] %vm98_vm1, %v59_v9  ;;  %v186_v10 = vld [vmem:[%s13264_s0 + $0xb9] sm:$0xff]  ;;  %v60_v12 = vld [vmem:[%s13264_s0 + $0xd0] sm:$0xff]  ;;  %v187_v13 = vld [vmem:[%s13264_s0 + $0xc1] sm:$0xff] }
  0x1c   :  { %v572_v11 = vld [vmem:[%s13264_s0 + $0xba] sm:$0xff]  ;;  %125 = vst.msk [vmem:[#allocation2 + $0xd0] sm:$0xff] %vm98_vm1, %v60_v12  ;;  %v573_v14 = vld [vmem:[%s13264_s0 + $0xc2] sm:$0xff]  ;;  %v574_v17 = vld [vmem:[%s13264_s0 + $0xca] sm:$0xff] }
  0x1d   :  { %v61_v15 = vld [vmem:[%s13264_s0 + $0xd8] sm:$0xff]  ;;  %v188_v16 = vld [vmem:[%s13264_s0 + $0xc9] sm:$0xff]  ;;  %v62_v18 = vld [vmem:[%s13264_s0 + $0xe0] sm:$0xff] }
  0x1e   :  { %309 = vrot.lane.b32.xlu0 %v172_v24, %s8366_s13  ;;  %695 = vrot.lane.b32.xlu1 %v558_v25, %s8369_s18  ;;  %126 = vst.msk [vmem:[#allocation2 + $0xd8] sm:$0xff] %vm98_vm1, %v61_v15  ;;  %127 = vst.msk [vmem:[#allocation2 + $0xe0] sm:$0xff] %vm98_vm1, %v62_v18  ;;  %v189_v19 = vld [vmem:[%s13264_s0 + $0xd1] sm:$0xff]  ;;  %v63_v22 = vld [vmem:[%s13264_s0 + $0xe8] sm:$0xff] }
  0x1f   :  { %v575_v21 = vld [vmem:[%s13264_s0 + $0xd2] sm:$0xff]  ;;  %128 = vst.msk [vmem:[#allocation2 + $0xe8] sm:$0xff] %vm98_vm1, %v63_v22  ;;  %v576_v24 = vld [vmem:[%s13264_s0 + $0xda] sm:$0xff]  ;;  %v577_v27 = vld [vmem:[%s13264_s0 + $0xe2] sm:$0xff] }
  0x20   :  { %v190_v23 = vld [vmem:[%s13264_s0 + $0xd9] sm:$0xff]  ;;  %v64_v25 = vld [vmem:[%s13264_s0 + $0xf0] sm:$0xff]  ;;  %v191_v26 = vld [vmem:[%s13264_s0 + $0xe1] sm:$0xff] }
  0x21   :  { %129 = vst.msk [vmem:[#allocation2 + $0xf0] sm:$0xff] %vm98_vm1, %v64_v25  ;;  %v65_v28 = vld [vmem:[%s13264_s0 + $0xf8] sm:$0xff]  ;;  %v192_v29 = vld [vmem:[%s13264_s0 + $0xe9] sm:$0xff] }
  0x22   :  { %311 = vrot.lane.b32.xlu0 %v173_v30, %s8366_s13  ;;  %697 = vrot.lane.b32.xlu1 %v559_v31, %s8369_s18  ;;  %130 = vst.msk [vmem:[#allocation2 + $0xf8] sm:$0xff] %vm98_vm1, %v65_v28  ;;  %v578_v30 = vld [vmem:[%s13264_s0 + $0xea] sm:$0xff]  ;;  %v66_v31 = vld [vmem:[%s13264_s0 + $0x100] sm:$0xff] }
  0x23   :  { %131 = vst.msk [vmem:[#allocation2 + $0x100] sm:$0xff] %vm98_vm1, %v66_v31  ;;  %v193_v32 = vld [vmem:[%s13264_s0 + $0xf1] sm:$0xff]  ;;  %v67_v34 = vld [vmem:[%s13264_s0 + $0x108] sm:$0xff] }
  0x24   :  { %v579_v33 = vld [vmem:[%s13264_s0 + $0xf2] sm:$0xff]  ;;  %132 = vst.msk [vmem:[#allocation2 + $0x108] sm:$0xff] %vm98_vm1, %v67_v34  ;;  %v581_v41 = vld [vmem:[%s13264_s0 + $0x102] sm:$0xff] }
  0x25   :  { %v69_v44 = vld [vmem:[%s13264_s0 + $0x118] sm:$0xff]  ;;  %v997_v50 = vld [vmem:[%s13265_s3 + $0x8] sm:$0xf] }
  0x26   :  { %313 = vrot.lane.b32.xlu0 %v174_v35, %s8366_s13  ;;  %699 = vrot.lane.b32.xlu1 %v560_v36, %s8369_s18  ;;  %v194_v35 = vld [vmem:[%s13264_s0 + $0xf9] sm:$0xff]  ;;  %134 = vst.msk [vmem:[#allocation2 + $0x118] sm:$0xff] %vm98_vm1, %v69_v44 }
  0x27   :  { %v580_v36 = vld [vmem:[%s13264_s0 + $0xfa] sm:$0xff]  ;;  %v591_v44 = vld [vmem:[%s13264_s0 + $0x152] sm:$0xff] }
  0x2a   :  { %315 = vrot.lane.b32.xlu0 %v175_v39, %s8366_s13  ;;  %701 = vrot.lane.b32.xlu1 %v561_v40, %s8369_s18  ;;  %v68_v39 = vld [vmem:[%s13264_s0 + $0x110] sm:$0xff]  ;;  %v195_v40 = vld [vmem:[%s13264_s0 + $0x101] sm:$0xff] }
  0x2b   :  { %133 = vst.msk [vmem:[#allocation2 + $0x110] sm:$0xff] %vm98_vm1, %v68_v39  ;;  %v78_v39 = vld [vmem:[%s13264_s0 + $0x160] sm:$0xff] }
  0x2c   :  { %143 = vst.msk [vmem:[#allocation2 + $0x160] sm:$0xff] %vm98_vm1, %v78_v39 }
  0x2e   :  { %317 = vrot.lane.b32.xlu0 %v176_v42, %s8366_s13  ;;  %703 = vrot.lane.b32.xlu1 %v562_v43, %s8369_s18 }
  0x32   :  { %319 = vrot.lane.b32.xlu0 %v177_v45, %s8366_s13  ;;  %705 = vrot.lane.b32.xlu1 %v563_v46, %s8369_s18  ;;  %v196_v45 = vld [vmem:[%s13264_s0 + $0x109] sm:$0xff] }
  0x33   :  { %v582_v46 = vld [vmem:[%s13264_s0 + $0x10a] sm:$0xff] }
  0x36   :  { %321 = vrot.lane.b32.xlu0 %v178_v48, %s8366_s13  ;;  %707 = vrot.lane.b32.xlu1 %v564_v49, %s8369_s18  ;;  %v996_v49 = vld [vmem:[%s13265_s3] sm:$0xff] }
  0x37   :  { %v7703_v53 = vpack.c.bf16 %v997_v50, %v996_v49  ;;  %v592_v50 = vld [vmem:[%s13264_s0 + $0x15a] sm:$0xff] }
  0x3a   :  { %323 = vrot.lane.b32.xlu0 %v179_v51, %s8366_s13  ;;  %709 = vrot.lane.b32.xlu1 %v565_v52, %s8369_s18  ;;  %v70_v51 = vld [vmem:[%s13264_s0 + $0x120] sm:$0xff]  ;;  %v197_v52 = vld [vmem:[%s13264_s0 + $0x111] sm:$0xff] }
  0x3b   :  { %135 = vst.msk [vmem:[#allocation2 + $0x120] sm:$0xff] %vm98_vm1, %v70_v51  ;;  %v80_v51 = vld [vmem:[%s13264_s0 + $0x170] sm:$0xff] }
  0x3c   :  { %145 = vst.msk [vmem:[#allocation2 + $0x170] sm:$0xff] %vm98_vm1, %v80_v51 }
  0x3e   :  { %325 = vrot.lane.b32.xlu0 %v180_v54, %s8366_s13  ;;  %711 = vrot.lane.b32.xlu1 %v566_v55, %s8369_s18 }
  0x42   :  { %327 = vrot.lane.b32.xlu0 %v181_v57, %s8366_s13  ;;  %713 = vrot.lane.b32.xlu1 %v567_v58, %s8369_s18  ;;  %v583_v57 = vld [vmem:[%s13264_s0 + $0x112] sm:$0xff]  ;;  %v71_v58 = vld [vmem:[%s13264_s0 + $0x128] sm:$0xff] }
  0x43   :  { %136 = vst.msk [vmem:[#allocation2 + $0x128] sm:$0xff] %vm98_vm1, %v71_v58  ;;  %v81_v58 = vld [vmem:[%s13264_s0 + $0x178] sm:$0xff] }
  0x44   :  { %146 = vst.msk [vmem:[#allocation2 + $0x178] sm:$0xff] %vm98_vm1, %v81_v58 }
  0x46   :  { %329 = vrot.lane.b32.xlu0 %v182_v60, %s8366_s13  ;;  %715 = vrot.lane.b32.xlu1 %v568_v61, %s8369_s18  ;;  %v198_v60 = vld [vmem:[%s13264_s0 + $0x119] sm:$0xff] }
  0x4a   :  { %331 = vrot.lane.b32.xlu0 %v183_v63, %s8366_s13  ;;  %717 = vrot.lane.b32.xlu1 %v569_v0, %s8369_s18  ;;  %v584_v63 = vld [vmem:[%s13264_s0 + $0x11a] sm:$0xff]  ;;  %v72_v0 = vld [vmem:[%s13264_s0 + $0x130] sm:$0xff] }
  0x4b   :  { %137 = vst.msk [vmem:[#allocation2 + $0x130] sm:$0xff] %vm98_vm1, %v72_v0  ;;  %v594_v0 = vld [vmem:[%s13264_s0 + $0x16a] sm:$0xff] }
  0x4e   :  { %333 = vrot.lane.b32.xlu0 %v184_v3, %s8366_s13  ;;  %719 = vrot.lane.b32.xlu1 %v570_v4, %s8369_s18  ;;  %v199_v3 = vld [vmem:[%s13264_s0 + $0x121] sm:$0xff] }
  0x52   :  { %335 = vrot.lane.b32.xlu0 %v185_v7, %s8366_s13  ;;  %721 = vrot.lane.b32.xlu1 %v571_v8, %s8369_s18  ;;  %v585_v7 = vld [vmem:[%s13264_s0 + $0x122] sm:$0xff]  ;;  %v73_v8 = vld [vmem:[%s13264_s0 + $0x138] sm:$0xff] }
  0x53   :  { %138 = vst.msk [vmem:[#allocation2 + $0x138] sm:$0xff] %vm98_vm1, %v73_v8 }
  0x56   :  { %337 = vrot.lane.b32.xlu0 %v186_v10, %s8366_s13  ;;  %723 = vrot.lane.b32.xlu1 %v572_v11, %s8369_s18  ;;  %v200_v10 = vld [vmem:[%s13264_s0 + $0x129] sm:$0xff] }
  0x5a   :  { %339 = vrot.lane.b32.xlu0 %v187_v13, %s8366_s13  ;;  %725 = vrot.lane.b32.xlu1 %v573_v14, %s8369_s18  ;;  %v586_v13 = vld [vmem:[%s13264_s0 + $0x12a] sm:$0xff]  ;;  %v74_v14 = vld [vmem:[%s13264_s0 + $0x140] sm:$0xff] }
  0x5b   :  { %139 = vst.msk [vmem:[#allocation2 + $0x140] sm:$0xff] %vm98_vm1, %v74_v14 }
  0x5e   :  { %341 = vrot.lane.b32.xlu0 %v188_v16, %s8366_s13  ;;  %727 = vrot.lane.b32.xlu1 %v574_v17, %s8369_s18  ;;  %v201_v16 = vld [vmem:[%s13264_s0 + $0x131] sm:$0xff] }
  0x62   :  { %343 = vrot.lane.b32.xlu0 %v189_v19, %s8366_s13  ;;  %729 = vrot.lane.b32.xlu1 %v575_v21, %s8369_s18  ;;  %v587_v19 = vld [vmem:[%s13264_s0 + $0x132] sm:$0xff]  ;;  %v75_v21 = vld [vmem:[%s13264_s0 + $0x148] sm:$0xff] }
  0x63   :  { %140 = vst.msk [vmem:[#allocation2 + $0x148] sm:$0xff] %vm98_vm1, %v75_v21  ;;  %v211_v21 = vld [vmem:[%s13264_s0 + $0x181] sm:$0xff] }
  0x66   :  { %345 = vrot.lane.b32.xlu0 %v190_v23, %s8366_s13  ;;  %731 = vrot.lane.b32.xlu1 %v576_v24, %s8369_s18  ;;  %v202_v23 = vld [vmem:[%s13264_s0 + $0x139] sm:$0xff] }
  0x6a   :  { %347 = vrot.lane.b32.xlu0 %v191_v26, %s8366_s13  ;;  %733 = vrot.lane.b32.xlu1 %v577_v27, %s8369_s18  ;;  %v588_v26 = vld [vmem:[%s13264_s0 + $0x13a] sm:$0xff]  ;;  %v76_v27 = vld [vmem:[%s13264_s0 + $0x150] sm:$0xff] }
  0x6b   :  { %141 = vst.msk [vmem:[#allocation2 + $0x150] sm:$0xff] %vm98_vm1, %v76_v27 }
  0x6e   :  { %349 = vrot.lane.b32.xlu0 %v192_v29, %s8366_s13  ;;  %735 = vrot.lane.b32.xlu1 %v578_v30, %s8369_s18  ;;  %v203_v29 = vld [vmem:[%s13264_s0 + $0x141] sm:$0xff] }
  0x72   :  { %351 = vrot.lane.b32.xlu0 %v193_v32, %s8366_s13  ;;  %737 = vrot.lane.b32.xlu1 %v579_v33, %s8369_s18  ;;  %v589_v32 = vld [vmem:[%s13264_s0 + $0x142] sm:$0xff]  ;;  %v77_v33 = vld [vmem:[%s13264_s0 + $0x158] sm:$0xff] }
  0x73   :  { %142 = vst.msk [vmem:[#allocation2 + $0x158] sm:$0xff] %vm98_vm1, %v77_v33 }
  0x74   :  { %v296_v37 = vpop.permute.xlu0 %295  ;;  %v298_v38 = vpop.permute.xlu1 %297 }
  0x75   :  { %486 = vst.msk [vmem:[#allocation2 + $0x10] sm:$0xff] %vm483_vm5, %v296_v37  ;;  %487 = vst.msk [vmem:[#allocation2 + $0x18] sm:$0xff] %vm483_vm5, %v298_v38  ;;  %v590_v38 = vld [vmem:[%s13264_s0 + $0x14a] sm:$0xff] }
  0x76   :  { %353 = vrot.lane.b32.xlu0 %v194_v35, %s8366_s13  ;;  %739 = vrot.lane.b32.xlu1 %v580_v36, %s8369_s18  ;;  %v204_v35 = vld [vmem:[%s13264_s0 + $0x149] sm:$0xff] }
  0x78   :  { %v682_v42 = vpop.permute.xlu0 %681  ;;  %v684_v43 = vpop.permute.xlu1 %683 }
  0x79   :  { %872 = vst.msk [vmem:[#allocation2 + $0x10] sm:$0xff] %vm869_vm6, %v682_v42  ;;  %873 = vst.msk [vmem:[#allocation2 + $0x18] sm:$0xff] %vm869_vm6, %v684_v43 }
  0x7a   :  { %355 = vrot.lane.b32.xlu0 %v195_v40, %s8366_s13  ;;  %741 = vrot.lane.b32.xlu1 %v581_v41, %s8369_s18  ;;  %v205_v41 = vld [vmem:[%s13264_s0 + $0x151] sm:$0xff] }
  0x7c   :  { %v300_v47 = vpop.permute.xlu0 %299  ;;  %v686_v48 = vpop.permute.xlu1 %685 }
  0x7d   :  { %488 = vst.msk [vmem:[#allocation2 + $0x20] sm:$0xff] %vm483_vm5, %v300_v47  ;;  %v206_v47 = vld [vmem:[%s13264_s0 + $0x159] sm:$0xff] }
  0x7e   :  { %874 = vst.msk [vmem:[#allocation2 + $0x20] sm:$0xff] %vm869_vm6, %v686_v48  ;;  %357 = vrot.lane.b32.xlu0 %v196_v45, %s8366_s13  ;;  %743 = vrot.lane.b32.xlu1 %v582_v46, %s8369_s18  ;;  %v79_v45 = vld [vmem:[%s13264_s0 + $0x168] sm:$0xff] }
  0x7f   :  { %144 = vst.msk [vmem:[#allocation2 + $0x168] sm:$0xff] %vm98_vm1, %v79_v45 }
  0x80   :  { %v8854_v54 = vld [vmem:[#allocation2 + $0x10] sm:$0xff]  ;;  %v302_v55 = vpop.permute.xlu0 %301  ;;  %v688_v56 = vpop.permute.xlu1 %687  ;;  %v8869_v59 = vld [vmem:[#allocation2 + $0x18] sm:$0xff] }
  0x81   :  { %6872 = vmatmul.mubr.msk.f32.vlgmr.msra.gmra.mrb[0].mxu0 %vm1004_vm7, %v8854_v54  ;;  %489 = vst.msk [vmem:[#allocation2 + $0x28] sm:$0xff] %vm483_vm5, %v302_v55 }
  0x82   :  { %875 = vst.msk [vmem:[#allocation2 + $0x28] sm:$0xff] %vm869_vm6, %v688_v56  ;;  %6874 = vmatprep.mubr.msk.f32.mxu0 %vm8367_vm0, %v13275_v5  ;;  %359 = vrot.lane.b32.xlu0 %v197_v52, %s8366_s13 }
  0x83   :  { %745 = vrot.lane.b32.xlu1 %v583_v57, %s8369_s18  ;;  %7705 = vmatpush3.bf16.msk.msra.mxu0 %vm8496_vm4, %v7703_v53  ;;  %v207_v53 = vld [vmem:[%s13264_s0 + $0x161] sm:$0xff] }
  0x84   :  { %v304_v61 = vpop.permute.xlu0 %303  ;;  %v690_v62 = vpop.permute.xlu1 %689  ;;  %7706 = vmatprep.subr.bf16.mxu0 %v13277_v2  ;;  %v593_v57 = vld [vmem:[%s13264_s0 + $0x162] sm:$0xff] }
  0x85   :  { %6875 = vmatmul.mubr.msk.f32.gmra.mrb[2].mxu0 %vm1004_vm7, %v8869_v59  ;;  %490 = vst.msk [vmem:[#allocation2 + $0x30] sm:$0xff] %vm483_vm5, %v304_v61  ;;  %v8892_v1 = vld [vmem:[#allocation2 + $0x20] sm:$0xff]  ;;  %v208_v61 = vld [vmem:[%s13264_s0 + $0x169] sm:$0xff] }
  0x86   :  { %876 = vst.msk [vmem:[#allocation2 + $0x30] sm:$0xff] %vm869_vm6, %v690_v62  ;;  %6877 = vmatprep.mubr.msk.f32.mxu0 %vm8367_vm0, %v13275_v5  ;;  %361 = vrot.lane.b32.xlu0 %v198_v60, %s8366_s13 }
  0x87   :  { %747 = vrot.lane.b32.xlu1 %v584_v63, %s8369_s18 }
  0x88   :  { %v306_v4 = vpop.permute.xlu0 %305  ;;  %v692_v6 = vpop.permute.xlu1 %691 }
  0x89   :  { %6878 = vmatmul.mubr.msk.f32.gmra.mrb[4].mxu0 %vm1004_vm7, %v8892_v1  ;;  %491 = vst.msk [vmem:[#allocation2 + $0x38] sm:$0xff] %vm483_vm5, %v306_v4  ;;  %v8912_v9 = vld [vmem:[#allocation2 + $0x28] sm:$0xff] }
  0x8a   :  { %877 = vst.msk [vmem:[#allocation2 + $0x38] sm:$0xff] %vm869_vm6, %v692_v6  ;;  %6880 = vmatprep.mubr.msk.f32.mxu0 %vm8367_vm0, %v13275_v5  ;;  %363 = vrot.lane.b32.xlu0 %v199_v3, %s8366_s13  ;;  %v82_v3 = vld [vmem:[%s13264_s0 + $0x180] sm:$0xff]  ;;  %v209_v6 = vld [vmem:[%s13264_s0 + $0x171] sm:$0xff] }
  0x8b   :  { %749 = vrot.lane.b32.xlu1 %v585_v7, %s8369_s18  ;;  %147 = vst.msk [vmem:[#allocation2 + $0x180] sm:$0xff] %vm98_vm1, %v82_v3 }
  0x8c   :  { %v308_v11 = vpop.permute.xlu0 %307  ;;  %v694_v12 = vpop.permute.xlu1 %693 }
  0x8d   :  { %6881 = vmatmul.mubr.msk.f32.gmra.mrb[6].mxu0 %vm1004_vm7, %v8912_v9  ;;  %492 = vst.msk [vmem:[#allocation2 + $0x40] sm:$0xff] %vm483_vm5, %v308_v11  ;;  %v8932_v15 = vld [vmem:[#allocation2 + $0x30] sm:$0xff]  ;;  %v83_v11 = vld [vmem:[%s13264_s0 + $0x188] sm:$0xff] }
  0x8e   :  { %878 = vst.msk [vmem:[#allocation2 + $0x40] sm:$0xff] %vm869_vm6, %v694_v12  ;;  %6883 = vmatprep.mubr.msk.f32.mxu0 %vm8367_vm0, %v13275_v5  ;;  %365 = vrot.lane.b32.xlu0 %v200_v10, %s8366_s13  ;;  %v595_v10 = vld [vmem:[%s13264_s0 + $0x172] sm:$0xff] }
  0x8f   :  { %751 = vrot.lane.b32.xlu1 %v586_v13, %s8369_s18  ;;  %148 = vst.msk [vmem:[#allocation2 + $0x188] sm:$0xff] %vm98_vm1, %v83_v11  ;;  %v210_v13 = vld [vmem:[%s13264_s0 + $0x179] sm:$0xff] }
  0x90   :  { %v310_v17 = vpop.permute.xlu0 %309  ;;  %v696_v18 = vpop.permute.xlu1 %695 }
  0x91   :  { %6884 = vmatmul.mubr.msk.f32.gmra.mrb[8].mxu0 %vm1004_vm7, %v8932_v15  ;;  %493 = vst.msk [vmem:[#allocation2 + $0x48] sm:$0xff] %vm483_vm5, %v310_v17  ;;  %v8952_v22 = vld [vmem:[#allocation2 + $0x38] sm:$0xff] }
  0x92   :  { %879 = vst.msk [vmem:[#allocation2 + $0x48] sm:$0xff] %vm869_vm6, %v696_v18  ;;  %6886 = vmatprep.mubr.msk.f32.mxu0 %vm8367_vm0, %v13275_v5  ;;  %367 = vrot.lane.b32.xlu0 %v201_v16, %s8366_s13  ;;  %v596_v17 = vld [vmem:[%s13264_s0 + $0x17a] sm:$0xff] }
  0x93   :  { %753 = vrot.lane.b32.xlu1 %v587_v19, %s8369_s18  ;;  %v34_v18 = vld [vmem:[%s13264_s0] sm:$0xff] }
  0x94   :  { %v312_v24 = vpop.permute.xlu0 %311  ;;  %v698_v25 = vpop.permute.xlu1 %697  ;;  %99 = vst.msk [vmem:[#allocation2] sm:$0xff] %vm98_vm1, %v34_v18 }
  0x95   :  { %6887 = vmatmul.mubr.msk.f32.gmra.mrb[10].mxu0 %vm1004_vm7, %v8952_v22  ;;  %494 = vst.msk [vmem:[#allocation2 + $0x50] sm:$0xff] %vm483_vm5, %v312_v24  ;;  %v8972_v28 = vld [vmem:[#allocation2 + $0x40] sm:$0xff] }
  0x96   :  { %880 = vst.msk [vmem:[#allocation2 + $0x50] sm:$0xff] %vm869_vm6, %v698_v25  ;;  %6889 = vmatprep.mubr.msk.f32.mxu0 %vm8367_vm0, %v13275_v5  ;;  %369 = vrot.lane.b32.xlu0 %v202_v23, %s8366_s13  ;;  %v597_v25 = vld [vmem:[%s13264_s0 + $0x182] sm:$0xff] }
  0x97   :  { %755 = vrot.lane.b32.xlu1 %v588_v26, %s8369_s18  ;;  %v35_v26 = vld [vmem:[%s13264_s0 + $0x8] sm:$0xff] }
  0x98   :  { %v314_v30 = vpop.permute.xlu0 %313  ;;  %v700_v31 = vpop.permute.xlu1 %699  ;;  %100 = vst.msk [vmem:[#allocation2 + $0x8] sm:$0xff] %vm98_vm1, %v35_v26 }
  0x99   :  { %6890 = vmatmul.mubr.msk.f32.gmra.mrb[12].mxu0 %vm1004_vm7, %v8972_v28  ;;  %495 = vst.msk [vmem:[#allocation2 + $0x58] sm:$0xff] %vm483_vm5, %v314_v30  ;;  %v8992_v34 = vld [vmem:[#allocation2 + $0x48] sm:$0xff] }
  0x9a   :  { %881 = vst.msk [vmem:[#allocation2 + $0x58] sm:$0xff] %vm869_vm6, %v700_v31  ;;  %6892 = vmatprep.mubr.msk.f32.mxu0 %vm8367_vm0, %v13275_v5  ;;  %371 = vrot.lane.b32.xlu0 %v203_v29, %s8366_s13  ;;  %v212_v29 = vld [vmem:[%s13264_s0 + $0x189] sm:$0xff] }
  0x9b   :  { %757 = vrot.lane.b32.xlu1 %v589_v32, %s8369_s18  ;;  %v598_v32 = vld [vmem:[%s13264_s0 + $0x18a] sm:$0xff] }
  0x9c   :  { %v316_v36 = vpop.permute.xlu0 %315  ;;  %v702_v37 = vpop.permute.xlu1 %701 }
  0x9d   :  { %6893 = vmatmul.mubr.msk.f32.gmra.mrb[14].mxu0 %vm1004_vm7, %v8992_v34  ;;  %496 = vst.msk [vmem:[#allocation2 + $0x60] sm:$0xff] %vm483_vm5, %v316_v36  ;;  %v9012_v40 = vld [vmem:[#allocation2 + $0x50] sm:$0xff] }
  0x9e   :  { %882 = vst.msk [vmem:[#allocation2 + $0x60] sm:$0xff] %vm869_vm6, %v702_v37  ;;  %6895 = vmatprep.mubr.msk.f32.mxu0 %vm8367_vm0, %v13275_v5  ;;  %373 = vrot.lane.b32.xlu0 %v204_v35, %s8366_s13  ;;  %v163_v35 = vld [vmem:[%s13264_s0 + $0x1] sm:$0xff] }
  0x9f   :  { %759 = vrot.lane.b32.xlu1 %v590_v38, %s8369_s18  ;;  %v549_v38 = vld [vmem:[%s13264_s0 + $0x2] sm:$0xff] }
  0xa0   :  { %v318_v42 = vpop.permute.xlu0 %317  ;;  %v704_v43 = vpop.permute.xlu1 %703 }
  0xa1   :  { %6896 = vmatmul.mubr.msk.f32.gmra.mrb[16].mxu0 %vm1004_vm7, %v9012_v40  ;;  %497 = vst.msk [vmem:[#allocation2 + $0x68] sm:$0xff] %vm483_vm5, %v318_v42  ;;  %v9032_v46 = vld [vmem:[#allocation2 + $0x58] sm:$0xff] }
  0xa2   :  { %883 = vst.msk [vmem:[#allocation2 + $0x68] sm:$0xff] %vm869_vm6, %v704_v43  ;;  %6898 = vmatprep.mubr.msk.f32.mxu0 %vm8367_vm0, %v13275_v5  ;;  %375 = vrot.lane.b32.xlu0 %v205_v41, %s8366_s13  ;;  %v164_v41 = vld [vmem:[%s13264_s0 + $0x9] sm:$0xff] }
  0xa3   :  { %761 = vrot.lane.b32.xlu1 %v591_v44, %s8369_s18  ;;  %v550_v44 = vld [vmem:[%s13264_s0 + $0xa] sm:$0xff] }
  0xa4   :  { %v320_v48 = vpop.permute.xlu0 %319  ;;  %v706_v49 = vpop.permute.xlu1 %705 }
  0xa5   :  { %6899 = vmatmul.mubr.msk.f32.gmra.mrb[18].mxu0 %vm1004_vm7, %v9032_v46  ;;  %498 = vst.msk [vmem:[#allocation2 + $0x70] sm:$0xff] %vm483_vm5, %v320_v48  ;;  %v9052_v52 = vld [vmem:[#allocation2 + $0x60] sm:$0xff] }
  0xa6   :  { %884 = vst.msk [vmem:[#allocation2 + $0x70] sm:$0xff] %vm869_vm6, %v706_v49  ;;  %6901 = vmatprep.mubr.msk.f32.mxu0 %vm8367_vm0, %v13275_v5  ;;  %377 = vrot.lane.b32.xlu0 %v206_v47, %s8366_s13 }
  0xa7   :  { %763 = vrot.lane.b32.xlu1 %v592_v50, %s8369_s18 }
  0xa8   :  { %v322_v55 = vpop.permute.xlu0 %321  ;;  %v708_v56 = vpop.permute.xlu1 %707 }
  0xa9   :  { %6902 = vmatmul.mubr.msk.f32.gmra.mrb[20].mxu0 %vm1004_vm7, %v9052_v52  ;;  %499 = vst.msk [vmem:[#allocation2 + $0x78] sm:$0xff] %vm483_vm5, %v322_v55  ;;  %v9072_v60 = vld [vmem:[#allocation2 + $0x68] sm:$0xff] }
  0xaa   :  { %885 = vst.msk [vmem:[#allocation2 + $0x78] sm:$0xff] %vm869_vm6, %v708_v56  ;;  %6904 = vmatprep.mubr.msk.f32.mxu0 %vm8367_vm0, %v13275_v5  ;;  %379 = vrot.lane.b32.xlu0 %v207_v53, %s8366_s13 }
  0xab   :  { %765 = vrot.lane.b32.xlu1 %v593_v57, %s8369_s18 }
  0xac   :  { %v324_v62 = vpop.permute.xlu0 %323  ;;  %v710_v63 = vpop.permute.xlu1 %709 }
  0xad   :  { %6905 = vmatmul.mubr.msk.f32.gmra.mrb[22].mxu0 %vm1004_vm7, %v9072_v60  ;;  %500 = vst.msk [vmem:[#allocation2 + $0x80] sm:$0xff] %vm483_vm5, %v324_v62  ;;  %v9092_v4 = vld [vmem:[#allocation2 + $0x70] sm:$0xff] }
  0xae   :  { %886 = vst.msk [vmem:[#allocation2 + $0x80] sm:$0xff] %vm869_vm6, %v710_v63  ;;  %6907 = vmatprep.mubr.msk.f32.mxu0 %vm8367_vm0, %v13275_v5  ;;  %381 = vrot.lane.b32.xlu0 %v208_v61, %s8366_s13 }
  0xaf   :  { %767 = vrot.lane.b32.xlu1 %v594_v0, %s8369_s18 }
  0xb0   :  { %v326_v7 = vpop.permute.xlu0 %325  ;;  %v712_v8 = vpop.permute.xlu1 %711 }
  0xb1   :  { %6908 = vmatmul.mubr.msk.f32.gmra.mrb[24].mxu0 %vm1004_vm7, %v9092_v4  ;;  %501 = vst.msk [vmem:[#allocation2 + $0x88] sm:$0xff] %vm483_vm5, %v326_v7  ;;  %v9112_v12 = vld [vmem:[#allocation2 + $0x78] sm:$0xff] }
  0xb2   :  { %887 = vst.msk [vmem:[#allocation2 + $0x88] sm:$0xff] %vm869_vm6, %v712_v8  ;;  %6910 = vmatprep.mubr.msk.f32.mxu0 %vm8367_vm0, %v13275_v5  ;;  %383 = vrot.lane.b32.xlu0 %v209_v6, %s8366_s13 }
  0xb3   :  { %769 = vrot.lane.b32.xlu1 %v595_v10, %s8369_s18 }
  0xb4   :  { %v328_v14 = vpop.permute.xlu0 %327  ;;  %v714_v16 = vpop.permute.xlu1 %713 }
  0xb5   :  { %6911 = vmatmul.mubr.msk.f32.gmra.mrb[26].mxu0 %vm1004_vm7, %v9112_v12  ;;  %502 = vst.msk [vmem:[#allocation2 + $0x90] sm:$0xff] %vm483_vm5, %v328_v14  ;;  %v9132_v19 = vld [vmem:[#allocation2 + $0x80] sm:$0xff] }
  0xb6   :  { %888 = vst.msk [vmem:[#allocation2 + $0x90] sm:$0xff] %vm869_vm6, %v714_v16  ;;  %6913 = vmatprep.mubr.msk.f32.mxu0 %vm8367_vm0, %v13275_v5  ;;  %385 = vrot.lane.b32.xlu0 %v210_v13, %s8366_s13 }
  0xb7   :  { %771 = vrot.lane.b32.xlu1 %v596_v17, %s8369_s18 }
  0xb8   :  { %v330_v23 = vpop.permute.xlu0 %329  ;;  %v716_v24 = vpop.permute.xlu1 %715 }
  0xb9   :  { %6914 = vmatmul.mubr.msk.f32.gmra.mrb[28].mxu0 %vm1004_vm7, %v9132_v19  ;;  %503 = vst.msk [vmem:[#allocation2 + $0x98] sm:$0xff] %vm483_vm5, %v330_v23  ;;  %v9152_v27 = vld [vmem:[#allocation2 + $0x88] sm:$0xff] }
  0xba   :  { %889 = vst.msk [vmem:[#allocation2 + $0x98] sm:$0xff] %vm869_vm6, %v716_v24  ;;  %6916 = vmatprep.mubr.msk.f32.mxu0 %vm8367_vm0, %v13275_v5  ;;  %387 = vrot.lane.b32.xlu0 %v211_v21, %s8366_s13 }
  0xbb   :  { %773 = vrot.lane.b32.xlu1 %v597_v25, %s8369_s18 }
  0xbc   :  { %v332_v30 = vpop.permute.xlu0 %331  ;;  %v718_v31 = vpop.permute.xlu1 %717 }
  0xbd   :  { %6917 = vmatmul.mubr.msk.f32.gmra.mrb[30].mxu0 %vm1004_vm7, %v9152_v27  ;;  %504 = vst.msk [vmem:[#allocation2 + $0xa0] sm:$0xff] %vm483_vm5, %v332_v30  ;;  %v9169_v33 = vld [vmem:[#allocation2 + $0x90] sm:$0xff] }
  0xbe   :  { %890 = vst.msk [vmem:[#allocation2 + $0xa0] sm:$0xff] %vm869_vm6, %v718_v31  ;;  %6919 = vmatprep.mubr.msk.f32.mxu0 %vm8367_vm0, %v13275_v5  ;;  %389 = vrot.lane.b32.xlu0 %v212_v29, %s8366_s13 }
  0xbf   :  { %775 = vrot.lane.b32.xlu1 %v598_v32, %s8369_s18 }
  0xc0   :  { %v334_v36 = vpop.permute.xlu0 %333  ;;  %v720_v37 = vpop.permute.xlu1 %719 }
  0xc1   :  { %6920 = vmatmul.mubr.msk.f32.gmra.mrb[32].mxu0 %vm1004_vm7, %v9169_v33  ;;  %505 = vst.msk [vmem:[#allocation2 + $0xa8] sm:$0xff] %vm483_vm5, %v334_v36  ;;  %v9185_v39 = vld [vmem:[#allocation2 + $0x98] sm:$0xff] }
  0xc2   :  { %891 = vst.msk [vmem:[#allocation2 + $0xa8] sm:$0xff] %vm869_vm6, %v720_v37  ;;  %6922 = vmatprep.mubr.msk.f32.mxu0 %vm8367_vm0, %v13275_v5  ;;  %291 = vrot.lane.b32.xlu0 %v163_v35, %s8366_s13 }
  0xc3   :  { %677 = vrot.lane.b32.xlu1 %v549_v38, %s8369_s18 }
  0xc4   :  { %v336_v42 = vpop.permute.xlu0 %335  ;;  %v722_v43 = vpop.permute.xlu1 %721 }
  0xc5   :  { %6923 = vmatmul.mubr.msk.f32.gmra.mrb[34].mxu0 %vm1004_vm7, %v9185_v39  ;;  %506 = vst.msk [vmem:[#allocation2 + $0xb0] sm:$0xff] %vm483_vm5, %v336_v42  ;;  %v9201_v45 = vld [vmem:[#allocation2 + $0xa0] sm:$0xff] }
  0xc6   :  { %892 = vst.msk [vmem:[#allocation2 + $0xb0] sm:$0xff] %vm869_vm6, %v722_v43  ;;  %6925 = vmatprep.mubr.msk.f32.mxu0 %vm8367_vm0, %v13275_v5  ;;  %293 = vrot.lane.b32.xlu0 %v164_v41, %s8366_s13 }
  0xc7   :  { %679 = vrot.lane.b32.xlu1 %v550_v44, %s8369_s18 }
  0xc8   :  { %v338_v47 = vpop.permute.xlu0 %337  ;;  %v724_v48 = vpop.permute.xlu1 %723 }
  0xc9   :  { %6926 = vmatmul.mubr.msk.f32.gmra.mrb[36].mxu0 %vm1004_vm7, %v9201_v45  ;;  %507 = vst.msk [vmem:[#allocation2 + $0xb8] sm:$0xff] %vm483_vm5, %v338_v47  ;;  %v9210_v49 = vld [vmem:[#allocation2 + $0xa8] sm:$0xff] }
  0xca   :  { %893 = vst.msk [vmem:[#allocation2 + $0xb8] sm:$0xff] %vm869_vm6, %v724_v48  ;;  %6928 = vmatprep.mubr.msk.f32.mxu0 %vm8367_vm0, %v13275_v5 }
  0xcc   :  { %v340_v50 = vpop.permute.xlu0 %339  ;;  %v726_v51 = vpop.permute.xlu1 %725 }
  0xcd   :  { %6929 = vmatmul.mubr.msk.f32.gmra.mrb[38].mxu0 %vm1004_vm7, %v9210_v49  ;;  %508 = vst.msk [vmem:[#allocation2 + $0xc0] sm:$0xff] %vm483_vm5, %v340_v50  ;;  %v9218_v53 = vld [vmem:[#allocation2 + $0xb0] sm:$0xff] }
  0xce   :  { %894 = vst.msk [vmem:[#allocation2 + $0xc0] sm:$0xff] %vm869_vm6, %v726_v51  ;;  %6931 = vmatprep.mubr.msk.f32.mxu0 %vm8367_vm0, %v13275_v5 }
  0xd0   :  { %v342_v55 = vpop.permute.xlu0 %341  ;;  %v728_v56 = vpop.permute.xlu1 %727 }
  0xd1   :  { %6932 = vmatmul.mubr.msk.f32.gmra.mrb[40].mxu0 %vm1004_vm7, %v9218_v53  ;;  %509 = vst.msk [vmem:[#allocation2 + $0xc8] sm:$0xff] %vm483_vm5, %v342_v55  ;;  %v9226_v57 = vld [vmem:[#allocation2 + $0xb8] sm:$0xff] }
  0xd2   :  { %895 = vst.msk [vmem:[#allocation2 + $0xc8] sm:$0xff] %vm869_vm6, %v728_v56  ;;  %6934 = vmatprep.mubr.msk.f32.mxu0 %vm8367_vm0, %v13275_v5 }
  0xd4   :  { %v344_v58 = vpop.permute.xlu0 %343  ;;  %v730_v61 = vpop.permute.xlu1 %729 }
  0xd5   :  { %6935 = vmatmul.mubr.msk.f32.gmra.mrb[42].mxu0 %vm1004_vm7, %v9226_v57  ;;  %510 = vst.msk [vmem:[#allocation2 + $0xd0] sm:$0xff] %vm483_vm5, %v344_v58  ;;  %v9234_v62 = vld [vmem:[#allocation2 + $0xc0] sm:$0xff] }
  0xd6   :  { %896 = vst.msk [vmem:[#allocation2 + $0xd0] sm:$0xff] %vm869_vm6, %v730_v61  ;;  %6937 = vmatprep.mubr.msk.f32.mxu0 %vm8367_vm0, %v13275_v5 }
  0xd8   :  { %v346_v63 = vpop.permute.xlu0 %345  ;;  %v732_v0 = vpop.permute.xlu1 %731 }
  0xd9   :  { %6938 = vmatmul.mubr.msk.f32.gmra.mrb[44].mxu0 %vm1004_vm7, %v9234_v62  ;;  %511 = vst.msk [vmem:[#allocation2 + $0xd8] sm:$0xff] %vm483_vm5, %v346_v63  ;;  %v9242_v3 = vld [vmem:[#allocation2 + $0xc8] sm:$0xff]  ;;  %v213_v63 = vld [vmem:[%s13264_s0 + $0x191] sm:$0xff] }
  0xda   :  { %897 = vst.msk [vmem:[#allocation2 + $0xd8] sm:$0xff] %vm869_vm6, %v732_v0  ;;  %6940 = vmatprep.mubr.msk.f32.mxu0 %vm8367_vm0, %v13275_v5  ;;  %391 = vrot.lane.b32.xlu0 %v213_v63, %s8366_s13 }
  0xdc   :  { %v348_v6 = vpop.permute.xlu0 %347  ;;  %v734_v7 = vpop.permute.xlu1 %733 }
  0xdd   :  { %6941 = vmatmul.mubr.msk.f32.gmra.mrb[46].mxu0 %vm1004_vm7, %v9242_v3  ;;  %512 = vst.msk [vmem:[#allocation2 + $0xe0] sm:$0xff] %vm483_vm5, %v348_v6  ;;  %v9250_v8 = vld [vmem:[#allocation2 + $0xd0] sm:$0xff] }
  0xde   :  { %898 = vst.msk [vmem:[#allocation2 + $0xe0] sm:$0xff] %vm869_vm6, %v734_v7  ;;  %6943 = vmatprep.mubr.msk.f32.mxu0 %vm8367_vm0, %v13275_v5  ;;  %v599_v6 = vld [vmem:[%s13264_s0 + $0x192] sm:$0xff] }
  0xdf   :  { %777 = vrot.lane.b32.xlu1 %v599_v6, %s8369_s18  ;;  %v604_v6 = vld [vmem:[%s13264_s0 + $0x1ba] sm:$0xff] }
  0xe0   :  { %v350_v10 = vpop.permute.xlu0 %349  ;;  %v736_v11 = vpop.permute.xlu1 %735 }
  0xe1   :  { %6944 = vmatmul.mubr.msk.f32.gmra.mrb[48].mxu0 %vm1004_vm7, %v9250_v8  ;;  %513 = vst.msk [vmem:[#allocation2 + $0xe8] sm:$0xff] %vm483_vm5, %v350_v10  ;;  %v9258_v13 = vld [vmem:[#allocation2 + $0xd8] sm:$0xff] }
  0xe2   :  { %899 = vst.msk [vmem:[#allocation2 + $0xe8] sm:$0xff] %vm869_vm6, %v736_v11  ;;  %6946 = vmatprep.mubr.msk.f32.mxu0 %vm8367_vm0, %v13275_v5  ;;  %v214_v11 = vld [vmem:[%s13264_s0 + $0x199] sm:$0xff] }
  0xe3   :  { %393 = vrot.lane.b32.xlu0 %v214_v11, %s8366_s13  ;;  %v219_v11 = vld [vmem:[%s13264_s0 + $0x1c1] sm:$0xff] }
  0xe4   :  { %v352_v14 = vpop.permute.xlu0 %351  ;;  %v738_v16 = vpop.permute.xlu1 %737 }
  0xe5   :  { %6947 = vmatmul.mubr.msk.f32.gmra.mrb[50].mxu0 %vm1004_vm7, %v9258_v13  ;;  %514 = vst.msk [vmem:[#allocation2 + $0xf0] sm:$0xff] %vm483_vm5, %v352_v14  ;;  %v9266_v17 = vld [vmem:[#allocation2 + $0xe0] sm:$0xff] }
  0xe6   :  { %900 = vst.msk [vmem:[#allocation2 + $0xf0] sm:$0xff] %vm869_vm6, %v738_v16  ;;  %6949 = vmatprep.mubr.msk.f32.mxu0 %vm8367_vm0, %v13275_v5  ;;  %v600_v16 = vld [vmem:[%s13264_s0 + $0x19a] sm:$0xff] }
  0xe7   :  { %779 = vrot.lane.b32.xlu1 %v600_v16, %s8369_s18 }
  0xe8   :  { %v354_v18 = vpop.permute.xlu0 %353  ;;  %v740_v21 = vpop.permute.xlu1 %739 }
  0xe9   :  { %6950 = vmatmul.mubr.msk.f32.gmra.mrb[52].mxu0 %vm1004_vm7, %v9266_v17  ;;  %515 = vst.msk [vmem:[#allocation2 + $0xf8] sm:$0xff] %vm483_vm5, %v354_v18  ;;  %v9274_v23 = vld [vmem:[#allocation2 + $0xe8] sm:$0xff] }
  0xea   :  { %901 = vst.msk [vmem:[#allocation2 + $0xf8] sm:$0xff] %vm869_vm6, %v740_v21  ;;  %6952 = vmatprep.mubr.msk.f32.mxu0 %vm8367_vm0, %v13275_v5 }
  0xec   :  { %v356_v24 = vpop.permute.xlu0 %355  ;;  %v742_v25 = vpop.permute.xlu1 %741 }
  0xed   :  { %6953 = vmatmul.mubr.msk.f32.gmra.mrb[54].mxu0 %vm1004_vm7, %v9274_v23  ;;  %516 = vst.msk [vmem:[#allocation2 + $0x100] sm:$0xff] %vm483_vm5, %v356_v24  ;;  %v9282_v26 = vld [vmem:[#allocation2 + $0xf0] sm:$0xff] }
  0xee   :  { %902 = vst.msk [vmem:[#allocation2 + $0x100] sm:$0xff] %vm869_vm6, %v742_v25  ;;  %6955 = vmatprep.mubr.msk.f32.mxu0 %vm8367_vm0, %v13275_v5  ;;  %v215_v25 = vld [vmem:[%s13264_s0 + $0x1a1] sm:$0xff] }
  0xef   :  { %395 = vrot.lane.b32.xlu0 %v215_v25, %s8366_s13 }
  0xf0   :  { %v358_v29 = vpop.permute.xlu0 %357  ;;  %v744_v30 = vpop.permute.xlu1 %743 }
  0xf1   :  { %6956 = vmatmul.mubr.msk.f32.gmra.mrb[56].mxu0 %vm1004_vm7, %v9282_v26  ;;  %517 = vst.msk [vmem:[#allocation2 + $0x108] sm:$0xff] %vm483_vm5, %v358_v29  ;;  %v9290_v31 = vld [vmem:[#allocation2 + $0xf8] sm:$0xff]  ;;  %v601_v29 = vld [vmem:[%s13264_s0 + $0x1a2] sm:$0xff] }
  0xf2   :  { %903 = vst.msk [vmem:[#allocation2 + $0x108] sm:$0xff] %vm869_vm6, %v744_v30  ;;  %6958 = vmatprep.mubr.msk.f32.mxu0 %vm8367_vm0, %v13275_v5  ;;  %781 = vrot.lane.b32.xlu1 %v601_v29, %s8369_s18  ;;  %v220_v29 = vld [vmem:[%s13264_s0 + $0x1c9] sm:$0xff] }
  0xf4   :  { %v360_v32 = vpop.permute.xlu0 %359 }
  0xf5   :  { %6959 = vmatmul.mubr.msk.f32.gmra.mrb[58].mxu0 %vm1004_vm7, %v9290_v31  ;;  %518 = vst.msk [vmem:[#allocation2 + $0x110] sm:$0xff] %vm483_vm5, %v360_v32  ;;  %v746_v35 = vpop.permute.xlu1 %745  ;;  %v9298_v36 = vld [vmem:[#allocation2 + $0x100] sm:$0xff] }
  0xf6   :  { %904 = vst.msk [vmem:[#allocation2 + $0x110] sm:$0xff] %vm869_vm6, %v746_v35  ;;  %6961 = vmatprep.mubr.msk.f32.mxu0 %vm8367_vm0, %v13275_v5  ;;  %v216_v35 = vld [vmem:[%s13264_s0 + $0x1a9] sm:$0xff] }
  0xf7   :  { %397 = vrot.lane.b32.xlu0 %v216_v35, %s8366_s13 }
  0xf8   :  { %v362_v37 = vpop.permute.xlu0 %361 }
  0xf9   :  { %6962 = vmatmul.mubr.msk.f32.gmra.mrb[60].mxu0 %vm1004_vm7, %v9298_v36  ;;  %519 = vst.msk [vmem:[#allocation2 + $0x118] sm:$0xff] %vm483_vm5, %v362_v37  ;;  %v748_v38 = vpop.permute.xlu1 %747  ;;  %v9306_v41 = vld [vmem:[#allocation2 + $0x108] sm:$0xff] }
  0xfa   :  { %905 = vst.msk [vmem:[#allocation2 + $0x118] sm:$0xff] %vm869_vm6, %v748_v38  ;;  %6964 = vmatprep.mubr.msk.f32.mxu0 %vm8367_vm0, %v13275_v5  ;;  %v602_v38 = vld [vmem:[%s13264_s0 + $0x1aa] sm:$0xff] }
  0xfb   :  { %783 = vrot.lane.b32.xlu1 %v602_v38, %s8369_s18 }
  0xfc   :  { %v364_v42 = vpop.permute.xlu0 %363 }
  0xfd   :  { %6965 = vmatmul.mubr.msk.f32.gmra.mrb[62].mxu0 %vm1004_vm7, %v9306_v41  ;;  %520 = vst.msk [vmem:[#allocation2 + $0x120] sm:$0xff] %vm483_vm5, %v364_v42  ;;  %v750_v43 = vpop.permute.xlu1 %749  ;;  %v9314_v44 = vld [vmem:[#allocation2 + $0x110] sm:$0xff] }
  0xfe   :  { %906 = vst.msk [vmem:[#allocation2 + $0x120] sm:$0xff] %vm869_vm6, %v750_v43  ;;  %6967 = vmatprep.mubr.msk.f32.mxu0 %vm8367_vm0, %v13275_v5 }
 0x100   :  { %v366_v47 = vpop.permute.xlu0 %365 }
 0x101   :  { %6968 = vmatmul.mubr.msk.f32.gmra.mrb[64].mxu0 %vm1004_vm7, %v9314_v44  ;;  %521 = vst.msk [vmem:[#allocation2 + $0x128] sm:$0xff] %vm483_vm5, %v366_v47  ;;  %v752_v48 = vpop.permute.xlu1 %751  ;;  %v9322_v50 = vld [vmem:[#allocation2 + $0x118] sm:$0xff] }
 0x102   :  { %907 = vst.msk [vmem:[#allocation2 + $0x128] sm:$0xff] %vm869_vm6, %v752_v48  ;;  %6970 = vmatprep.mubr.msk.f32.mxu0 %vm8367_vm0, %v13275_v5  ;;  %v217_v47 = vld [vmem:[%s13264_s0 + $0x1b1] sm:$0xff] }
 0x103   :  { %399 = vrot.lane.b32.xlu0 %v217_v47, %s8366_s13  ;;  %v607_v47 = vld [vmem:[%s13264_s0 + $0x1d2] sm:$0xff] }
 0x104   :  { %v368_v51 = vpop.permute.xlu0 %367 }
 0x105   :  { %6971 = vmatmul.mubr.msk.f32.gmra.mrb[66].mxu0 %vm1004_vm7, %v9322_v50  ;;  %522 = vst.msk [vmem:[#allocation2 + $0x130] sm:$0xff] %vm483_vm5, %v368_v51  ;;  %v754_v55 = vpop.permute.xlu1 %753  ;;  %v9330_v56 = vld [vmem:[#allocation2 + $0x120] sm:$0xff]  ;;  %v603_v51 = vld [vmem:[%s13264_s0 + $0x1b2] sm:$0xff] }
 0x106   :  { %908 = vst.msk [vmem:[#allocation2 + $0x130] sm:$0xff] %vm869_vm6, %v754_v55  ;;  %6973 = vmatprep.mubr.msk.f32.mxu0 %vm8367_vm0, %v13275_v5  ;;  %785 = vrot.lane.b32.xlu1 %v603_v51, %s8369_s18 }
 0x108   :  { %v370_v58 = vpop.permute.xlu0 %369 }
 0x109   :  { %6974 = vmatmul.mubr.msk.f32.gmra.mrb[68].mxu0 %vm1004_vm7, %v9330_v56  ;;  %523 = vst.msk [vmem:[#allocation2 + $0x138] sm:$0xff] %vm483_vm5, %v370_v58  ;;  %v756_v61 = vpop.permute.xlu1 %755  ;;  %v9341_v0 = vld [vmem:[#allocation2 + $0x128] sm:$0xff] }
 0x10a   :  { %909 = vst.msk [vmem:[#allocation2 + $0x138] sm:$0xff] %vm869_vm6, %v756_v61  ;;  %6976 = vmatprep.mubr.msk.f32.mxu0 %vm8367_vm0, %v13275_v5  ;;  %v218_v61 = vld [vmem:[%s13264_s0 + $0x1b9] sm:$0xff]  ;;  %787 = vrot.lane.b32.xlu1 %v604_v6, %s8369_s18 }
 0x10b   :  { %401 = vrot.lane.b32.xlu0 %v218_v61, %s8366_s13  ;;  %v608_v6 = vld [vmem:[%s13264_s0 + $0x1da] sm:$0xff] }
 0x10c   :  { %v372_v7 = vpop.permute.xlu0 %371 }
 0x10d   :  { %6977 = vmatmul.mubr.msk.f32.gmra.mrb[70].mxu0 %vm1004_vm7, %v9341_v0  ;;  %524 = vst.msk [vmem:[#allocation2 + $0x140] sm:$0xff] %vm483_vm5, %v372_v7  ;;  %v758_v10 = vpop.permute.xlu1 %757  ;;  %v9357_v14 = vld [vmem:[#allocation2 + $0x130] sm:$0xff] }
 0x10e   :  { %910 = vst.msk [vmem:[#allocation2 + $0x140] sm:$0xff] %vm869_vm6, %v758_v10  ;;  %6979 = vmatprep.mubr.msk.f32.mxu0 %vm8367_vm0, %v13275_v5 }
 0x10f   :  { %403 = vrot.lane.b32.xlu0 %v219_v11, %s8366_s13  ;;  %v223_v11 = vld [vmem:[%s13264_s0 + $0x1e1] sm:$0xff] }
 0x110   :  { %v374_v18 = vpop.permute.xlu0 %373 }
 0x111   :  { %6980 = vmatmul.mubr.msk.f32.gmra.mrb[72].mxu0 %vm1004_vm7, %v9357_v14  ;;  %525 = vst.msk [vmem:[#allocation2 + $0x148] sm:$0xff] %vm483_vm5, %v374_v18  ;;  %v760_v21 = vpop.permute.xlu1 %759  ;;  %v9370_v24 = vld [vmem:[#allocation2 + $0x138] sm:$0xff]  ;;  %v605_v18 = vld [vmem:[%s13264_s0 + $0x1c2] sm:$0xff] }
 0x112   :  { %911 = vst.msk [vmem:[#allocation2 + $0x148] sm:$0xff] %vm869_vm6, %v760_v21  ;;  %6982 = vmatprep.mubr.msk.f32.mxu0 %vm8367_vm0, %v13275_v5  ;;  %789 = vrot.lane.b32.xlu1 %v605_v18, %s8369_s18 }
 0x113   :  { %405 = vrot.lane.b32.xlu0 %v220_v29, %s8366_s13 }
 0x114   :  { %v376_v30 = vpop.permute.xlu0 %375 }
 0x115   :  { %6983 = vmatmul.mubr.msk.f32.gmra.mrb[74].mxu0 %vm1004_vm7, %v9370_v24  ;;  %526 = vst.msk [vmem:[#allocation2 + $0x150] sm:$0xff] %vm483_vm5, %v376_v30  ;;  %v762_v32 = vpop.permute.xlu1 %761  ;;  %v9389_v37 = vld [vmem:[#allocation2 + $0x140] sm:$0xff] }
 0x116   :  { %912 = vst.msk [vmem:[#allocation2 + $0x150] sm:$0xff] %vm869_vm6, %v762_v32  ;;  %6985 = vmatprep.mubr.msk.f32.mxu0 %vm8367_vm0, %v13275_v5  ;;  %v606_v32 = vld [vmem:[%s13264_s0 + $0x1ca] sm:$0xff] }
 0x117   :  { %791 = vrot.lane.b32.xlu1 %v606_v32, %s8369_s18 }
 0x118   :  { %v378_v42 = vpop.permute.xlu0 %377 }
 0x119   :  { %6986 = vmatmul.mubr.msk.f32.gmra.mrb[76].mxu0 %vm1004_vm7, %v9389_v37  ;;  %527 = vst.msk [vmem:[#allocation2 + $0x158] sm:$0xff] %vm483_vm5, %v378_v42  ;;  %v764_v43 = vpop.permute.xlu1 %763  ;;  %v9405_v48 = vld [vmem:[#allocation2 + $0x148] sm:$0xff]  ;;  %v221_v42 = vld [vmem:[%s13264_s0 + $0x1d1] sm:$0xff] }
 0x11a   :  { %913 = vst.msk [vmem:[#allocation2 + $0x158] sm:$0xff] %vm869_vm6, %v764_v43  ;;  %6988 = vmatprep.mubr.msk.f32.mxu0 %vm8367_vm0, %v13275_v5  ;;  %407 = vrot.lane.b32.xlu0 %v221_v42, %s8366_s13 }
 0x11b   :  { %793 = vrot.lane.b32.xlu1 %v607_v47, %s8369_s18  ;;  %v6117_v47 = vld [vmem:[%s13265_s3 + $0x20] sm:$0xff] }
 0x11c   :  { %v380_v55 = vpop.permute.xlu0 %379 }
 0x11d   :  { %6989 = vmatmul.mubr.msk.f32.gmra.mrb[78].mxu0 %vm1004_vm7, %v9405_v48  ;;  %528 = vst.msk [vmem:[#allocation2 + $0x160] sm:$0xff] %vm483_vm5, %v380_v55  ;;  %v766_v58 = vpop.permute.xlu1 %765  ;;  %v9421_v63 = vld [vmem:[#allocation2 + $0x150] sm:$0xff] }
 0x11e   :  { %914 = vst.msk [vmem:[#allocation2 + $0x160] sm:$0xff] %vm869_vm6, %v766_v58  ;;  %6991 = vmatprep.mubr.msk.f32.mxu0 %vm8367_vm0, %v13275_v5  ;;  %v222_v58 = vld [vmem:[%s13264_s0 + $0x1d9] sm:$0xff] }
 0x11f   :  { %409 = vrot.lane.b32.xlu0 %v222_v58, %s8366_s13  ;;  %795 = vrot.lane.b32.xlu1 %v608_v6, %s8369_s18 }
 0x120   :  { %v382_v7 = vpop.permute.xlu0 %381 }
 0x121   :  { %6992 = vmatmul.mubr.msk.f32.gmra.mrb[80].mxu0 %vm1004_vm7, %v9421_v63  ;;  %529 = vst.msk [vmem:[#allocation2 + $0x168] sm:$0xff] %vm483_vm5, %v382_v7  ;;  %v768_v10 = vpop.permute.xlu1 %767  ;;  %v9437_v16 = vld [vmem:[#allocation2 + $0x158] sm:$0xff] }
 0x122   :  { %915 = vst.msk [vmem:[#allocation2 + $0x168] sm:$0xff] %vm869_vm6, %v768_v10  ;;  %6994 = vmatprep.mubr.msk.f32.mxu0 %vm8367_vm0, %v13275_v5 }
 0x123   :  { %411 = vrot.lane.b32.xlu0 %v223_v11, %s8366_s13 }
 0x124   :  { %v384_v21 = vpop.permute.xlu0 %383 }
 0x125   :  { %6995 = vmatmul.mubr.msk.f32.gmra.mrb[82].mxu0 %vm1004_vm7, %v9437_v16  ;;  %530 = vst.msk [vmem:[#allocation2 + $0x170] sm:$0xff] %vm483_vm5, %v384_v21  ;;  %v770_v25 = vpop.permute.xlu1 %769  ;;  %v9453_v30 = vld [vmem:[#allocation2 + $0x160] sm:$0xff] }
 0x126   :  { %916 = vst.msk [vmem:[#allocation2 + $0x170] sm:$0xff] %vm869_vm6, %v770_v25  ;;  %6997 = vmatprep.mubr.msk.f32.mxu0 %vm8367_vm0, %v13275_v5  ;;  %v609_v21 = vld [vmem:[%s13264_s0 + $0x1e2] sm:$0xff] }
 0x127   :  { %797 = vrot.lane.b32.xlu1 %v609_v21, %s8369_s18  ;;  %v90_v21 = vld [vmem:[%s13264_s0 + $0x1c0] sm:$0xff] }
 0x128   :  { %v386_v35 = vpop.permute.xlu0 %385  ;;  %155 = vst.msk [vmem:[#allocation2 + $0x1c0] sm:$0xff] %vm98_vm1, %v90_v21 }
 0x129   :  { %6998 = vmatmul.mubr.msk.f32.gmra.mrb[84].mxu0 %vm1004_vm7, %v9453_v30  ;;  %531 = vst.msk [vmem:[#allocation2 + $0x178] sm:$0xff] %vm483_vm5, %v386_v35  ;;  %v772_v38 = vpop.permute.xlu1 %771  ;;  %v9469_v43 = vld [vmem:[#allocation2 + $0x168] sm:$0xff] }
 0x12a   :  { %917 = vst.msk [vmem:[#allocation2 + $0x178] sm:$0xff] %vm869_vm6, %v772_v38  ;;  %7000 = vmatprep.mubr.msk.f32.mxu0 %vm8367_vm0, %v13275_v5 }
 0x12c   :  { %v388_v51 = vpop.permute.xlu0 %387 }
 0x12d   :  { %7001 = vmatmul.mubr.msk.f32.gmra.mrb[86].mxu0 %vm1004_vm7, %v9469_v43  ;;  %532 = vst.msk [vmem:[#allocation2 + $0x180] sm:$0xff] %vm483_vm5, %v388_v51  ;;  %v774_v55 = vpop.permute.xlu1 %773  ;;  %v9485_v61 = vld [vmem:[#allocation2 + $0x170] sm:$0xff]  ;;  %v6118_v51 = vld [vmem:[%s13265_s3 + $0x28] sm:$0xf] }
 0x12e   :  { %918 = vst.msk [vmem:[#allocation2 + $0x180] sm:$0xff] %vm869_vm6, %v774_v55  ;;  %7003 = vmatprep.mubr.msk.f32.mxu0 %vm8367_vm0, %v13275_v5  ;;  %v7707_v58 = vpack.c.bf16 %v6118_v51, %v6117_v47  ;;  %v92_v51 = vld [vmem:[%s13264_s0 + $0x1d0] sm:$0xff] }
 0x12f   :  { %157 = vst.msk [vmem:[#allocation2 + $0x1d0] sm:$0xff] %vm98_vm1, %v92_v51 }
 0x130   :  { %v390_v7 = vpop.permute.xlu0 %389 }
 0x131   :  { %7004 = vmatmul.mubr.msk.f32.gmra.mrb[88].mxu0 %vm1004_vm7, %v9485_v61  ;;  %533 = vst.msk [vmem:[#allocation2 + $0x188] sm:$0xff] %vm483_vm5, %v390_v7  ;;  %v776_v10 = vpop.permute.xlu1 %775  ;;  %v9501_v18 = vld [vmem:[#allocation2 + $0x178] sm:$0xff] }
 0x132   :  { %919 = vst.msk [vmem:[#allocation2 + $0x188] sm:$0xff] %vm869_vm6, %v776_v10  ;;  %7006 = vmatprep.mubr.msk.f32.mxu0 %vm8367_vm0, %v13275_v5  ;;  %v89_v7 = vld [vmem:[%s13264_s0 + $0x1b8] sm:$0xff] }
 0x133   :  { %154 = vst.msk [vmem:[#allocation2 + $0x1b8] sm:$0xff] %vm98_vm1, %v89_v7 }
 0x134   :  { %v292_v25 = vpop.permute.xlu0 %291 }
 0x135   :  { %7007 = vmatmul.mubr.msk.f32.gmra.mrb[90].mxu0 %vm1004_vm7, %v9501_v18  ;;  %484 = vst.msk [vmem:[#allocation2] sm:$0xff] %vm483_vm5, %v292_v25  ;;  %v678_v29 = vpop.permute.xlu1 %677  ;;  %v9514_v32 = vld [vmem:[#allocation2 + $0x180] sm:$0xff] }
 0x136   :  { %870 = vst.msk [vmem:[#allocation2] sm:$0xff] %vm869_vm6, %v678_v29  ;;  %7009 = vmatprep.mubr.msk.f32.mxu0 %vm8367_vm0, %v13275_v5 }
 0x138   :  { %v294_v35 = vpop.permute.xlu0 %293 }
 0x139   :  { %7010 = vmatmul.mubr.msk.f32.gmra.mrb[92].mxu0 %vm1004_vm7, %v9514_v32  ;;  %485 = vst.msk [vmem:[#allocation2 + $0x8] sm:$0xff] %vm483_vm5, %v294_v35  ;;  %v680_v38 = vpop.permute.xlu1 %679  ;;  %v9522_v42 = vld [vmem:[#allocation2 + $0x188] sm:$0xff] }
 0x13a   :  { %871 = vst.msk [vmem:[#allocation2 + $0x8] sm:$0xff] %vm869_vm6, %v680_v38  ;;  %7012 = vmatprep.mubr.msk.f32.mxu0 %vm8367_vm0, %v13275_v5  ;;  %v91_v35 = vld [vmem:[%s13264_s0 + $0x1c8] sm:$0xff] }
 0x13b   :  { %156 = vst.msk [vmem:[#allocation2 + $0x1c8] sm:$0xff] %vm98_vm1, %v91_v35 }
 0x13d   :  { %7013 = vmatmul.mubr.msk.f32.gmra.mrb[94].mxu0 %vm1004_vm7, %v9522_v42  ;;  %v935_v55 = vld [vmem:[#allocation2] sm:$0xff] }
 0x13e   :  { %7058 = vmatprep.mubr.msk.f32.mxu0 %vm8367_vm0, %v13275_v5 }
 0x141   :  { %7059 = vmatmul.mubr.msk.f32.vlgmr.msra.gmra.mrb[0].mxu0 %vm1004_vm7, %v935_v55  ;;  %v936_v6 = vld [vmem:[#allocation2 + $0x8] sm:$0xff] }
 0x142   :  { %7061 = vmatprep.mubr.msk.f32.mxu0 %vm8367_vm0, %v13275_v5  ;;  %7709 = vmatpush3.bf16.msk.msra.mxu0 %vm8496_vm4, %v7707_v58  ;;  %vm3818_vm4 = vcmask 189568  }
 0x145   :  { %7062 = vmatmul.mubr.msk.f32.gmra.mrb[2].mxu0 %vm1004_vm7, %v936_v6  ;;  %v93_v6 = vld [vmem:[%s13264_s0 + $0x1d8] sm:$0xff] }
 0x146   :  { %7064 = vmatprep.mubr.msk.f32.mxu0 %vm8367_vm0, %v13275_v5  ;;  %158 = vst.msk [vmem:[#allocation2 + $0x1d8] sm:$0xff] %vm98_vm1, %v93_v6 }
 0x149   :  { %7065 = vmatmul.mubr.msk.f32.gmra.mrb[4].mxu0 %vm1004_vm7, %v8854_v54  ;;  %v84_v54 = vld [vmem:[%s13264_s0 + $0x190] sm:$0xff] }
 0x14a   :  { %7067 = vmatprep.mubr.msk.f32.mxu0 %vm8367_vm0, %v13275_v5  ;;  %149 = vst.msk [vmem:[#allocation2 + $0x190] sm:$0xff] %vm98_vm1, %v84_v54 }
 0x14c   :  { %v392_v20 = vpop.permute.xlu0 %391 }
 0x14d   :  { %7068 = vmatmul.mubr.msk.f32.gmra.mrb[6].mxu0 %vm1004_vm7, %v8869_v59  ;;  %534 = vst.msk [vmem:[#allocation2 + $0x190] sm:$0xff] %vm483_vm5, %v392_v20 }
 0x14e   :  { %7070 = vmatprep.mubr.msk.f32.mxu0 %vm8367_vm0, %v13275_v5 }
 0x151   :  { %7071 = vmatmul.mubr.msk.f32.gmra.mrb[8].mxu0 %vm1004_vm7, %v8892_v1  ;;  %v778_v59 = vpop.permute.xlu1 %777 }
 0x152   :  { %7073 = vmatprep.mubr.msk.f32.mxu0 %vm8367_vm0, %v13275_v5  ;;  %920 = vst.msk [vmem:[#allocation2 + $0x190] sm:$0xff] %vm869_vm6, %v778_v59  ;;  %v94_v59 = vld [vmem:[%s13264_s0 + $0x1e0] sm:$0xff] }
 0x153   :  { %159 = vst.msk [vmem:[#allocation2 + $0x1e0] sm:$0xff] %vm98_vm1, %v94_v59 }
 0x155   :  { %7074 = vmatmul.mubr.msk.f32.gmra.mrb[10].mxu0 %vm1004_vm7, %v8912_v9  ;;  %v394_v1 = vpop.permute.xlu0 %393  ;;  %v85_v9 = vld [vmem:[%s13264_s0 + $0x198] sm:$0xff] }
 0x156   :  { %7076 = vmatprep.mubr.msk.f32.mxu0 %vm8367_vm0, %v13275_v5  ;;  %150 = vst.msk [vmem:[#allocation2 + $0x198] sm:$0xff] %vm98_vm1, %v85_v9 }
 0x157   :  { %535 = vst.msk [vmem:[#allocation2 + $0x198] sm:$0xff] %vm483_vm5, %v394_v1 }
 0x159   :  { %7077 = vmatmul.mubr.msk.f32.gmra.mrb[12].mxu0 %vm1004_vm7, %v8932_v15  ;;  %v780_v15 = vpop.permute.xlu1 %779 }
 0x15a   :  { %7079 = vmatprep.mubr.msk.f32.mxu0 %vm8367_vm0, %v13275_v5  ;;  %921 = vst.msk [vmem:[#allocation2 + $0x198] sm:$0xff] %vm869_vm6, %v780_v15  ;;  %v1948_v15 = vld [vmem:[#allocation2 + $0x40] sm:$0xff] }
 0x15d   :  { %7080 = vmatmul.mubr.msk.f32.gmra.mrb[14].mxu0 %vm1004_vm7, %v8952_v22 }
 0x15e   :  { %7082 = vmatprep.mubr.msk.f32.mxu0 %vm8367_vm0, %v13275_v5 }
 0x161   :  { %7083 = vmatmul.mubr.msk.f32.gmra.mrb[16].mxu0 %vm1004_vm7, %v8972_v28  ;;  %v396_v22 = vpop.permute.xlu0 %395  ;;  %v86_v28 = vld [vmem:[%s13264_s0 + $0x1a0] sm:$0xff] }
 0x162   :  { %7085 = vmatprep.mubr.msk.f32.mxu0 %vm8367_vm0, %v13275_v5  ;;  %151 = vst.msk [vmem:[#allocation2 + $0x1a0] sm:$0xff] %vm98_vm1, %v86_v28  ;;  %v1950_v28 = vld [vmem:[#allocation2 + $0x50] sm:$0xff] }
 0x163   :  { %536 = vst.msk [vmem:[#allocation2 + $0x1a0] sm:$0xff] %vm483_vm5, %v396_v22  ;;  %v1949_v22 = vld [vmem:[#allocation2 + $0x48] sm:$0xff] }
 0x165   :  { %7086 = vmatmul.mubr.msk.f32.gmra.mrb[18].mxu0 %vm1004_vm7, %v8992_v34  ;;  %v782_v34 = vpop.permute.xlu1 %781 }
 0x166   :  { %7088 = vmatprep.mubr.msk.f32.mxu0 %vm8367_vm0, %v13275_v5  ;;  %922 = vst.msk [vmem:[#allocation2 + $0x1a0] sm:$0xff] %vm869_vm6, %v782_v34  ;;  %v1951_v34 = vld [vmem:[#allocation2 + $0x58] sm:$0xff] }
 0x169   :  { %7089 = vmatmul.mubr.msk.f32.gmra.mrb[20].mxu0 %vm1004_vm7, %v9012_v40  ;;  %v9623_v40 = vld [vmem:[#allocation2 + $0x190] sm:$0xff] }
 0x16a   :  { %7091 = vmatprep.mubr.msk.f32.mxu0 %vm8367_vm0, %v13275_v5  ;;  %7016 = vmatmul.mubr.msk.f32.vlgmr.msra.gmra.mrb[0].mxu1 %vm1004_vm7, %v9623_v40 }
 0x16b   :  { %7018 = vmatprep.mubr.msk.f32.mxu1 %vm8367_vm0, %v13275_v5 }
 0x16d   :  { %7092 = vmatmul.mubr.msk.f32.gmra.mrb[22].mxu0 %vm1004_vm7, %v9032_v46  ;;  %v398_v46 = vpop.permute.xlu0 %397 }
 0x16e   :  { %7094 = vmatprep.mubr.msk.f32.mxu0 %vm8367_vm0, %v13275_v5 }
 0x171   :  { %7095 = vmatmul.mubr.msk.f32.gmra.mrb[24].mxu0 %vm1004_vm7, %v9052_v52  ;;  %v87_v52 = vld [vmem:[%s13264_s0 + $0x1a8] sm:$0xff] }
 0x172   :  { %7097 = vmatprep.mubr.msk.f32.mxu0 %vm8367_vm0, %v13275_v5  ;;  %152 = vst.msk [vmem:[#allocation2 + $0x1a8] sm:$0xff] %vm98_vm1, %v87_v52  ;;  %v1953_v52 = vld [vmem:[#allocation2 + $0x68] sm:$0xff] }
 0x173   :  { %537 = vst.msk [vmem:[#allocation2 + $0x1a8] sm:$0xff] %vm483_vm5, %v398_v46  ;;  %v1952_v46 = vld [vmem:[#allocation2 + $0x60] sm:$0xff] }
 0x175   :  { %7098 = vmatmul.mubr.msk.f32.gmra.mrb[26].mxu0 %vm1004_vm7, %v9072_v60  ;;  %v784_v60 = vpop.permute.xlu1 %783 }
 0x176   :  { %7100 = vmatprep.mubr.msk.f32.mxu0 %vm8367_vm0, %v13275_v5  ;;  %923 = vst.msk [vmem:[#allocation2 + $0x1a8] sm:$0xff] %vm869_vm6, %v784_v60 }
 0x179   :  { %7101 = vmatmul.mubr.msk.f32.gmra.mrb[28].mxu0 %vm1004_vm7, %v9092_v4  ;;  %v9639_v4 = vld [vmem:[#allocation2 + $0x198] sm:$0xff] }
 0x17a   :  { %7103 = vmatprep.mubr.msk.f32.mxu0 %vm8367_vm0, %v13275_v5  ;;  %7019 = vmatmul.mubr.msk.f32.gmra.mrb[2].mxu1 %vm1004_vm7, %v9639_v4 }
 0x17b   :  { %7021 = vmatprep.mubr.msk.f32.mxu1 %vm8367_vm0, %v13275_v5 }
 0x17d   :  { %7104 = vmatmul.mubr.msk.f32.gmra.mrb[30].mxu0 %vm1004_vm7, %v9112_v12  ;;  %v400_v12 = vpop.permute.xlu0 %399  ;;  %v9671_v11 = vld [vmem:[#allocation2 + $0x1a8] sm:$0xff] }
 0x17e   :  { %7106 = vmatprep.mubr.msk.f32.mxu0 %vm8367_vm0, %v13275_v5 }
 0x181   :  { %7107 = vmatmul.mubr.msk.f32.gmra.mrb[32].mxu0 %vm1004_vm7, %v9132_v19  ;;  %v88_v19 = vld [vmem:[%s13264_s0 + $0x1b0] sm:$0xff] }
 0x182   :  { %7109 = vmatprep.mubr.msk.f32.mxu0 %vm8367_vm0, %v13275_v5  ;;  %153 = vst.msk [vmem:[#allocation2 + $0x1b0] sm:$0xff] %vm98_vm1, %v88_v19 }
 0x183   :  { %538 = vst.msk [vmem:[#allocation2 + $0x1b0] sm:$0xff] %vm483_vm5, %v400_v12  ;;  %v1954_v12 = vld [vmem:[#allocation2 + $0x70] sm:$0xff] }
 0x185   :  { %7110 = vmatmul.mubr.msk.f32.gmra.mrb[34].mxu0 %vm1004_vm7, %v9152_v27  ;;  %v786_v27 = vpop.permute.xlu1 %785 }
 0x186   :  { %7112 = vmatprep.mubr.msk.f32.mxu0 %vm8367_vm0, %v13275_v5  ;;  %924 = vst.msk [vmem:[#allocation2 + $0x1b0] sm:$0xff] %vm869_vm6, %v786_v27 }
 0x189   :  { %7113 = vmatmul.mubr.msk.f32.gmra.mrb[36].mxu0 %vm1004_vm7, %v9169_v33  ;;  %v9655_v33 = vld [vmem:[#allocation2 + $0x1a0] sm:$0xff]  ;;  %v788_v10 = vpop.permute.xlu1 %787 }
 0x18a   :  { %7115 = vmatprep.mubr.msk.f32.mxu0 %vm8367_vm0, %v13275_v5  ;;  %7022 = vmatmul.mubr.msk.f32.gmra.mrb[4].mxu1 %vm1004_vm7, %v9655_v33 }
 0x18b   :  { %7024 = vmatprep.mubr.msk.f32.mxu1 %vm8367_vm0, %v13275_v5 }
 0x18d   :  { %7116 = vmatmul.mubr.msk.f32.gmra.mrb[38].mxu0 %vm1004_vm7, %v9185_v39  ;;  %v402_v39 = vpop.permute.xlu0 %401  ;;  %v790_v25 = vpop.permute.xlu1 %789  ;;  %v9687_v29 = vld [vmem:[#allocation2 + $0x1b0] sm:$0xff] }
 0x18e   :  { %7118 = vmatprep.mubr.msk.f32.mxu0 %vm8367_vm0, %v13275_v5  ;;  %539 = vst.msk [vmem:[#allocation2 + $0x1b8] sm:$0xff] %vm483_vm5, %v402_v39  ;;  %7025 = vmatmul.mubr.msk.f32.gmra.mrb[6].mxu1 %vm1004_vm7, %v9671_v11  ;;  %v1955_v39 = vld [vmem:[#allocation2 + $0x78] sm:$0xff] }
 0x18f   :  { %925 = vst.msk [vmem:[#allocation2 + $0x1b8] sm:$0xff] %vm869_vm6, %v788_v10  ;;  %7027 = vmatprep.mubr.msk.f32.mxu1 %vm8367_vm0, %v13275_v5 }
 0x191   :  { %7119 = vmatmul.mubr.msk.f32.gmra.mrb[40].mxu0 %vm1004_vm7, %v9201_v45  ;;  %v404_v45 = vpop.permute.xlu0 %403  ;;  %v792_v38 = vpop.permute.xlu1 %791 }
 0x192   :  { %7121 = vmatprep.mubr.msk.f32.mxu0 %vm8367_vm0, %v13275_v5  ;;  %540 = vst.msk [vmem:[#allocation2 + $0x1c0] sm:$0xff] %vm483_vm5, %v404_v45  ;;  %7028 = vmatmul.mubr.msk.f32.gmra.mrb[8].mxu1 %vm1004_vm7, %v9687_v29  ;;  %v1956_v45 = vld [vmem:[#allocation2 + $0x80] sm:$0xff] }
 0x193   :  { %926 = vst.msk [vmem:[#allocation2 + $0x1c0] sm:$0xff] %vm869_vm6, %v790_v25  ;;  %7030 = vmatprep.mubr.msk.f32.mxu1 %vm8367_vm0, %v13275_v5 }
 0x195   :  { %7122 = vmatmul.mubr.msk.f32.gmra.mrb[42].mxu0 %vm1004_vm7, %v9210_v49  ;;  %v406_v49 = vpop.permute.xlu0 %405  ;;  %v794_v55 = vpop.permute.xlu1 %793 }
 0x196   :  { %7124 = vmatprep.mubr.msk.f32.mxu0 %vm8367_vm0, %v13275_v5  ;;  %541 = vst.msk [vmem:[#allocation2 + $0x1c8] sm:$0xff] %vm483_vm5, %v406_v49  ;;  %v9703_v47 = vld [vmem:[#allocation2 + $0x1b8] sm:$0xff]  ;;  %v1957_v49 = vld [vmem:[#allocation2 + $0x88] sm:$0xff] }
 0x197   :  { %927 = vst.msk [vmem:[#allocation2 + $0x1c8] sm:$0xff] %vm869_vm6, %v792_v38  ;;  %7031 = vmatmul.mubr.msk.f32.gmra.mrb[10].mxu1 %vm1004_vm7, %v9703_v47 }
 0x198   :  { %7033 = vmatprep.mubr.msk.f32.mxu1 %vm8367_vm0, %v13275_v5 }
 0x199   :  { %7125 = vmatmul.mubr.msk.f32.gmra.mrb[44].mxu0 %vm1004_vm7, %v9218_v53  ;;  %v408_v53 = vpop.permute.xlu0 %407  ;;  %v796_v20 = vpop.permute.xlu1 %795 }
 0x19a   :  { %7127 = vmatprep.mubr.msk.f32.mxu0 %vm8367_vm0, %v13275_v5  ;;  %542 = vst.msk [vmem:[#allocation2 + $0x1d0] sm:$0xff] %vm483_vm5, %v408_v53  ;;  %v9719_v58 = vld [vmem:[#allocation2 + $0x1c0] sm:$0xff]  ;;  %v1958_v53 = vld [vmem:[#allocation2 + $0x90] sm:$0xff] }
 0x19b   :  { %928 = vst.msk [vmem:[#allocation2 + $0x1d0] sm:$0xff] %vm869_vm6, %v794_v55  ;;  %7034 = vmatmul.mubr.msk.f32.gmra.mrb[12].mxu1 %vm1004_vm7, %v9719_v58 }
 0x19c   :  { %7036 = vmatprep.mubr.msk.f32.mxu1 %vm8367_vm0, %v13275_v5 }
 0x19d   :  { %7128 = vmatmul.mubr.msk.f32.gmra.mrb[46].mxu0 %vm1004_vm7, %v9226_v57  ;;  %v410_v57 = vpop.permute.xlu0 %409  ;;  %v798_v1 = vpop.permute.xlu1 %797 }
 0x19e   :  { %7130 = vmatprep.mubr.msk.f32.mxu0 %vm8367_vm0, %v13275_v5  ;;  %543 = vst.msk [vmem:[#allocation2 + $0x1d8] sm:$0xff] %vm483_vm5, %v410_v57  ;;  %v9735_v54 = vld [vmem:[#allocation2 + $0x1c8] sm:$0xff]  ;;  %v1959_v57 = vld [vmem:[#allocation2 + $0x98] sm:$0xff] }
 0x19f   :  { %929 = vst.msk [vmem:[#allocation2 + $0x1d8] sm:$0xff] %vm869_vm6, %v796_v20  ;;  %7037 = vmatmul.mubr.msk.f32.gmra.mrb[14].mxu1 %vm1004_vm7, %v9735_v54 }
 0x1a0   :  { %7039 = vmatprep.mubr.msk.f32.mxu1 %vm8367_vm0, %v13275_v5 }
 0x1a1   :  { %7131 = vmatmul.mubr.msk.f32.gmra.mrb[48].mxu0 %vm1004_vm7, %v9234_v62  ;;  %v412_v62 = vpop.permute.xlu0 %411 }
 0x1a2   :  { %7133 = vmatprep.mubr.msk.f32.mxu0 %vm8367_vm0, %v13275_v5  ;;  %544 = vst.msk [vmem:[#allocation2 + $0x1e0] sm:$0xff] %vm483_vm5, %v412_v62  ;;  %v9751_v9 = vld [vmem:[#allocation2 + $0x1d0] sm:$0xff]  ;;  %v1960_v62 = vld [vmem:[#allocation2 + $0xa0] sm:$0xff] }
 0x1a3   :  { %930 = vst.msk [vmem:[#allocation2 + $0x1e0] sm:$0xff] %vm869_vm6, %v798_v1  ;;  %7040 = vmatmul.mubr.msk.f32.gmra.mrb[16].mxu1 %vm1004_vm7, %v9751_v9 }
 0x1a4   :  { %7042 = vmatprep.mubr.msk.f32.mxu1 %vm8367_vm0, %v13275_v5 }
 0x1a5   :  { %7134 = vmatmul.mubr.msk.f32.gmra.mrb[50].mxu0 %vm1004_vm7, %v9242_v3 }
 0x1a6   :  { %7136 = vmatprep.mubr.msk.f32.mxu0 %vm8367_vm0, %v13275_v5  ;;  %v9762_v3 = vld [vmem:[#allocation2 + $0x1d8] sm:$0xff] }
 0x1a7   :  { %7043 = vmatmul.mubr.msk.f32.gmra.mrb[18].mxu1 %vm1004_vm7, %v9762_v3 }
 0x1a8   :  { %7045 = vmatprep.mubr.msk.f32.mxu1 %vm8367_vm0, %v13275_v5 }
 0x1a9   :  { %7137 = vmatmul.mubr.msk.f32.gmra.mrb[52].mxu0 %vm1004_vm7, %v9250_v8 }
 0x1aa   :  { %7139 = vmatprep.mubr.msk.f32.mxu0 %vm8367_vm0, %v13275_v5  ;;  %v9772_v8 = vld [vmem:[#allocation2 + $0x1e0] sm:$0xff] }
 0x1ab   :  { %7046 = vmatmul.mubr.msk.f32.gmra.mrb[20].mxu1 %vm1004_vm7, %v9772_v8 }
 0x1ac   :  { %7048 = vmatprep.mubr.msk.f32.mxu1 %vm8367_vm0, %v13275_v5 }
 0x1ad   :  { %7140 = vmatmul.mubr.msk.f32.gmra.mrb[54].mxu0 %vm1004_vm7, %v9258_v13  ;;  %v224_v13 = vld [vmem:[%s13264_s0 + $0x1e9] sm:$0xff] }
 0x1ae   :  { %7142 = vmatprep.mubr.msk.f32.mxu0 %vm8367_vm0, %v13275_v5  ;;  %413 = vrot.lane.b32.xlu0 %v224_v13, %s8366_s13  ;;  %v1961_v13 = vld [vmem:[#allocation2 + $0xa8] sm:$0xff] }
 0x1b1   :  { %7143 = vmatmul.mubr.msk.f32.gmra.mrb[56].mxu0 %vm1004_vm7, %v9266_v17  ;;  %v610_v17 = vld [vmem:[%s13264_s0 + $0x1ea] sm:$0xff] }
 0x1b2   :  { %7145 = vmatprep.mubr.msk.f32.mxu0 %vm8367_vm0, %v13275_v5  ;;  %799 = vrot.lane.b32.xlu1 %v610_v17, %s8369_s18 }
 0x1b5   :  { %7146 = vmatmul.mubr.msk.f32.gmra.mrb[58].mxu0 %vm1004_vm7, %v9274_v23  ;;  %v225_v23 = vld [vmem:[%s13264_s0 + $0x1f1] sm:$0xff] }
 0x1b6   :  { %7148 = vmatprep.mubr.msk.f32.mxu0 %vm8367_vm0, %v13275_v5  ;;  %415 = vrot.lane.b32.xlu0 %v225_v23, %s8366_s13 }
 0x1b9   :  { %7149 = vmatmul.mubr.msk.f32.gmra.mrb[60].mxu0 %vm1004_vm7, %v9282_v26  ;;  %v611_v26 = vld [vmem:[%s13264_s0 + $0x1f2] sm:$0xff] }
 0x1ba   :  { %7151 = vmatprep.mubr.msk.f32.mxu0 %vm8367_vm0, %v13275_v5  ;;  %801 = vrot.lane.b32.xlu1 %v611_v26, %s8369_s18  ;;  %v1962_v26 = vld [vmem:[#allocation2 + $0xb0] sm:$0xff] }
 0x1bd   :  { %7152 = vmatmul.mubr.msk.f32.gmra.mrb[62].mxu0 %vm1004_vm7, %v9290_v31  ;;  %v226_v31 = vld [vmem:[%s13264_s0 + $0x1f9] sm:$0x7f] }
 0x1be   :  { %7154 = vmatprep.mubr.msk.f32.mxu0 %vm8367_vm0, %v13275_v5  ;;  %417 = vrot.lane.b32.xlu0 %v226_v31, %s8366_s13 }
 0x1c1   :  { %7155 = vmatmul.mubr.msk.f32.gmra.mrb[64].mxu0 %vm1004_vm7, %v9298_v36  ;;  %v612_v36 = vld [vmem:[%s13264_s0 + $0x1fa] sm:$0x3f] }
 0x1c2   :  { %7157 = vmatprep.mubr.msk.f32.mxu0 %vm8367_vm0, %v13275_v5  ;;  %803 = vrot.lane.b32.xlu1 %v612_v36, %s8369_s18 }
 0x1c5   :  { %7158 = vmatmul.mubr.msk.f32.gmra.mrb[66].mxu0 %vm1004_vm7, %v9306_v41  ;;  %v995_v41 = vld [vmem:[#allocation2 + $0x1e0] sm:$0x3] }
 0x1c6   :  { %7160 = vmatprep.mubr.msk.f32.mxu0 %vm8367_vm0, %v13275_v5 }
 0x1c9   :  { %7161 = vmatmul.mubr.msk.f32.gmra.mrb[68].mxu0 %vm1004_vm7, %v9314_v44  ;;  %v1944_v44 = vld [vmem:[#allocation2 + $0x20] sm:$0xff] }
 0x1ca   :  { %7163 = vmatprep.mubr.msk.f32.mxu0 %vm8367_vm0, %v13275_v5 }
 0x1cd   :  { %7164 = vmatmul.mubr.msk.f32.gmra.mrb[70].mxu0 %vm1004_vm7, %v9322_v50  ;;  %v1945_v50 = vld [vmem:[#allocation2 + $0x28] sm:$0xff] }
 0x1ce   :  { %7166 = vmatprep.mubr.msk.f32.mxu0 %vm8367_vm0, %v13275_v5 }
 0x1d1   :  { %7167 = vmatmul.mubr.msk.f32.gmra.mrb[72].mxu0 %vm1004_vm7, %v9330_v56  ;;  %v1946_v56 = vld [vmem:[#allocation2 + $0x30] sm:$0xff] }
 0x1d2   :  { %7169 = vmatprep.mubr.msk.f32.mxu0 %vm8367_vm0, %v13275_v5 }
 0x1d5   :  { %7170 = vmatmul.mubr.msk.f32.gmra.mrb[74].mxu0 %vm1004_vm7, %v9341_v0  ;;  %v1947_v0 = vld [vmem:[#allocation2 + $0x38] sm:$0xff] }
 0x1d6   :  { %7172 = vmatprep.mubr.msk.f32.mxu0 %vm8367_vm0, %v13275_v5 }
 0x1d9   :  { %7173 = vmatmul.mubr.msk.f32.gmra.mrb[76].mxu0 %vm1004_vm7, %v9357_v14 }
 0x1da   :  { %7175 = vmatprep.mubr.msk.f32.mxu0 %vm8367_vm0, %v13275_v5 }
 0x1dd   :  { %7176 = vmatmul.mubr.msk.f32.gmra.mrb[78].mxu0 %vm1004_vm7, %v9370_v24 }
 0x1de   :  { %7178 = vmatprep.mubr.msk.f32.mxu0 %vm8367_vm0, %v13275_v5 }
 0x1e1   :  { %7179 = vmatmul.mubr.msk.f32.gmra.mrb[80].mxu0 %vm1004_vm7, %v9389_v37 }
 0x1e2   :  { %7181 = vmatprep.mubr.msk.f32.mxu0 %vm8367_vm0, %v13275_v5 }
 0x1e5   :  { %7182 = vmatmul.mubr.msk.f32.gmra.mrb[82].mxu0 %vm1004_vm7, %v9405_v48 }
 0x1e6   :  { %7184 = vmatprep.mubr.msk.f32.mxu0 %vm8367_vm0, %v13275_v5 }
 0x1e9   :  { %7185 = vmatmul.mubr.msk.f32.gmra.mrb[84].mxu0 %vm1004_vm7, %v9421_v63 }
 0x1ea   :  { %7187 = vmatprep.mubr.msk.f32.mxu0 %vm8367_vm0, %v13275_v5 }
 0x1ed   :  { %7188 = vmatmul.mubr.msk.f32.gmra.mrb[86].mxu0 %vm1004_vm7, %v9437_v16 }
 0x1ee   :  { %7190 = vmatprep.mubr.msk.f32.mxu0 %vm8367_vm0, %v13275_v5 }
 0x1f1   :  { %7191 = vmatmul.mubr.msk.f32.gmra.mrb[88].mxu0 %vm1004_vm7, %v9453_v30 }
 0x1f2   :  { %7193 = vmatprep.mubr.msk.f32.mxu0 %vm8367_vm0, %v13275_v5 }
 0x1f5   :  { %7194 = vmatmul.mubr.msk.f32.gmra.mrb[90].mxu0 %vm1004_vm7, %v9469_v43 }
 0x1f6   :  { %7196 = vmatprep.mubr.msk.f32.mxu0 %vm8367_vm0, %v13275_v5 }
 0x1f9   :  { %7197 = vmatmul.mubr.msk.f32.gmra.mrb[92].mxu0 %vm1004_vm7, %v9485_v61 }
 0x1fa   :  { %7199 = vmatprep.mubr.msk.f32.mxu0 %vm8367_vm0, %v13275_v5 }
 0x1fd   :  { %7200 = vmatmul.mubr.msk.f32.gmra.mrb[94].mxu0 %vm1004_vm7, %v9501_v18 }
 0x1fe   :  { %7202 = vmatprep.mubr.msk.f32.mxu0 %vm8367_vm0, %v13275_v5 }
 0x201   :  { %7203 = vmatmul.mubr.msk.f32.gmra.mrb[96].mxu0 %vm1004_vm7, %v9514_v32 }
 0x202   :  { %7205 = vmatprep.mubr.msk.f32.mxu0 %vm8367_vm0, %v13275_v5 }
 0x205   :  { %7206 = vmatmul.mubr.msk.f32.gmra.mrb[98].mxu0 %vm1004_vm7, %v9522_v42 }
 0x206   :  { %7208 = vmatprep.mubr.msk.f32.mxu0 %vm8367_vm0, %v13275_v5 }
 0x209   :  { %7209 = vmatmul.mubr.msk.f32.gmra.mrb[100].mxu0 %vm1004_vm7, %v9623_v40 }
 0x20a   :  { %7211 = vmatprep.mubr.msk.f32.mxu0 %vm8367_vm0, %v13275_v5 }
 0x20d   :  { %7212 = vmatmul.mubr.msk.f32.gmra.mrb[102].mxu0 %vm1004_vm7, %v9639_v4 }
 0x20e   :  { %7214 = vmatprep.mubr.msk.f32.mxu0 %vm8367_vm0, %v13275_v5 }
 0x211   :  { %7215 = vmatmul.mubr.msk.f32.gmra.mrb[104].mxu0 %vm1004_vm7, %v9655_v33 }
 0x212   :  { %7217 = vmatprep.mubr.msk.f32.mxu0 %vm8367_vm0, %v13275_v5 }
 0x215   :  { %7218 = vmatmul.mubr.msk.f32.gmra.mrb[106].mxu0 %vm1004_vm7, %v9671_v11 }
 0x216   :  { %7220 = vmatprep.mubr.msk.f32.mxu0 %vm8367_vm0, %v13275_v5 }
 0x219   :  { %7221 = vmatmul.mubr.msk.f32.gmra.mrb[108].mxu0 %vm1004_vm7, %v9687_v29 }
 0x21a   :  { %7223 = vmatprep.mubr.msk.f32.mxu0 %vm8367_vm0, %v13275_v5 }
 0x21d   :  { %7224 = vmatmul.mubr.msk.f32.gmra.mrb[110].mxu0 %vm1004_vm7, %v9703_v47 }
 0x21e   :  { %7226 = vmatprep.mubr.msk.f32.mxu0 %vm8367_vm0, %v13275_v5 }
 0x221   :  { %7227 = vmatmul.mubr.msk.f32.gmra.mrb[112].mxu0 %vm1004_vm7, %v9719_v58 }
 0x222   :  { %7229 = vmatprep.mubr.msk.f32.mxu0 %vm8367_vm0, %v13275_v5 }
 0x225   :  { %7230 = vmatmul.mubr.msk.f32.gmra.mrb[114].mxu0 %vm1004_vm7, %v9735_v54 }
 0x226   :  { %7232 = vmatprep.mubr.msk.f32.mxu0 %vm8367_vm0, %v13275_v5 }
 0x229   :  { %7233 = vmatmul.mubr.msk.f32.gmra.mrb[116].mxu0 %vm1004_vm7, %v9751_v9 }
 0x22a   :  { %7235 = vmatprep.mubr.msk.f32.mxu0 %vm8367_vm0, %v13275_v5 }
 0x22d   :  { %7236 = vmatmul.mubr.msk.f32.gmra.mrb[118].mxu0 %vm1004_vm7, %v9762_v3 }
 0x22e   :  { %7238 = vmatprep.mubr.msk.f32.mxu0 %vm8367_vm0, %v13275_v5 }
 0x231   :  { %7239 = vmatmul.mubr.msk.f32.gmra.mrb[120].mxu0 %vm1004_vm7, %v995_v41  ;;  %v1963_v41 = vld [vmem:[#allocation2 + $0xb8] sm:$0xff] }
 0x232   :  { %7245 = vmatprep.mubr.msk.f32.mxu0 %vm8367_vm0, %v13275_v5 }
 0x235   :  { %7246 = vmatmul.mubr.msk.f32.vlgmr.msra.gmra.mrb[0].mxu0 %vm1004_vm7, %v1944_v44 }
 0x236   :  { %7248 = vmatprep.mubr.msk.f32.mxu0 %vm8367_vm0, %v13275_v5 }
 0x239   :  { %7249 = vmatmul.mubr.msk.f32.gmra.mrb[2].mxu0 %vm1004_vm7, %v1945_v50 }
 0x23a   :  { %7251 = vmatprep.mubr.msk.f32.mxu0 %vm8367_vm0, %v13275_v5 }
 0x23d   :  { %7252 = vmatmul.mubr.msk.f32.gmra.mrb[4].mxu0 %vm1004_vm7, %v1946_v56  ;;  %v9963_v60 = vpop.f32.mrb[0].mxu1  ;;  %v1964_v56 = vld [vmem:[#allocation2 + $0xc0] sm:$0xff] }
 0x23e   :  { %7254 = vmatprep.mubr.msk.f32.mxu0 %vm8367_vm0, %v13275_v5  ;;  %v7017_v19 = vpop.f32.mrb[1].mxu1 }
 0x241   :  { %7255 = vmatmul.mubr.msk.f32.gmra.mrb[6].mxu0 %vm1004_vm7, %v1947_v0 }
 0x242   :  { %7257 = vmatprep.mubr.msk.f32.mxu0 %vm8367_vm0, %v13275_v5 }
 0x245   :  { %7258 = vmatmul.mubr.msk.f32.gmra.mrb[8].mxu0 %vm1004_vm7, %v1948_v15  ;;  %v1965_v15 = vld [vmem:[#allocation2 + $0xc8] sm:$0xff] }
 0x246   :  { %7260 = vmatprep.mubr.msk.f32.mxu0 %vm8367_vm0, %v13275_v5 }
 0x249   :  { %7261 = vmatmul.mubr.msk.f32.gmra.mrb[10].mxu0 %vm1004_vm7, %v1949_v22  ;;  %v1966_v22 = vld [vmem:[#allocation2 + $0xd0] sm:$0xff] }
 0x24a   :  { %7263 = vmatprep.mubr.msk.f32.mxu0 %vm8367_vm0, %v13275_v5 }
 0x24d   :  { %7264 = vmatmul.mubr.msk.f32.gmra.mrb[12].mxu0 %vm1004_vm7, %v1950_v28  ;;  %v9968_v27 = vpop.f32.mrb[2].mxu1  ;;  %v95_v28 = vld [vmem:[%s13264_s0 + $0x1e8] sm:$0xff] }
 0x24e   :  { %7266 = vmatprep.mubr.msk.f32.mxu0 %vm8367_vm0, %v13275_v5  ;;  %v7020_v7 = vpop.f32.mrb[3].mxu1  ;;  %160 = vst.msk [vmem:[#allocation2 + $0x1e8] sm:$0xff] %vm98_vm1, %v95_v28 }
 0x24f   :  { %v1968_v7 = vld [vmem:[#allocation2 + $0xe0] sm:$0xff] }
 0x251   :  { %7267 = vmatmul.mubr.msk.f32.gmra.mrb[14].mxu0 %vm1004_vm7, %v1951_v34  ;;  %v414_v34 = vpop.permute.xlu0 %413 }
 0x252   :  { %7269 = vmatprep.mubr.msk.f32.mxu0 %vm8367_vm0, %v13275_v5  ;;  %545 = vst.msk [vmem:[#allocation2 + $0x1e8] sm:$0xff] %vm483_vm5, %v414_v34 }
 0x255   :  { %7270 = vmatmul.mubr.msk.f32.gmra.mrb[16].mxu0 %vm1004_vm7, %v1952_v46  ;;  %v800_v46 = vpop.permute.xlu1 %799  ;;  %v416_v19 = vpop.permute.xlu0 %415 }
 0x256   :  { %7272 = vmatprep.mubr.msk.f32.mxu0 %vm8367_vm0, %v13275_v5  ;;  %931 = vst.msk [vmem:[#allocation2 + $0x1e8] sm:$0xff] %vm869_vm6, %v800_v46 }
 0x259   :  { %7273 = vmatmul.mubr.msk.f32.gmra.mrb[18].mxu0 %vm1004_vm7, %v1953_v52  ;;  %v1967_v52 = vld [vmem:[#allocation2 + $0xd8] sm:$0xff] }
 0x25a   :  { %7275 = vmatprep.mubr.msk.f32.mxu0 %vm8367_vm0, %v13275_v5 }
 0x25d   :  { %7276 = vmatmul.mubr.msk.f32.gmra.mrb[20].mxu0 %vm1004_vm7, %v1954_v12  ;;  %v9973_v10 = vpop.f32.mrb[4].mxu1  ;;  %v96_v12 = vld [vmem:[%s13264_s0 + $0x1f0] sm:$0xff] }
 0x25e   :  { %7278 = vmatprep.mubr.msk.f32.mxu0 %vm8367_vm0, %v13275_v5  ;;  %v7023_v21 = vpop.f32.mrb[5].mxu1  ;;  %161 = vst.msk [vmem:[#allocation2 + $0x1f0] sm:$0xff] %vm98_vm1, %v96_v12  ;;  %v2004_v12 = vld [vmem:[#allocation2 + $0x200] sm:$0x3] }
 0x25f   :  { %546 = vst.msk [vmem:[#allocation2 + $0x1f0] sm:$0xff] %vm483_vm5, %v416_v19  ;;  %v418_v21 = vpop.permute.xlu0 %417  ;;  %vm5402_vm5 = vcmask 523264  }
 0x261   :  { %7279 = vmatmul.mubr.msk.f32.gmra.mrb[22].mxu0 %vm1004_vm7, %v1955_v39  ;;  %v9978_v25 = vpop.f32.mrb[6].mxu1  ;;  %v802_v39 = vpop.permute.xlu1 %801 }
 0x262   :  { %7281 = vmatprep.mubr.msk.f32.mxu0 %vm8367_vm0, %v13275_v5  ;;  %v7026_v35 = vpop.f32.mrb[7].mxu1  ;;  %932 = vst.msk [vmem:[#allocation2 + $0x1f0] sm:$0xff] %vm869_vm6, %v802_v39 }
 0x263   :  { %v10047_v35 = vld [vmem:[#allocation2 + $0x1e8] sm:$0xff] }
 0x264   :  { %7049 = vmatmul.mubr.msk.f32.gmra.mrb[22].mxu1 %vm1004_vm7, %v10047_v35 }
 0x265   :  { %7282 = vmatmul.mubr.msk.f32.gmra.mrb[24].mxu0 %vm1004_vm7, %v1956_v45  ;;  %v9983_v38 = vpop.f32.mrb[8].mxu1  ;;  %v97_v45 = vld [vmem:[%s13264_s0 + $0x1f8] sm:$0xff]  ;;  %7051 = vmatprep.mubr.msk.f32.mxu1 %vm8367_vm0, %v13275_v5 }
 0x266   :  { %7284 = vmatprep.mubr.msk.f32.mxu0 %vm8367_vm0, %v13275_v5  ;;  %v7029_v51 = vpop.f32.mrb[9].mxu1  ;;  %162 = vst.msk [vmem:[#allocation2 + $0x1f8] sm:$0xff] %vm98_vm1, %v97_v45  ;;  %vm3509_vm1 = vcmask 130113  }
 0x267   :  { %548 = vst.msk [vmem:[#allocation2 + $0x1f8] sm:$0x7f] %vm547_vm9, %v418_v21 }
 0x269   :  { %7285 = vmatmul.mubr.msk.f32.gmra.mrb[26].mxu0 %vm1004_vm7, %v1957_v49  ;;  %v804_v49 = vpop.permute.xlu1 %803  ;;  %v1000_v51 = vld [vmem:[#allocation2 + $0x1f0] sm:$0x3] }
 0x26a   :  { %7287 = vmatprep.mubr.msk.f32.mxu0 %vm8367_vm0, %v13275_v5  ;;  %v9988_v55 = vpop.f32.mrb[10].mxu1  ;;  %934 = vst.msk [vmem:[#allocation2 + $0x1f8] sm:$0x3f] %vm933_vm10, %v804_v49  ;;  %7052 = vmatmul.mubr.msk.f32.gmra.mrb[24].mxu1 %vm1004_vm7, %v1000_v51 }
 0x26b   :  { %v7032_v6 = vpop.f32.mrb[11].mxu1 }
 0x26c   :  { %v1971_v6 = vld [vmem:[#allocation2 + $0xf8] sm:$0xff] }
 0x26d   :  { %7288 = vmatmul.mubr.msk.f32.gmra.mrb[28].mxu0 %vm1004_vm7, %v1958_v53  ;;  %v1969_v53 = vld [vmem:[#allocation2 + $0xe8] sm:$0xff] }
 0x26e   :  { %7290 = vmatprep.mubr.msk.f32.mxu0 %vm8367_vm0, %v13275_v5  ;;  %v9993_v20 = vpop.f32.mrb[12].mxu1 }
 0x26f   :  { %v7035_v59 = vpop.f32.mrb[13].mxu1 }
 0x270   :  { %v1973_v59 = vld [vmem:[#allocation2 + $0x108] sm:$0xff] }
 0x271   :  { %7291 = vmatmul.mubr.msk.f32.gmra.mrb[30].mxu0 %vm1004_vm7, %v1959_v57  ;;  %v1970_v57 = vld [vmem:[#allocation2 + $0xf0] sm:$0xff]  ;;  %v2003_v28 = vld [vmem:[#allocation2 + $0x1f8] sm:$0xff] }
 0x272   :  { %7293 = vmatprep.mubr.msk.f32.mxu0 %vm8367_vm0, %v13275_v5  ;;  %v9998_v1 = vpop.f32.mrb[14].mxu1 }
 0x273   :  { %v7038_v17 = vpop.f32.mrb[15].mxu1 }
 0x274   :  { %v8362_v17 = vld [vmem:[#allocation2 + $0x118] sm:$0xff] }
 0x275   :  { %7294 = vmatmul.mubr.msk.f32.gmra.mrb[32].mxu0 %vm1004_vm7, %v1960_v62  ;;  %v1972_v62 = vld [vmem:[#allocation2 + $0x100] sm:$0xff] }
 0x276   :  { %7296 = vmatprep.mubr.msk.f32.mxu0 %vm8367_vm0, %v13275_v5  ;;  %v10003_v23 = vpop.f32.mrb[16].mxu1 }
 0x277   :  { %v7041_v31 = vpop.f32.mrb[17].mxu1 }
 0x278   :  { %v8364_v31 = vld [vmem:[#allocation2 + $0x128] sm:$0xff] }
 0x279   :  { %7297 = vmatmul.mubr.msk.f32.gmra.mrb[34].mxu0 %vm1004_vm7, %v1961_v13  ;;  %v1974_v13 = vld [vmem:[#allocation2 + $0x110] sm:$0xff] }
 0x27a   :  { %7299 = vmatprep.mubr.msk.f32.mxu0 %vm8367_vm0, %v13275_v5  ;;  %v10008_v36 = vpop.f32.mrb[18].mxu1 }
 0x27b   :  { %v7044_v44 = vpop.f32.mrb[19].mxu1 }
 0x27c   :  { %v2002_v44 = vld [vmem:[#allocation2 + $0x1f0] sm:$0xff] }
 0x27d   :  { %7300 = vmatmul.mubr.msk.f32.gmra.mrb[36].mxu0 %vm1004_vm7, %v1962_v26  ;;  %v8363_v26 = vld [vmem:[#allocation2 + $0x120] sm:$0xff] }
 0x27e   :  { %7302 = vmatprep.mubr.msk.f32.mxu0 %vm8367_vm0, %v13275_v5  ;;  %v10013_v50 = vpop.f32.mrb[20].mxu1 }
 0x27f   :  { %v7047_v0 = vpop.f32.mrb[21].mxu1 }
 0x281   :  { %7303 = vmatmul.mubr.msk.f32.gmra.mrb[38].mxu0 %vm1004_vm7, %v1963_v41 }
 0x282   :  { %7305 = vmatprep.mubr.msk.f32.mxu0 %vm8367_vm0, %v13275_v5 }
 0x285   :  { %7306 = vmatmul.mubr.msk.f32.gmra.mrb[40].mxu0 %vm1004_vm7, %v1964_v56 }
 0x286   :  { %7308 = vmatprep.mubr.msk.f32.mxu0 %vm8367_vm0, %v13275_v5 }
 0x289   :  { %7309 = vmatmul.mubr.msk.f32.gmra.mrb[42].mxu0 %vm1004_vm7, %v1965_v15 }
 0x28a   :  { %7311 = vmatprep.mubr.msk.f32.mxu0 %vm8367_vm0, %v13275_v5 }
 0x28d   :  { %7312 = vmatmul.mubr.msk.f32.gmra.mrb[44].mxu0 %vm1004_vm7, %v1966_v22 }
 0x28e   :  { %7314 = vmatprep.mubr.msk.f32.mxu0 %vm8367_vm0, %v13275_v5 }
 0x291   :  { %7315 = vmatmul.mubr.msk.f32.gmra.mrb[46].mxu0 %vm1004_vm7, %v1967_v52 }
 0x292   :  { %7317 = vmatprep.mubr.msk.f32.mxu0 %vm8367_vm0, %v13275_v5 }
 0x295   :  { %7318 = vmatmul.mubr.msk.f32.gmra.mrb[48].mxu0 %vm1004_vm7, %v1968_v7 }
 0x296   :  { %7320 = vmatprep.mubr.msk.f32.mxu0 %vm8367_vm0, %v13275_v5 }
 0x299   :  { %7321 = vmatmul.mubr.msk.f32.gmra.mrb[50].mxu0 %vm1004_vm7, %v1969_v53 }
 0x29a   :  { %7323 = vmatprep.mubr.msk.f32.mxu0 %vm8367_vm0, %v13275_v5 }
 0x29d   :  { %7324 = vmatmul.mubr.msk.f32.gmra.mrb[52].mxu0 %vm1004_vm7, %v1970_v57 }
 0x29e   :  { %7326 = vmatprep.mubr.msk.f32.mxu0 %vm8367_vm0, %v13275_v5 }
 0x2a1   :  { %7327 = vmatmul.mubr.msk.f32.gmra.mrb[54].mxu0 %vm1004_vm7, %v1971_v6 }
 0x2a2   :  { %7329 = vmatprep.mubr.msk.f32.mxu0 %vm8367_vm0, %v13275_v5 }
 0x2a5   :  { %7330 = vmatmul.mubr.msk.f32.gmra.mrb[56].mxu0 %vm1004_vm7, %v1972_v62 }
 0x2a6   :  { %7332 = vmatprep.mubr.msk.f32.mxu0 %vm8367_vm0, %v13275_v5 }
 0x2a9   :  { %7333 = vmatmul.mubr.msk.f32.gmra.mrb[58].mxu0 %vm1004_vm7, %v1973_v59 }
 0x2aa   :  { %7335 = vmatprep.mubr.msk.f32.mxu0 %vm8367_vm0, %v13275_v5 }
 0x2ad   :  { %7336 = vmatmul.mubr.msk.f32.gmra.mrb[60].mxu0 %vm1004_vm7, %v1974_v13 }
 0x2ae   :  { %7338 = vmatprep.mubr.msk.f32.mxu0 %vm8367_vm0, %v13275_v5 }
 0x2b1   :  { %7339 = vmatmul.mubr.msk.f32.gmra.mrb[62].mxu0 %vm1004_vm7, %v8362_v17 }
 0x2b2   :  { %7341 = vmatprep.mubr.msk.f32.mxu0 %vm8367_vm0, %v13275_v5 }
 0x2b5   :  { %7342 = vmatmul.mubr.msk.f32.gmra.mrb[64].mxu0 %vm1004_vm7, %v8363_v26 }
 0x2b6   :  { %7344 = vmatprep.mubr.msk.f32.mxu0 %vm8367_vm0, %v13275_v5 }
 0x2b9   :  { %7345 = vmatmul.mubr.msk.f32.gmra.mrb[66].mxu0 %vm1004_vm7, %v8364_v31 }
 0x2ba   :  { %7347 = vmatprep.mubr.msk.f32.mxu0 %vm8367_vm0, %v13275_v5 }
 0x2bd   :  { %7348 = vmatmul.mubr.msk.f32.gmra.mrb[68].mxu0 %vm1004_vm7, %v9357_v14  ;;  %v2629_v14 = vlaneseq }
 0x2be   :  { %7350 = vmatprep.mubr.msk.f32.mxu0 %vm8367_vm0, %v13275_v5 }
 0x2c1   :  { %7351 = vmatmul.mubr.msk.f32.gmra.mrb[70].mxu0 %vm1004_vm7, %v9370_v24 }
 0x2c2   :  { %7353 = vmatprep.mubr.msk.f32.mxu0 %vm8367_vm0, %v13275_v5 }
 0x2c5   :  { %7354 = vmatmul.mubr.msk.f32.gmra.mrb[72].mxu0 %vm1004_vm7, %v9389_v37  ;;  %v10159_v37 = vshrl.u32 %v2629_v14, 7 }
 0x2c6   :  { %7356 = vmatprep.mubr.msk.f32.mxu0 %vm8367_vm0, %v13275_v5 }
 0x2c7   :  { %13417 = vst [vmem:[#allocation5_spill] sm:$0xff] %v10159_v37 }
 0x2c9   :  { %7357 = vmatmul.mubr.msk.f32.gmra.mrb[74].mxu0 %vm1004_vm7, %v9405_v48 }
 0x2ca   :  { %7359 = vmatprep.mubr.msk.f32.mxu0 %vm8367_vm0, %v13275_v5 }
 0x2cd   :  { %7360 = vmatmul.mubr.msk.f32.gmra.mrb[76].mxu0 %vm1004_vm7, %v9421_v63  ;;  %v13274_v63 = vsub.s32 1, %v10159_v37 }
 0x2ce   :  { %7362 = vmatprep.mubr.msk.f32.mxu0 %vm8367_vm0, %v13275_v5 }
 0x2d1   :  { %7363 = vmatmul.mubr.msk.f32.gmra.mrb[78].mxu0 %vm1004_vm7, %v9437_v16  ;;  %v10169_v16 = vld [vmem:[%s13266_s1] sm:$0xf] }
 0x2d2   :  { %7365 = vmatprep.mubr.msk.f32.mxu0 %vm8367_vm0, %v13275_v5 }
 0x2d5   :  { %7366 = vmatmul.mubr.msk.f32.gmra.mrb[80].mxu0 %vm1004_vm7, %v9453_v30 }
 0x2d6   :  { %7368 = vmatprep.mubr.msk.f32.mxu0 %vm8367_vm0, %v13275_v5 }
 0x2d9   :  { %7369 = vmatmul.mubr.msk.f32.gmra.mrb[82].mxu0 %vm1004_vm7, %v9469_v43  ;;  %v10176_v43 = vrot.slane %v10169_v16, %v13274_v63 }
 0x2da   :  { %7371 = vmatprep.mubr.msk.f32.mxu0 %vm8367_vm0, %v13275_v5 }
 0x2db   :  { %2719 = vmatprep.mubr.f32.mxu1 %v10176_v43 }
 0x2dd   :  { %7372 = vmatmul.mubr.msk.f32.gmra.mrb[84].mxu0 %vm1004_vm7, %v9485_v61 }
 0x2de   :  { %7374 = vmatprep.mubr.msk.f32.mxu0 %vm8367_vm0, %v13275_v5 }
 0x2e1   :  { %7375 = vmatmul.mubr.msk.f32.gmra.mrb[86].mxu0 %vm1004_vm7, %v9501_v18 }
 0x2e2   :  { %7377 = vmatprep.mubr.msk.f32.mxu0 %vm8367_vm0, %v13275_v5 }
 0x2e5   :  { %7378 = vmatmul.mubr.msk.f32.gmra.mrb[88].mxu0 %vm1004_vm7, %v9514_v32 }
 0x2e6   :  { %7380 = vmatprep.mubr.msk.f32.mxu0 %vm8367_vm0, %v13275_v5 }
 0x2e9   :  { %7381 = vmatmul.mubr.msk.f32.gmra.mrb[90].mxu0 %vm1004_vm7, %v9522_v42 }
 0x2ea   :  { %7383 = vmatprep.mubr.msk.f32.mxu0 %vm8367_vm0, %v13275_v5 }
 0x2ed   :  { %7384 = vmatmul.mubr.msk.f32.gmra.mrb[92].mxu0 %vm1004_vm7, %v9623_v40 }
 0x2ee   :  { %7386 = vmatprep.mubr.msk.f32.mxu0 %vm8367_vm0, %v13275_v5 }
 0x2f1   :  { %7387 = vmatmul.mubr.msk.f32.gmra.mrb[94].mxu0 %vm1004_vm7, %v9639_v4 }
 0x2f2   :  { %7389 = vmatprep.mubr.msk.f32.mxu0 %vm8367_vm0, %v13275_v5 }
 0x2f5   :  { %7390 = vmatmul.mubr.msk.f32.gmra.mrb[96].mxu0 %vm1004_vm7, %v9655_v33 }
 0x2f6   :  { %7392 = vmatprep.mubr.msk.f32.mxu0 %vm8367_vm0, %v13275_v5 }
 0x2f9   :  { %7393 = vmatmul.mubr.msk.f32.gmra.mrb[98].mxu0 %vm1004_vm7, %v9671_v11 }
 0x2fa   :  { %7395 = vmatprep.mubr.msk.f32.mxu0 %vm8367_vm0, %v13275_v5 }
 0x2fd   :  { %7396 = vmatmul.mubr.msk.f32.gmra.mrb[100].mxu0 %vm1004_vm7, %v9687_v29 }
 0x2fe   :  { %7398 = vmatprep.mubr.msk.f32.mxu0 %vm8367_vm0, %v13275_v5 }
 0x301   :  { %7399 = vmatmul.mubr.msk.f32.gmra.mrb[102].mxu0 %vm1004_vm7, %v9703_v47 }
 0x302   :  { %7401 = vmatprep.mubr.msk.f32.mxu0 %vm8367_vm0, %v13275_v5 }
 0x305   :  { %7402 = vmatmul.mubr.msk.f32.gmra.mrb[104].mxu0 %vm1004_vm7, %v9719_v58 }
 0x306   :  { %7404 = vmatprep.mubr.msk.f32.mxu0 %vm8367_vm0, %v13275_v5 }
 0x308   :  { %v10157_v24 = vpop.f32.mrb[0].mxu0 }
 0x309   :  { %13416 = vst [vmem:[#allocation4_spill] sm:$0xff] %v10157_v24  ;;  %v7247_v48 = vpop.f32.mrb[1].mxu0  ;;  %7405 = vmatmul.mubr.msk.f32.gmra.mrb[106].mxu0 %vm1004_vm7, %v9735_v54  ;;  %v10180_v61 = vmul.f32 %v10157_v24, %v10157_v24 }
 0x30a   :  { %7407 = vmatprep.mubr.msk.f32.mxu0 %vm8367_vm0, %v13275_v5 }
 0x30c   :  { %v10171_v30 = vpop.f32.mrb[2].mxu0 }
 0x30d   :  { %13418 = vst [vmem:[#allocation6_spill] sm:$0xff] %v10171_v30  ;;  %v7712_v18 = vpack.c.bf16 %v10171_v30, %v10157_v24  ;;  %v10186_v32 = vmul.f32 %v10171_v30, %v10171_v30  ;;  %v7250_v42 = vpop.f32.mrb[3].mxu0  ;;  %7408 = vmatmul.mubr.msk.f32.gmra.mrb[108].mxu0 %vm1004_vm7, %v9751_v9 }
 0x30e   :  { %7410 = vmatprep.mubr.msk.f32.mxu0 %vm8367_vm0, %v13275_v5 }
 0x310   :  { %v10195_v4 = vpop.f32.mrb[4].mxu0 }
 0x311   :  { %13419 = vst [vmem:[#allocation7_spill] sm:$0xff] %v10195_v4  ;;  %v7253_v33 = vpop.f32.mrb[5].mxu0  ;;  %7411 = vmatmul.mubr.msk.f32.gmra.mrb[110].mxu0 %vm1004_vm7, %v9762_v3  ;;  %v10205_v29 = vmul.f32 %v10195_v4, %v10195_v4 }
 0x312   :  { %7413 = vmatprep.mubr.msk.f32.mxu0 %vm8367_vm0, %v13275_v5 }
 0x314   :  { %v10201_v11 = vpop.f32.mrb[6].mxu0 }
 0x315   :  { %13420 = vst [vmem:[#allocation8_spill] sm:$0xff] %v10201_v11  ;;  %v7716_v47 = vpack.c.bf16 %v10201_v11, %v10195_v4  ;;  %v10211_v58 = vmul.f32 %v10201_v11, %v10201_v11  ;;  %v7256_v54 = vpop.f32.mrb[7].mxu0  ;;  %7414 = vmatmul.mubr.msk.f32.gmra.mrb[112].mxu0 %vm1004_vm7, %v9772_v8 }
 0x316   :  { %7416 = vmatprep.mubr.msk.f32.mxu0 %vm8367_vm0, %v13275_v5 }
 0x318   :  { %v10219_v3 = vpop.f32.mrb[8].mxu0 }
 0x319   :  { %13421 = vst [vmem:[#allocation9_spill] sm:$0xff] %v10219_v3  ;;  %v7259_v41 = vpop.f32.mrb[9].mxu0  ;;  %7417 = vmatmul.mubr.msk.f32.gmra.mrb[114].mxu0 %vm1004_vm7, %v10047_v35  ;;  %v10229_v8 = vmul.f32 %v10219_v3, %v10219_v3 }
 0x31a   :  { %7419 = vmatprep.mubr.msk.f32.mxu0 %vm8367_vm0, %v13275_v5 }
 0x31c   :  { %v10225_v56 = vpop.f32.mrb[10].mxu0 }
 0x31d   :  { %13422 = vst [vmem:[#allocation10_spill] sm:$0xff] %v10225_v56  ;;  %v7720_v0 = vpack.c.bf16 %v10225_v56, %v10219_v3  ;;  %v10235_v15 = vmul.f32 %v10225_v56, %v10225_v56  ;;  %v7262_v22 = vpop.f32.mrb[11].mxu0  ;;  %7420 = vmatmul.mubr.msk.f32.gmra.mrb[116].mxu0 %vm1004_vm7, %v2002_v44 }
 0x31e   :  { %7422 = vmatprep.mubr.msk.f32.mxu0 %vm8367_vm0, %v13275_v5 }
 0x320   :  { %v10242_v46 = vpop.f32.mrb[12].mxu0 }
 0x321   :  { %13423 = vst [vmem:[#allocation11_spill] sm:$0xff] %v10242_v46  ;;  %v7265_v52 = vpop.f32.mrb[13].mxu0  ;;  %7423 = vmatmul.mubr.msk.f32.gmra.mrb[118].mxu0 %vm1004_vm7, %v2003_v28  ;;  %v10251_v39 = vmul.f32 %v10242_v46, %v10242_v46 }
 0x322   :  { %7425 = vmatprep.mubr.msk.f32.mxu0 %vm8367_vm0, %v13275_v5  ;;  %vm3885_vm0 = vcmask 195584  }
 0x324   :  { %v10247_v19 = vpop.f32.mrb[14].mxu0 }
 0x325   :  { %13424 = vst [vmem:[#allocation12_spill] sm:$0xff] %v10247_v19  ;;  %v10257_v45 = vmul.f32 %v10247_v19, %v10247_v19  ;;  %v7268_v21 = vpop.f32.mrb[15].mxu0  ;;  %7426 = vmatmul.mubr.msk.f32.gmra.mrb[120].mxu0 %vm1004_vm7, %v2004_v12 }
 0x328   :  { %v10262_v35 = vpop.f32.mrb[16].mxu0 }
 0x329   :  { %13425 = vst [vmem:[#allocation13_spill] sm:$0xff] %v10262_v35  ;;  %v7271_v53 = vpop.f32.mrb[17].mxu0  ;;  %v10268_v57 = vmul.f32 %v10262_v35, %v10262_v35 }
 0x32c   :  { %v10264_v51 = vpop.f32.mrb[18].mxu0 }
 0x32d   :  { %13426 = vst [vmem:[#allocation14_spill] sm:$0xff] %v10264_v51  ;;  %v10274_v62 = vmul.f32 %v10264_v51, %v10264_v51  ;;  %v7274_v59 = vpop.f32.mrb[19].mxu0 }
 0x330   :  { %v10278_v17 = vpop.f32.mrb[20].mxu0 }
 0x331   :  { %13427 = vst [vmem:[#allocation15_spill] sm:$0xff] %v10278_v17  ;;  %v7277_v26 = vpop.f32.mrb[21].mxu0  ;;  %v10284_v14 = vmul.f32 %v10278_v17, %v10278_v17 }
 0x334   :  { %v10280_v31 = vpop.f32.mrb[22].mxu0 }
 0x335   :  { %13428 = vst [vmem:[#allocation16_spill] sm:$0xff] %v10280_v31  ;;  %v10290_v42 = vmul.f32 %v10280_v31, %v10280_v31  ;;  %v7280_v33 = vpop.f32.mrb[23].mxu0 }
 0x338   :  { %v10294_v41 = vpop.f32.mrb[24].mxu0 }
 0x339   :  { %13429 = vst [vmem:[#allocation17_spill] sm:$0xff] %v10294_v41  ;;  %v7283_v44 = vpop.f32.mrb[25].mxu0  ;;  %v10300_v28 = vmul.f32 %v10294_v41, %v10294_v41 }
 0x33c   :  { %v10296_v22 = vpop.f32.mrb[26].mxu0 }
 0x33d   :  { %13430 = vst [vmem:[#allocation18_spill] sm:$0xff] %v10296_v22  ;;  %v10306_v12 = vmul.f32 %v10296_v22, %v10296_v22  ;;  %v7286_v21 = vpop.f32.mrb[27].mxu0 }
 0x340   :  { %v10310_v59 = vpop.f32.mrb[28].mxu0 }
 0x341   :  { %13431 = vst [vmem:[#allocation19_spill] sm:$0xff] %v10310_v59  ;;  %v7289_v26 = vpop.f32.mrb[29].mxu0  ;;  %v10316_v44 = vmul.f32 %v10310_v59, %v10310_v59 }
 0x344   :  { %v10312_v33 = vpop.f32.mrb[30].mxu0 }
 0x345   :  { %13432 = vst [vmem:[#allocation20_spill] sm:$0xff] %v10312_v33  ;;  %v10322_v54 = vmul.f32 %v10312_v33, %v10312_v33  ;;  %v7292_v21 = vpop.f32.mrb[31].mxu0 }
 0x348   :  { %v10326_v13 = vpop.f32.mrb[32].mxu0 }
 0x349   :  { %13433 = vst [vmem:[#allocation21_spill] sm:$0xff] %v10326_v13  ;;  %v7295_v26 = vpop.f32.mrb[33].mxu0  ;;  %v10332_v34 = vmul.f32 %v10326_v13, %v10326_v13 }
 0x34c   :  { %v10328_v49 = vpop.f32.mrb[34].mxu0 }
 0x34d   :  { %13434 = vst [vmem:[#allocation22_spill] sm:$0xff] %v10328_v49  ;;  %v7710_v9 = vpack.c.bf16 %v10328_v49, %v10326_v13  ;;  %v10338_v40 = vmul.f32 %v10328_v49, %v10328_v49  ;;  %v7298_v21 = vpop.f32.mrb[35].mxu0  ;;  %v10404_v49 = vpop.f32.mrb[22].mxu1 }
 0x34f   :  { %7711 = vmatprep.subr.bf16.mxu1 %v7710_v9 }
 0x350   :  { %v10342_v5 = vpop.f32.mrb[36].mxu0  ;;  %7713 = vmatpush3.bf16.msra.mxu1 %v7712_v18 }
 0x351   :  { %13435 = vst [vmem:[#allocation23_spill] sm:$0xff] %v10342_v5  ;;  %v7301_v26 = vpop.f32.mrb[37].mxu0  ;;  %v10351_v63 = vmul.f32 %v10342_v5, %v10342_v5 }
 0x354   :  { %v10347_v2 = vpop.f32.mrb[38].mxu0 }
 0x355   :  { %13436 = vst [vmem:[#allocation24_spill] sm:$0xff] %v10347_v2  ;;  %v7714_v21 = vpack.c.bf16 %v10347_v2, %v10342_v5  ;;  %v10357_v9 = vmul.f32 %v10347_v2, %v10347_v2  ;;  %v7304_v53 = vpop.f32.mrb[39].mxu0 }
 0x357   :  { %7715 = vmatprep.subr.bf16.mxu1 %v7714_v21 }
 0x358   :  { %v10361_v18 = vpop.f32.mrb[40].mxu0  ;;  %7717 = vmatpush3.bf16.msra.mxu1 %v7716_v47 }
 0x359   :  { %13437 = vst [vmem:[#allocation25_spill] sm:$0xff] %v10361_v18  ;;  %v7307_v26 = vpop.f32.mrb[41].mxu0  ;;  %v10370_v6 = vmul.f32 %v10361_v18, %v10361_v18 }
 0x35c   :  { %v10366_v48 = vpop.f32.mrb[42].mxu0 }
 0x35d   :  { %13438 = vst [vmem:[#allocation26_spill] sm:$0xff] %v10366_v48  ;;  %v7718_v53 = vpack.c.bf16 %v10366_v48, %v10361_v18  ;;  %v10376_v21 = vmul.f32 %v10366_v48, %v10366_v48  ;;  %v7310_v52 = vpop.f32.mrb[43].mxu0 }
 0x35f   :  { %7719 = vmatprep.subr.bf16.mxu1 %v7718_v53 }
 0x360   :  { %v10380_v47 = vpop.f32.mrb[44].mxu0  ;;  %7721 = vmatpush3.bf16.msra.mxu1 %v7720_v0 }
 0x361   :  { %13439 = vst [vmem:[#allocation27_spill] sm:$0xff] %v10380_v47  ;;  %v7313_v26 = vpop.f32.mrb[45].mxu0  ;;  %v10389_v18 = vmul.f32 %v10380_v47, %v10380_v47 }
 0x362   :  { %v13442_v26 = vpack.c.bf16 %v10247_v19, %v10242_v46 }
 0x364   :  { %v10385_v2 = vpop.f32.mrb[46].mxu0 }
 0x365   :  { %13440 = vst [vmem:[#allocation28_spill] sm:$0xff] %v10385_v2  ;;  %v7722_v52 = vpack.c.bf16 %v10385_v2, %v10380_v47  ;;  %v10395_v53 = vmul.f32 %v10385_v2, %v10385_v2  ;;  %v7316_v7 = vpop.f32.mrb[47].mxu0  ;;  %v7050_v47 = vpop.f32.mrb[23].mxu1 }
 0x366   :  { %v13445_v47 = vpack.c.bf16 %v10264_v51, %v10262_v35 }
 0x367   :  { %7723 = vmatprep.subr.bf16.mxu1 %v7722_v52 }
 0x368   :  { %v10399_v0 = vpop.f32.mrb[48].mxu0  ;;  %7725 = vmatpush3.bf16.msra.mxu1 %v13442_v26  ;;  %v10418_v26 = vpop.f32.mrb[24].mxu1 }
 0x369   :  { %13441 = vst [vmem:[#allocation29_spill] sm:$0xff] %v10399_v0  ;;  %v7319_v5 = vpop.f32.mrb[49].mxu0  ;;  %v10410_v2 = vmul.f32 %v10399_v0, %v10399_v0  ;;  %v7053_v46 = vpop.f32.mrb[25].mxu1 }
 0x36c   :  { %v10406_v13 = vpop.f32.mrb[50].mxu0 }
 0x36d   :  { %13443 = vst [vmem:[#allocation30_spill] sm:$0xff] %v10406_v13  ;;  %v7726_v7 = vpack.c.bf16 %v10406_v13, %v10399_v0  ;;  %v10416_v52 = vmul.f32 %v10406_v13, %v10406_v13  ;;  %v7322_v48 = vpop.f32.mrb[51].mxu0 }
 0x36f   :  { %7727 = vmatprep.subr.bf16.mxu1 %v7726_v7 }
 0x370   :  { %v10422_v19 = vpop.f32.mrb[52].mxu0  ;;  %7729 = vmatpush3.bf16.msra.mxu1 %v13445_v47 }
 0x371   :  { %13444 = vst [vmem:[#allocation31_spill] sm:$0xff] %v10422_v19  ;;  %v7325_v56 = vpop.f32.mrb[53].mxu0  ;;  %v10431_v13 = vmul.f32 %v10422_v19, %v10422_v19 }
 0x372   :  { %v13448_v56 = vpack.c.bf16 %v10280_v31, %v10278_v17  ;;  %v10466_v17 = vsub.s32 0, %v10159_v37 }
 0x374   :  { %v10427_v0 = vpop.f32.mrb[54].mxu0  ;;  %13452 = vst [vmem:[#allocation36_spill] sm:$0xff] %v10466_v17 }
 0x375   :  { %13446 = vst [vmem:[#allocation32_spill] sm:$0xff] %v10427_v0  ;;  %v7730_v48 = vpack.c.bf16 %v10427_v0, %v10422_v19  ;;  %v10437_v7 = vmul.f32 %v10427_v0, %v10427_v0  ;;  %v7328_v5 = vpop.f32.mrb[55].mxu0 }
 0x377   :  { %7731 = vmatprep.subr.bf16.mxu1 %v7730_v48 }
 0x378   :  { %v10441_v46 = vpop.f32.mrb[56].mxu0  ;;  %7733 = vmatpush3.bf16.msra.mxu1 %v13448_v56 }
 0x379   :  { %13447 = vst [vmem:[#allocation33_spill] sm:$0xff] %v10441_v46  ;;  %v7331_v51 = vpop.f32.mrb[57].mxu0  ;;  %v10450_v19 = vmul.f32 %v10441_v46, %v10441_v46 }
 0x37a   :  { %v13451_v51 = vpack.c.bf16 %v10296_v22, %v10294_v41  ;;  %v13455_v41 = vpack.c.bf16 %v10312_v33, %v10310_v59 }
 0x37c   :  { %v10446_v35 = vpop.f32.mrb[58].mxu0 }
 0x37d   :  { %13449 = vst [vmem:[#allocation34_spill] sm:$0xff] %v10446_v35  ;;  %v7734_v5 = vpack.c.bf16 %v10446_v35, %v10441_v46  ;;  %v10456_v48 = vmul.f32 %v10446_v35, %v10446_v35  ;;  %v7334_v47 = vpop.f32.mrb[59].mxu0 }
 0x37f   :  { %7735 = vmatprep.subr.bf16.mxu1 %v7734_v5 }
 0x380   :  { %v10460_v56 = vpop.f32.mrb[60].mxu0  ;;  %7737 = vmatpush3.bf16.msra.mxu1 %v13451_v51 }
 0x381   :  { %13450 = vst [vmem:[#allocation35_spill] sm:$0xff] %v10460_v56  ;;  %v7337_v31 = vpop.f32.mrb[61].mxu0  ;;  %v10473_v47 = vmul.f32 %v10460_v56, %v10460_v56 }
 0x382   :  { %v10483_v31 = vrot.slane %v10169_v16, %v10466_v17 }
 0x384   :  { %v10468_v46 = vpop.f32.mrb[62].mxu0 }
 0x385   :  { %13453 = vst [vmem:[#allocation37_spill] sm:$0xff] %v10468_v46  ;;  %v7738_v5 = vpack.c.bf16 %v10468_v46, %v10460_v56  ;;  %v10479_v0 = vmul.f32 %v10468_v46, %v10468_v46  ;;  %v7340_v51 = vpop.f32.mrb[63].mxu0  ;;  %v13456_v56 = vsub.s32 3, %v10159_v37 }
 0x387   :  { %7739 = vmatprep.subr.bf16.mxu1 %v7738_v5  ;;  %v10495_v46 = vrot.slane %v10169_v16, %v13456_v56  ;;  %v13458_v5 = vmov 0.0|0.0  }
 0x388   :  { %v10487_v22 = vpop.f32.mrb[64].mxu0  ;;  %7741 = vmatpush3.bf16.msra.mxu1 %v13455_v41 }
 0x389   :  { %13454 = vst [vmem:[#allocation38_spill] sm:$0xff] %v10487_v22  ;;  %13457 = vst [vmem:[#allocation39_spill] sm:$0xff] %v10495_v46  ;;  %v7343_v51 = vpop.f32.mrb[65].mxu0  ;;  %7742 = vmatprep.subr.bf16.mxu1 %v13458_v5  ;;  %v10505_v35 = vmul.f32 %v10487_v22, %v10487_v22 }
 0x38b   :  { %2720 = vmatmul.mubr.f32.vlgmr.msra.gmra.mrb[26].mxu1 %v10483_v31  ;;  %13460 = vst [vmem:[#allocation41_spill] sm:$0xff] %v10505_v35 }
 0x38c   :  { %v10499_v3 = vpop.f32.mrb[66].mxu0  ;;  %6182 = vmatprep.mubr.msk.f32.mxu1 %vm2648_vm11, %v10495_v46 }
 0x38d   :  { %13459 = vst [vmem:[#allocation40_spill] sm:$0xff] %v10499_v3  ;;  %v7743_v41 = vpack.c.bf16 %v10499_v3, %v10487_v22  ;;  %v10511_v56 = vmul.f32 %v10499_v3, %v10499_v3  ;;  %v7346_v51 = vpop.f32.mrb[67].mxu0 }
 0x38f   :  { %7744 = vmatpush1.bf16.msra.mxu1 %v7743_v41 }
 0x390   :  { %v10515_v59 = vpop.f32.mrb[68].mxu0  ;;  %7745 = vmatprep.subr.bf16.mxu1 %v13458_v5 }
 0x391   :  { %13461 = vst [vmem:[#allocation42_spill] sm:$0xff] %v10515_v59  ;;  %v7349_v11 = vpop.f32.mrb[69].mxu0  ;;  %v10522_v30 = vmul.f32 %v10515_v59, %v10515_v59 }
 0x393   :  { %13463 = vst [vmem:[#allocation44_spill] sm:$0xff] %v10522_v30 }
 0x394   :  { %v10518_v4 = vpop.f32.mrb[70].mxu0 }
 0x395   :  { %13462 = vst [vmem:[#allocation43_spill] sm:$0xff] %v10518_v4  ;;  %v7746_v3 = vpack.c.bf16 %v10518_v4, %v10515_v59  ;;  %v10528_v51 = vmul.f32 %v10518_v4, %v10518_v4  ;;  %v7352_v33 = vpop.f32.mrb[71].mxu0 }
 0x397   :  { %13464 = vst [vmem:[#allocation45_spill] sm:$0xff] %v10528_v51  ;;  %7747 = vmatpush1.bf16.msra.mxu1 %v7746_v3 }
 0x398   :  { %v10532_v22 = vpop.f32.mrb[72].mxu0  ;;  %7748 = vmatprep.subr.bf16.mxu1 %v13458_v5 }
 0x399   :  { %13465 = vst [vmem:[#allocation46_spill] sm:$0xff] %v10532_v22  ;;  %v7355_v11 = vpop.f32.mrb[73].mxu0  ;;  %v10539_v17 = vmul.f32 %v10532_v22, %v10532_v22 }
 0x39b   :  { %13467 = vst [vmem:[#allocation48_spill] sm:$0xff] %v10539_v17 }
 0x39c   :  { %v10535_v24 = vpop.f32.mrb[74].mxu0 }
 0x39d   :  { %13466 = vst [vmem:[#allocation47_spill] sm:$0xff] %v10535_v24  ;;  %v7749_v4 = vpack.c.bf16 %v10535_v24, %v10532_v22  ;;  %v10545_v33 = vmul.f32 %v10535_v24, %v10535_v24  ;;  %v7358_v41 = vpop.f32.mrb[75].mxu0 }
 0x39f   :  { %13468 = vst [vmem:[#allocation49_spill] sm:$0xff] %v10545_v33  ;;  %7750 = vmatpush1.bf16.msra.mxu1 %v7749_v4 }
 0x3a0   :  { %v10549_v59 = vpop.f32.mrb[76].mxu0  ;;  %7751 = vmatprep.subr.bf16.mxu1 %v13458_v5 }
 0x3a1   :  { %13469 = vst [vmem:[#allocation50_spill] sm:$0xff] %v10549_v59  ;;  %v7361_v11 = vpop.f32.mrb[77].mxu0  ;;  %v10556_v51 = vmul.f32 %v10549_v59, %v10549_v59 }
 0x3a3   :  { %13471 = vst [vmem:[#allocation52_spill] sm:$0xff] %v10556_v51 }
 0x3a4   :  { %v10552_v30 = vpop.f32.mrb[78].mxu0 }
 0x3a5   :  { %13470 = vst [vmem:[#allocation51_spill] sm:$0xff] %v10552_v30  ;;  %v7752_v24 = vpack.c.bf16 %v10552_v30, %v10549_v59  ;;  %v10562_v41 = vmul.f32 %v10552_v30, %v10552_v30  ;;  %v7364_v3 = vpop.f32.mrb[79].mxu0 }
 0x3a7   :  { %13472 = vst [vmem:[#allocation53_spill] sm:$0xff] %v10562_v41  ;;  %7753 = vmatpush1.bf16.msra.mxu1 %v7752_v24 }
 0x3a8   :  { %v10566_v22 = vpop.f32.mrb[80].mxu0  ;;  %7754 = vmatprep.subr.bf16.mxu1 %v13458_v5 }
 0x3a9   :  { %13473 = vst [vmem:[#allocation54_spill] sm:$0xff] %v10566_v22  ;;  %v7367_v11 = vpop.f32.mrb[81].mxu0  ;;  %v10573_v33 = vmul.f32 %v10566_v22, %v10566_v22 }
 0x3ab   :  { %13475 = vst [vmem:[#allocation56_spill] sm:$0xff] %v10573_v33 }
 0x3ac   :  { %v10569_v17 = vpop.f32.mrb[82].mxu0 }
 0x3ad   :  { %13474 = vst [vmem:[#allocation55_spill] sm:$0xff] %v10569_v17  ;;  %v7755_v30 = vpack.c.bf16 %v10569_v17, %v10566_v22  ;;  %v10579_v3 = vmul.f32 %v10569_v17, %v10569_v17  ;;  %v7370_v4 = vpop.f32.mrb[83].mxu0 }
 0x3af   :  { %13476 = vst [vmem:[#allocation57_spill] sm:$0xff] %v10579_v3  ;;  %7756 = vmatpush1.bf16.msra.mxu1 %v7755_v30 }
 0x3b0   :  { %v10583_v59 = vpop.f32.mrb[84].mxu0  ;;  %7757 = vmatprep.subr.bf16.mxu1 %v13458_v5 }
 0x3b1   :  { %13477 = vst [vmem:[#allocation58_spill] sm:$0xff] %v10583_v59  ;;  %v7373_v11 = vpop.f32.mrb[85].mxu0  ;;  %v10590_v41 = vmul.f32 %v10583_v59, %v10583_v59 }
 0x3b3   :  { %13479 = vst [vmem:[#allocation60_spill] sm:$0xff] %v10590_v41 }
 0x3b4   :  { %v10586_v51 = vpop.f32.mrb[86].mxu0 }
 0x3b5   :  { %13478 = vst [vmem:[#allocation59_spill] sm:$0xff] %v10586_v51  ;;  %v7758_v17 = vpack.c.bf16 %v10586_v51, %v10583_v59  ;;  %v10596_v4 = vmul.f32 %v10586_v51, %v10586_v51  ;;  %v7376_v24 = vpop.f32.mrb[87].mxu0 }
 0x3b7   :  { %13480 = vst [vmem:[#allocation61_spill] sm:$0xff] %v10596_v4  ;;  %7759 = vmatpush1.bf16.msra.mxu1 %v7758_v17 }
 0x3b8   :  { %v10600_v22 = vpop.f32.mrb[88].mxu0  ;;  %7760 = vmatprep.subr.bf16.mxu1 %v13458_v5 }
 0x3b9   :  { %13481 = vst [vmem:[#allocation62_spill] sm:$0xff] %v10600_v22  ;;  %v7379_v11 = vpop.f32.mrb[89].mxu0  ;;  %v10607_v3 = vmul.f32 %v10600_v22, %v10600_v22 }
 0x3bb   :  { %13483 = vst [vmem:[#allocation64_spill] sm:$0xff] %v10607_v3 }
 0x3bc   :  { %v10603_v33 = vpop.f32.mrb[90].mxu0 }
 0x3bd   :  { %13482 = vst [vmem:[#allocation63_spill] sm:$0xff] %v10603_v33  ;;  %v7761_v51 = vpack.c.bf16 %v10603_v33, %v10600_v22  ;;  %v10613_v24 = vmul.f32 %v10603_v33, %v10603_v33  ;;  %v7382_v30 = vpop.f32.mrb[91].mxu0 }
 0x3bf   :  { %13484 = vst [vmem:[#allocation65_spill] sm:$0xff] %v10613_v24  ;;  %7762 = vmatpush1.bf16.msra.mxu1 %v7761_v51 }
 0x3c0   :  { %v10617_v59 = vpop.f32.mrb[92].mxu0  ;;  %7763 = vmatprep.subr.bf16.mxu1 %v13458_v5 }
 0x3c1   :  { %13485 = vst [vmem:[#allocation66_spill] sm:$0xff] %v10617_v59  ;;  %v7385_v11 = vpop.f32.mrb[93].mxu0  ;;  %v10624_v4 = vmul.f32 %v10617_v59, %v10617_v59 }
 0x3c4   :  { %v10620_v41 = vpop.f32.mrb[94].mxu0 }
 0x3c5   :  { %13486 = vst [vmem:[#allocation67_spill] sm:$0xff] %v10620_v41  ;;  %v7764_v33 = vpack.c.bf16 %v10620_v41, %v10617_v59  ;;  %v10630_v30 = vmul.f32 %v10620_v41, %v10620_v41  ;;  %v7388_v17 = vpop.f32.mrb[95].mxu0 }
 0x3c7   :  { %7765 = vmatpush1.bf16.msra.mxu1 %v7764_v33 }
 0x3c8   :  { %v2500_v22 = vpop.f32.mrb[96].mxu0  ;;  %7766 = vmatprep.subr.bf16.mxu1 %v13458_v5 }
 0x3c9   :  { %v10636_v11 = vadd.f32 %v2500_v22, %v9963_v60  ;;  %v7391_v3 = vpop.f32.mrb[97].mxu0 }
 0x3cc   :  { %v2505_v24 = vpop.f32.mrb[98].mxu0 }
 0x3cd   :  { %v10639_v46 = vadd.f32 %v2505_v24, %v9968_v27  ;;  %v7394_v59 = vpop.f32.mrb[99].mxu0 }
 0x3cf   :  { %v7767_v41 = vpack.c.bf16 %v10639_v46, %v10636_v11 }
 0x3d0   :  { %v2510_v17 = vpop.f32.mrb[100].mxu0 }
 0x3d1   :  { %v10644_v35 = vadd.f32 %v2510_v17, %v9973_v10  ;;  %v7397_v33 = vpop.f32.mrb[101].mxu0  ;;  %7768 = vmatpush1.bf16.msra.mxu1 %v7767_v41 }
 0x3d2   :  { %7769 = vmatprep.subr.bf16.mxu1 %v13458_v5 }
 0x3d4   :  { %v2515_v51 = vpop.f32.mrb[102].mxu0 }
 0x3d5   :  { %v10648_v60 = vadd.f32 %v2515_v51, %v9978_v25  ;;  %v7400_v22 = vpop.f32.mrb[103].mxu0 }
 0x3d7   :  { %v7770_v27 = vpack.c.bf16 %v10648_v60, %v10644_v35 }
 0x3d8   :  { %v2520_v59 = vpop.f32.mrb[104].mxu0 }
 0x3d9   :  { %v10653_v3 = vadd.f32 %v2520_v59, %v9983_v38  ;;  %v7403_v24 = vpop.f32.mrb[105].mxu0  ;;  %7771 = vmatpush1.bf16.msra.mxu1 %v7770_v27 }
 0x3da   :  { %7772 = vmatprep.subr.bf16.mxu1 %v13458_v5 }
 0x3dc   :  { %v2525_v10 = vpop.f32.mrb[106].mxu0 }
 0x3dd   :  { %v10657_v41 = vadd.f32 %v2525_v10, %v9988_v55  ;;  %v7406_v17 = vpop.f32.mrb[107].mxu0 }
 0x3df   :  { %v7773_v25 = vpack.c.bf16 %v10657_v41, %v10653_v3 }
 0x3e0   :  { %v2530_v51 = vpop.f32.mrb[108].mxu0 }
 0x3e1   :  { %v10662_v33 = vadd.f32 %v2530_v51, %v9993_v20  ;;  %v7409_v22 = vpop.f32.mrb[109].mxu0  ;;  %7774 = vmatpush1.bf16.msra.mxu1 %v7773_v25 }
 0x3e2   :  { %7775 = vmatprep.subr.bf16.mxu1 %v13458_v5 }
 0x3e4   :  { %v2535_v38 = vpop.f32.mrb[110].mxu0 }
 0x3e5   :  { %v10666_v27 = vadd.f32 %v2535_v38, %v9998_v1  ;;  %v7412_v59 = vpop.f32.mrb[111].mxu0 }
 0x3e7   :  { %v7776_v55 = vpack.c.bf16 %v10666_v27, %v10662_v33 }
 0x3e8   :  { %v2540_v24 = vpop.f32.mrb[112].mxu0 }
 0x3e9   :  { %v10671_v10 = vadd.f32 %v2540_v24, %v10003_v23  ;;  %v7415_v17 = vpop.f32.mrb[113].mxu0  ;;  %7777 = vmatpush1.bf16.msra.mxu1 %v7776_v55 }
 0x3ea   :  { %7778 = vmatprep.subr.bf16.mxu1 %v13458_v5 }
 0x3eb   :  { %13487 = vst [vmem:[#allocation68_spill] sm:$0xff] %v10671_v10 }
 0x3ec   :  { %v2545_v20 = vpop.f32.mrb[114].mxu0 }
 0x3ed   :  { %v10675_v25 = vadd.f32 %v2545_v20, %v10008_v36  ;;  %v7418_v51 = vpop.f32.mrb[115].mxu0  ;;  %v13343_v36 = vsub.s32 2, %v10159_v37  ;;  %v13574_v37 = vld [vmem:[#allocation55_spill] sm:$0xff] }
 0x3ef   :  { %13488 = vst [vmem:[#allocation69_spill] sm:$0xff] %v10675_v25  ;;  %v7779_v1 = vpack.c.bf16 %v10675_v25, %v10671_v10 }
 0x3f0   :  { %v2550_v22 = vpop.f32.mrb[116].mxu0 }
 0x3f1   :  { %v10680_v38 = vadd.f32 %v2550_v22, %v10013_v50  ;;  %v7421_v59 = vpop.f32.mrb[117].mxu0  ;;  %7780 = vmatpush1.bf16.msra.mxu1 %v7779_v1  ;;  %v13492_v22 = vmov 0.0   ;;  %v13493_v1 = vpack.c.bf16 %v10338_v40, %v10332_v34  ;;  %v13498_v40 = vpack.c.bf16 %v10235_v15, %v10229_v8 }
 0x3f2   :  { %7781 = vmatprep.subr.bf16.mxu1 %v13458_v5  ;;  %v13495_v59 = vpack.c.bf16 %v10357_v9, %v10351_v63  ;;  %v13500_v63 = vpack.c.bf16 %v10257_v45, %v10251_v39  ;;  %v13505_v8 = vpack.c.bf16 %v10456_v48, %v10450_v19  ;;  %v13507_v15 = vpack.c.bf16 %v10479_v0, %v10473_v47  ;;  %v13509_v39 = vld [vmem:[#allocation41_spill] sm:$0xff]  ;;  %v13511_v45 = vld [vmem:[#allocation39_spill] sm:$0xff]  ;;  %v13522_v9 = vld [vmem:[#allocation56_spill] sm:$0xff] }
 0x3f3   :  { %13489 = vst [vmem:[#allocation70_spill] sm:$0xff] %v10680_v38  ;;  %v13508_v34 = vpack.c.bf16 %v10322_v54, %v10316_v44  ;;  %v13510_v19 = vpack.c.bf16 %v10511_v56, %v13509_v39  ;;  %v13518_v54 = vld [vmem:[#allocation53_spill] sm:$0xff]  ;;  %v2844_v47 = vmul.f32 %v10639_v46, %v10639_v46  ;;  %v13530_v56 = vpack.c.bf16 %v10630_v30, %v10624_v4 }
 0x3f4   :  { %v2555_v23 = vpop.f32.mrb[118].mxu0  ;;  %v13521_v44 = vld [vmem:[#allocation57_spill] sm:$0xff]  ;;  %v2847_v4 = vmul.f32 %v10653_v3, %v10653_v3 }
 0x3f5   :  { %v10684_v55 = vadd.f32 %v2555_v23, %v10404_v49  ;;  %v7424_v24 = vpop.f32.mrb[119].mxu0  ;;  %v10696_v49 = vrot.slane %v10169_v16, %v13343_v36  ;;  %v13496_v16 = vpack.c.bf16 %v10211_v58, %v10205_v29  ;;  %v13497_v23 = vpack.c.bf16 %v10376_v21, %v10370_v6  ;;  %v13513_v6 = vld [vmem:[#allocation44_spill] sm:$0xff]  ;;  %v13524_v21 = vld [vmem:[#allocation61_spill] sm:$0xff]  ;;  %v13571_v36 = vld [vmem:[#allocation50_spill] sm:$0xff] }
 0x3f6   :  { %v13503_v29 = vpack.c.bf16 %v10437_v7, %v10431_v13  ;;  %v13504_v58 = vpack.c.bf16 %v10290_v42, %v10284_v14  ;;  %v13515_v13 = vld [vmem:[#allocation49_spill] sm:$0xff]  ;;  %v13516_v14 = vld [vmem:[#allocation48_spill] sm:$0xff] }
 0x3f7   :  { %13490 = vst [vmem:[#allocation71_spill] sm:$0xff] %v10684_v55  ;;  %v7782_v17 = vpack.c.bf16 %v10684_v55, %v10680_v38  ;;  %v13517_v42 = vpack.c.bf16 %v13515_v13, %v13516_v14  ;;  %v13528_v7 = vld [vmem:[#allocation64_spill] sm:$0xff] }
 0x3f8   :  { %v2560_v20 = vpop.f32.mrb[120].mxu0 }
 0x3f9   :  { %v10690_v51 = vadd.f32 %v2560_v20, %v10418_v26  ;;  %v7427_v50 = vpop.f32.mrb[121].mxu0  ;;  %7783 = vmatpush1.bf16.msra.mxu1 %v7782_v17  ;;  %v13494_v26 = vpack.c.bf16 %v10186_v32, %v10180_v61  ;;  %v13499_v61 = vpack.c.bf16 %v10395_v53, %v10389_v18  ;;  %v13502_v32 = vpack.c.bf16 %v10274_v62, %v10268_v57  ;;  %v13512_v57 = vld [vmem:[#allocation45_spill] sm:$0xff]  ;;  %v13525_v53 = vld [vmem:[#allocation60_spill] sm:$0xff] }
 0x3fa   :  { %2781 = vmatprep.subr.mxu1 %v13492_v22  ;;  %v13514_v62 = vpack.c.bf16 %v13512_v57, %v13513_v6  ;;  %v13523_v18 = vpack.c.bf16 %v13521_v44, %v13522_v9  ;;  %v13526_v0 = vpack.c.bf16 %v13524_v21, %v13525_v53  ;;  %v2846_v17 = vmul.f32 %v10648_v60, %v10648_v60  ;;  %v13531_v53 = vld [vmem:[#allocation36_spill] sm:$0xff] }
 0x3fb   :  { %13491 = vst [vmem:[#allocation72_spill] sm:$0xff] %v10690_v51  ;;  %v2845_v20 = vmul.f32 %v10644_v35, %v10644_v35 }
 0x3fd   :  { %6181 = vmatpush1.msk.msra.mxu1 %vm2651_vm12, %v10690_v51  ;;  %v7844_v50 = vpack.c.bf16 %v2846_v17, %v2845_v20  ;;  %v13535_v17 = vld [vmem:[#allocation8_spill] sm:$0xff] }
 0x3fe   :  { %2790 = vmatmul.mubr.f32.vlgmr.msra.gmra.mrb[28].mxu1 %v10696_v49  ;;  %7785 = vmatprep.subr.bf16.mxu1 %v13493_v1  ;;  %v2848_v1 = vmul.f32 %v10657_v41, %v10657_v41 }
 0x3ff   :  { %7787 = vmatpush3.bf16.msra.mxu1 %v13494_v26  ;;  %2923 = vmatprep.mubr.f32.mxu1 %v10176_v43  ;;  %v13501_v43 = vpack.c.bf16 %v10416_v52, %v10410_v2  ;;  %v13506_v2 = vpack.c.bf16 %v10306_v12, %v10300_v28  ;;  %v13519_v28 = vld [vmem:[#allocation52_spill] sm:$0xff]  ;;  %v13527_v52 = vld [vmem:[#allocation65_spill] sm:$0xff]  ;;  %v2850_v26 = vmul.f32 %v10666_v27, %v10666_v27 }
 0x400   :  { %7789 = vmatprep.subr.bf16.mxu1 %v13495_v59  ;;  %v13520_v12 = vpack.c.bf16 %v13518_v54, %v13519_v28  ;;  %v13529_v48 = vpack.c.bf16 %v13527_v52, %v13528_v7  ;;  %v7847_v30 = vpack.c.bf16 %v2848_v1, %v2847_v4  ;;  %v2849_v59 = vmul.f32 %v10662_v33, %v10662_v33  ;;  %v13532_v7 = vld [vmem:[#allocation4_spill] sm:$0xff]  ;;  %v13537_v4 = vld [vmem:[#allocation10_spill] sm:$0xff] }
 0x403   :  { %7791 = vmatpush3.bf16.msra.mxu1 %v13496_v16  ;;  %v7850_v16 = vpack.c.bf16 %v2850_v26, %v2849_v59  ;;  %v13538_v26 = vld [vmem:[#allocation11_spill] sm:$0xff] }
 0x404   :  { %7793 = vmatprep.subr.bf16.mxu1 %v13497_v23  ;;  %v2852_v23 = vmul.f32 %v10675_v25, %v10675_v25  ;;  %v13579_v25 = vld [vmem:[#allocation66_spill] sm:$0xff] }
 0x407   :  { %7795 = vmatpush3.bf16.msra.mxu1 %v13498_v40  ;;  %v2851_v40 = vmul.f32 %v10671_v10, %v10671_v10  ;;  %v13580_v10 = vld [vmem:[#allocation67_spill] sm:$0xff] }
 0x408   :  { %7797 = vmatprep.subr.bf16.mxu1 %v13499_v61 }
 0x409   :  { %v7853_v61 = vpack.c.bf16 %v2852_v23, %v2851_v40  ;;  %v13540_v23 = vld [vmem:[#allocation12_spill] sm:$0xff] }
 0x40b   :  { %7799 = vmatpush3.bf16.msra.mxu1 %v13500_v63  ;;  %v2854_v63 = vmul.f32 %v10684_v55, %v10684_v55  ;;  %v13577_v55 = vld [vmem:[#allocation62_spill] sm:$0xff] }
 0x40c   :  { %7801 = vmatprep.subr.bf16.mxu1 %v13501_v43  ;;  %v2853_v43 = vmul.f32 %v10680_v38, %v10680_v38  ;;  %v13578_v38 = vld [vmem:[#allocation63_spill] sm:$0xff] }
 0x40f   :  { %7803 = vmatpush3.bf16.msra.mxu1 %v13502_v32  ;;  %v7856_v32 = vpack.c.bf16 %v2854_v63, %v2853_v43  ;;  %v13542_v43 = vld [vmem:[#allocation14_spill] sm:$0xff] }
 0x410   :  { %7805 = vmatprep.subr.bf16.mxu1 %v13503_v29  ;;  %v2855_v29 = vmul.f32 %v10690_v51, %v10690_v51  ;;  %v13576_v51 = vld [vmem:[#allocation59_spill] sm:$0xff] }
 0x413   :  { %7807 = vmatpush3.bf16.msra.mxu1 %v13504_v58 }
 0x414   :  { %7809 = vmatprep.subr.bf16.mxu1 %v13505_v8 }
 0x417   :  { %7811 = vmatpush3.bf16.msra.mxu1 %v13506_v2 }
 0x418   :  { %7813 = vmatprep.subr.bf16.mxu1 %v13507_v15 }
 0x41b   :  { %7815 = vmatpush3.bf16.msra.mxu1 %v13508_v34 }
 0x41c   :  { %7816 = vmatprep.subr.bf16.mxu1 %v13458_v5 }
 0x41e   :  { %2924 = vmatmul.mubr.f32.vlgmr.msra.gmra.mrb[30].mxu1 %v10483_v31  ;;  %v2843_v31 = vmul.f32 %v10636_v11, %v10636_v11 }
 0x41f   :  { %7818 = vmatpush1.bf16.msra.mxu1 %v13510_v19  ;;  %6184 = vmatprep.mubr.msk.f32.mxu1 %vm2648_vm11, %v13511_v45 }
 0x420   :  { %7819 = vmatprep.subr.bf16.mxu1 %v13458_v5  ;;  %v7841_v24 = vpack.c.bf16 %v2844_v47, %v2843_v31  ;;  %v13533_v47 = vld [vmem:[#allocation6_spill] sm:$0xff] }
 0x423   :  { %7821 = vmatpush1.bf16.msra.mxu1 %v13514_v62 }
 0x424   :  { %7822 = vmatprep.subr.bf16.mxu1 %v13458_v5 }
 0x427   :  { %7824 = vmatpush1.bf16.msra.mxu1 %v13517_v42 }
 0x428   :  { %7825 = vmatprep.subr.bf16.mxu1 %v13458_v5 }
 0x42b   :  { %7827 = vmatpush1.bf16.msra.mxu1 %v13520_v12 }
 0x42c   :  { %7828 = vmatprep.subr.bf16.mxu1 %v13458_v5 }
 0x42f   :  { %7830 = vmatpush1.bf16.msra.mxu1 %v13523_v18  ;;  %v2627_v18 = vld [vmem:[%s13268_s5] sm:$0x1] }
 0x430   :  { %7831 = vmatprep.subr.bf16.mxu1 %v13458_v5 }
 0x433   :  { %7833 = vmatpush1.bf16.msra.mxu1 %v13526_v0 }
 0x434   :  { %7834 = vmatprep.subr.bf16.mxu1 %v13458_v5 }
 0x437   :  { %7836 = vmatpush1.bf16.msra.mxu1 %v13529_v48 }
 0x438   :  { %7837 = vmatprep.subr.bf16.mxu1 %v13458_v5 }
 0x43b   :  { %7839 = vmatpush1.bf16.msra.mxu1 %v13530_v56  ;;  %v13534_v56 = vld [vmem:[#allocation7_spill] sm:$0xff] }
 0x43c   :  { %7840 = vmatprep.subr.bf16.mxu1 %v13458_v5 }
 0x43f   :  { %7842 = vmatpush1.bf16.msra.mxu1 %v7841_v24 }
 0x440   :  { %7843 = vmatprep.subr.bf16.mxu1 %v13458_v5 }
 0x443   :  { %7845 = vmatpush1.bf16.msra.mxu1 %v7844_v50  ;;  %v13536_v50 = vld [vmem:[#allocation9_spill] sm:$0xff] }
 0x444   :  { %7846 = vmatprep.subr.bf16.mxu1 %v13458_v5 }
 0x447   :  { %7848 = vmatpush1.bf16.msra.mxu1 %v7847_v30 }
 0x448   :  { %7849 = vmatprep.subr.bf16.mxu1 %v13458_v5 }
 0x44b   :  { %7851 = vmatpush1.bf16.msra.mxu1 %v7850_v16 }
 0x44c   :  { %7852 = vmatprep.subr.bf16.mxu1 %v13458_v5 }
 0x44f   :  { %7854 = vmatpush1.bf16.msra.mxu1 %v7853_v61  ;;  %v13541_v61 = vld [vmem:[#allocation13_spill] sm:$0xff] }
 0x450   :  { %7855 = vmatprep.subr.bf16.mxu1 %v13458_v5  ;;  %v13572_v5 = vld [vmem:[#allocation51_spill] sm:$0xff] }
 0x453   :  { %7857 = vmatpush1.bf16.msra.mxu1 %v7856_v32 }
 0x454   :  { %2985 = vmatprep.subr.mxu1 %v13492_v22 }
 0x457   :  { %6183 = vmatpush1.msk.msra.mxu1 %vm2651_vm12, %v2855_v29  ;;  %v13543_v29 = vld [vmem:[#allocation15_spill] sm:$0xff] }
 0x458   :  { %2994 = vmatmul.mubr.f32.vlgmr.msra.gmra.mrb[32].mxu1 %v10696_v49  ;;  %v2626_v49 = vld [vmem:[%s13267_s4] sm:$0x1] }
 0x45e   :  { %v6582_v58 = vpop.f32.mrb[26].mxu1 }
 0x45f   :  { %v6583_v8 = vpop.f32.mrb[27].mxu1 }
 0x460   :  { %v6584_v2 = vadd.f32 %v6583_v8, %v6582_v58  ;;  %v13544_v8 = vld [vmem:[#allocation16_spill] sm:$0xff] }
 0x4d1   :  { %v2791_v15 = vpop.f32.mrb[28].mxu1 }
 0x4d2   :  { %v2792_v34 = vadd.f32 %v6584_v2, %v2791_v15  ;;  %v2793_v39 = vpop.f32.mrb[29].mxu1  ;;  %v13545_v15 = vld [vmem:[#allocation17_spill] sm:$0xff] }
 0x4d3   :  { %v13546_v39 = vld [vmem:[#allocation18_spill] sm:$0xff] }
 0x4d4   :  { %v2999_v6 = vmul.f32 0.0025510204, %v2792_v34 }
 0x4d6   :  { %v3001_v14 = vmul.f32 %v2999_v6, %v2999_v6 }
 0x4f1   :  { %v6617_v19 = vpop.f32.mrb[30].mxu1 }
 0x4f2   :  { %v6618_v45 = vpop.f32.mrb[31].mxu1 }
 0x4f3   :  { %v6619_v57 = vadd.f32 %v6618_v45, %v6617_v19  ;;  %v13547_v45 = vld [vmem:[#allocation19_spill] sm:$0xff] }
 0x52b   :  { %v2995_v62 = vpop.f32.mrb[32].mxu1 }
 0x52c   :  { %v2996_v13 = vadd.f32 %v6619_v57, %v2995_v62  ;;  %v2997_v22 = vpop.f32.mrb[33].mxu1 }
 0x52e   :  { %v3000_v42 = vmul.f32 0.0025510204, %v2996_v13  ;;  %v13549_v13 = vld [vmem:[#allocation21_spill] sm:$0xff] }
 0x530   :  { %v3002_v54 = vsub.f32 %v3000_v42, %v3001_v14  ;;  %v13550_v14 = vld [vmem:[#allocation22_spill] sm:$0xff] }
 0x532   :  { %v3003_v28 = vmax.f32 %v3002_v54, 0.0  ;;  %v13551_v54 = vld [vmem:[#allocation23_spill] sm:$0xff] }
 0x534   :  { %v3004_v12 = vadd.f32 1e-05, %v3003_v28 }
 0x536   :  { %8358 = vrsqrt.f32 %v3004_v12  ;;  %v13552_v12 = vld [vmem:[#allocation24_spill] sm:$0xff] }
 0x540   :  { %v8359_v44 = vpop.eup %8358 }
 0x541   :  { %v3006_v9 = vmul.f32 %v8359_v44, %v2626_v49  ;;  %v13553_v44 = vld [vmem:[#allocation25_spill] sm:$0xff] }
 0x543   :  { %v3007_v21 = vmul.f32 %v3006_v9, %v2999_v6  ;;  %v10827_v0 = vrot.slane %v3006_v9, %v13531_v53  ;;  %v13548_v6 = vld [vmem:[#allocation20_spill] sm:$0xff] }
 0x545   :  { %v3008_v52 = vsub.f32 %v2627_v18, %v3007_v21  ;;  %v3015_v48 = vmul.f32 %v10827_v0, %v13532_v7  ;;  %v3016_v31 = vmul.f32 %v10827_v0, %v13533_v47  ;;  %v3017_v24 = vmul.f32 %v10827_v0, %v13534_v56  ;;  %v13554_v18 = vld [vmem:[#allocation26_spill] sm:$0xff]  ;;  %v13556_v47 = vld [vmem:[#allocation28_spill] sm:$0xff] }
 0x546   :  { %v3018_v20 = vmul.f32 %v10827_v0, %v13535_v17  ;;  %v3019_v1 = vmul.f32 %v10827_v0, %v13536_v50  ;;  %v3020_v30 = vmul.f32 %v10827_v0, %v13537_v4  ;;  %v3021_v59 = vmul.f32 %v10827_v0, %v13538_v26  ;;  %v13557_v17 = vld [vmem:[#allocation29_spill] sm:$0xff]  ;;  %v13558_v4 = vld [vmem:[#allocation30_spill] sm:$0xff] }
 0x547   :  { %v10844_v16 = vrot.slane %v3008_v52, %v13531_v53  ;;  %v3022_v40 = vmul.f32 %v10827_v0, %v13540_v23  ;;  %v3023_v63 = vmul.f32 %v10827_v0, %v13541_v61  ;;  %v3024_v32 = vmul.f32 %v10827_v0, %v13542_v43  ;;  %v13555_v52 = vld [vmem:[#allocation27_spill] sm:$0xff]  ;;  %v13560_v43 = vld [vmem:[#allocation32_spill] sm:$0xff]  ;;  %v13573_v53 = vld [vmem:[#allocation54_spill] sm:$0xff] }
 0x548   :  { %v3025_v58 = vmul.f32 %v10827_v0, %v13543_v29  ;;  %v3026_v2 = vmul.f32 %v10827_v0, %v13544_v8  ;;  %v3027_v34 = vmul.f32 %v10827_v0, %v13545_v15  ;;  %v3028_v19 = vmul.f32 %v10827_v0, %v13546_v39  ;;  %v13559_v23 = vld [vmem:[#allocation31_spill] sm:$0xff]  ;;  %v13561_v8 = vld [vmem:[#allocation33_spill] sm:$0xff]  ;;  %v13562_v39 = vld [vmem:[#allocation34_spill] sm:$0xff] }
 0x549   :  { %13539 = vst [vmem:[#allocation41_spill] sm:$0xff] %v10844_v16  ;;  %v3029_v57 = vmul.f32 %v10827_v0, %v13547_v45  ;;  %v3030_v62 = vmul.f32 %v10827_v0, %v13548_v6  ;;  %v3031_v22 = vmul.f32 %v10827_v0, %v13549_v13  ;;  %v3032_v42 = vmul.f32 %v10827_v0, %v13550_v14  ;;  %v13563_v6 = vld [vmem:[#allocation35_spill] sm:$0xff]  ;;  %v13564_v14 = vld [vmem:[#allocation37_spill] sm:$0xff]  ;;  %v13575_v16 = vld [vmem:[#allocation58_spill] sm:$0xff] }
 0x54a   :  { %v3033_v28 = vmul.f32 %v10827_v0, %v13551_v54  ;;  %v3034_v49 = vmul.f32 %v10827_v0, %v13552_v12  ;;  %v3035_v9 = vmul.f32 %v10827_v0, %v13553_v44  ;;  %v3036_v21 = vmul.f32 %v10827_v0, %v13554_v18  ;;  %v13565_v12 = vld [vmem:[#allocation38_spill] sm:$0xff]  ;;  %v13566_v18 = vld [vmem:[#allocation40_spill] sm:$0xff] }
 0x54b   :  { %v3037_v7 = vmul.f32 %v10827_v0, %v13555_v52  ;;  %v3038_v56 = vmul.f32 %v10827_v0, %v13556_v47  ;;  %v3039_v50 = vmul.f32 %v10827_v0, %v13557_v17  ;;  %v3040_v26 = vmul.f32 %v10827_v0, %v13558_v4  ;;  %v13567_v47 = vld [vmem:[#allocation42_spill] sm:$0xff]  ;;  %v13568_v4 = vld [vmem:[#allocation43_spill] sm:$0xff] }
 0x54c   :  { %v3041_v61 = vmul.f32 %v10827_v0, %v13559_v23  ;;  %v3042_v29 = vmul.f32 %v10827_v0, %v13560_v43  ;;  %v3043_v15 = vmul.f32 %v10827_v0, %v13561_v8  ;;  %v3044_v45 = vmul.f32 %v10827_v0, %v13562_v39  ;;  %v13569_v43 = vld [vmem:[#allocation46_spill] sm:$0xff]  ;;  %v13570_v39 = vld [vmem:[#allocation47_spill] sm:$0xff] }
 0x54d   :  { %v3045_v13 = vmul.f32 %v10827_v0, %v13563_v6  ;;  %v3046_v54 = vmul.f32 %v10827_v0, %v13564_v14  ;;  %v3047_v44 = vmul.f32 %v10827_v0, %v13565_v12  ;;  %v3048_v52 = vmul.f32 %v10827_v0, %v13566_v18 }
 0x54e   :  { %v3049_v17 = vmul.f32 %v10827_v0, %v13567_v47  ;;  %v3050_v23 = vmul.f32 %v10827_v0, %v13568_v4  ;;  %v3051_v8 = vmul.f32 %v10827_v0, %v13569_v43  ;;  %v3052_v6 = vmul.f32 %v10827_v0, %v13570_v39 }
 0x54f   :  { %v3053_v14 = vmul.f32 %v10827_v0, %v13571_v36  ;;  %v3054_v12 = vmul.f32 %v10827_v0, %v13572_v5  ;;  %v3055_v18 = vmul.f32 %v10827_v0, %v13573_v53  ;;  %v3056_v47 = vmul.f32 %v10827_v0, %v13574_v37 }
 0x550   :  { %v3057_v4 = vmul.f32 %v10827_v0, %v13575_v16  ;;  %v3058_v43 = vmul.f32 %v10827_v0, %v13576_v51  ;;  %v3059_v39 = vmul.f32 %v10827_v0, %v13577_v55  ;;  %v3060_v36 = vmul.f32 %v10827_v0, %v13578_v38 }
 0x551   :  { %v3061_v5 = vmul.f32 %v10827_v0, %v13579_v25  ;;  %v3062_v53 = vmul.f32 %v10827_v0, %v13580_v10  ;;  %v3063_v37 = vmul.f32 %v10636_v11, %v10827_v0  ;;  %v3064_v16 = vmul.f32 %v10639_v46, %v10827_v0  ;;  %v13581_v46 = vld [vmem:[#allocation68_spill] sm:$0xff] }
 0x552   :  { %v3065_v51 = vmul.f32 %v10644_v35, %v10827_v0  ;;  %v3066_v55 = vmul.f32 %v10648_v60, %v10827_v0  ;;  %v3067_v38 = vmul.f32 %v10653_v3, %v10827_v0  ;;  %v3068_v25 = vmul.f32 %v10657_v41, %v10827_v0  ;;  %v13582_v60 = vld [vmem:[#allocation69_spill] sm:$0xff]  ;;  %v13583_v41 = vld [vmem:[#allocation70_spill] sm:$0xff] }
 0x553   :  { %v3069_v10 = vmul.f32 %v10662_v33, %v10827_v0  ;;  %v3070_v11 = vmul.f32 %v10666_v27, %v10827_v0  ;;  %v3071_v35 = vmul.f32 %v13581_v46, %v10827_v0  ;;  %v3072_v3 = vmul.f32 %v13582_v60, %v10827_v0  ;;  %v13584_v27 = vld [vmem:[#allocation71_spill] sm:$0xff]  ;;  %v13585_v60 = vld [vmem:[#allocation72_spill] sm:$0xff] }
 0x554   :  { %v3073_v33 = vmul.f32 %v13583_v41, %v10827_v0  ;;  %v3074_v46 = vmul.f32 %v13584_v27, %v10827_v0  ;;  %v3075_v41 = vmul.f32 %v13585_v60, %v10827_v0  ;;  %v13586_v27 = vld [vmem:[#allocation41_spill] sm:$0xff] }
 0x555   :  { %v3082_v0 = vadd.f32 %v13586_v27, %v3015_v48  ;;  %v3083_v60 = vadd.f32 %v13586_v27, %v3016_v31  ;;  %v3084_v48 = vadd.f32 %v13586_v27, %v3017_v24  ;;  %v3085_v31 = vadd.f32 %v13586_v27, %v3018_v20 }
 0x556   :  { %v3086_v24 = vadd.f32 %v13586_v27, %v3019_v1  ;;  %v3087_v20 = vadd.f32 %v13586_v27, %v3020_v30  ;;  %v3088_v1 = vadd.f32 %v13586_v27, %v3021_v59  ;;  %v3089_v30 = vadd.f32 %v13586_v27, %v3022_v40 }
 0x557   :  { %v3090_v59 = vadd.f32 %v13586_v27, %v3023_v63  ;;  %v3091_v40 = vadd.f32 %v13586_v27, %v3024_v32  ;;  %v3092_v63 = vadd.f32 %v13586_v27, %v3025_v58  ;;  %v3093_v32 = vadd.f32 %v13586_v27, %v3026_v2 }
 0x558   :  { %v10967_v58 = vadd.f32 %v13586_v27, %v3027_v34  ;;  %v10970_v2 = vadd.f32 %v13586_v27, %v3028_v19  ;;  %v10973_v34 = vadd.f32 %v13586_v27, %v3029_v57  ;;  %v10979_v19 = vadd.f32 %v13586_v27, %v3031_v22 }
 0x559   :  { %v10985_v57 = vadd.f32 %v13586_v27, %v3033_v28  ;;  %v10997_v22 = vadd.f32 %v13586_v27, %v3037_v7  ;;  %v11006_v28 = vadd.f32 %v13586_v27, %v3040_v26  ;;  %v11018_v7 = vadd.f32 %v13586_v27, %v3044_v45 }
 0x55a   :  { %13587 = vst [vmem:[#allocation39_spill] sm:$0xff] %v10967_v58  ;;  %13588 = vst [vmem:[#allocation45_spill] sm:$0xff] %v10970_v2  ;;  %v10976_v58 = vadd.f32 %v13586_v27, %v3030_v62  ;;  %v10982_v2 = vadd.f32 %v13586_v27, %v3032_v42  ;;  %v10991_v62 = vadd.f32 %v13586_v27, %v3035_v9 }
 0x55b   :  { %13589 = vst [vmem:[#allocation44_spill] sm:$0xff] %v10973_v34  ;;  %13591 = vst [vmem:[#allocation48_spill] sm:$0xff] %v10979_v19  ;;  %v10988_v34 = vadd.f32 %v13586_v27, %v3034_v49  ;;  %v11000_v19 = vadd.f32 %v13586_v27, %v3038_v56  ;;  %v11003_v42 = vadd.f32 %v13586_v27, %v3039_v50 }
 0x55c   :  { %13590 = vst [vmem:[#allocation49_spill] sm:$0xff] %v10976_v58  ;;  %v10994_v58 = vadd.f32 %v13586_v27, %v3036_v21  ;;  %v11009_v49 = vadd.f32 %v13586_v27, %v3041_v61  ;;  %v11012_v9 = vadd.f32 %v13586_v27, %v3042_v29  ;;  %v11015_v21 = vadd.f32 %v13586_v27, %v3043_v15 }
 0x55d   :  { %v11021_v56 = vadd.f32 %v13586_v27, %v3045_v13  ;;  %v11024_v50 = vadd.f32 %v13586_v27, %v3046_v54  ;;  %v11027_v26 = vadd.f32 %v13586_v27, %v3047_v44  ;;  %v11030_v61 = vadd.f32 %v13586_v27, %v3048_v52 }
 0x55e   :  { %v11033_v29 = vadd.f32 %v13586_v27, %v3049_v17  ;;  %v11036_v15 = vadd.f32 %v13586_v27, %v3050_v23  ;;  %v11039_v45 = vadd.f32 %v13586_v27, %v3051_v8  ;;  %v11042_v13 = vadd.f32 %v13586_v27, %v3052_v6 }
 0x55f   :  { %v11045_v54 = vadd.f32 %v13586_v27, %v3053_v14  ;;  %v11048_v44 = vadd.f32 %v13586_v27, %v3054_v12  ;;  %v11051_v52 = vadd.f32 %v13586_v27, %v3055_v18  ;;  %v11054_v17 = vadd.f32 %v13586_v27, %v3056_v47 }
 0x560   :  { %v11057_v23 = vadd.f32 %v13586_v27, %v3057_v4  ;;  %v11060_v8 = vadd.f32 %v13586_v27, %v3058_v43  ;;  %v11063_v6 = vadd.f32 %v13586_v27, %v3059_v39  ;;  %v11066_v14 = vadd.f32 %v13586_v27, %v3060_v36 }
 0x561   :  { %v11069_v12 = vadd.f32 %v13586_v27, %v3061_v5  ;;  %v11072_v18 = vadd.f32 %v13586_v27, %v3062_v53  ;;  %v11075_v47 = vadd.f32 %v13586_v27, %v3063_v37  ;;  %v11078_v4 = vadd.f32 %v13586_v27, %v3064_v16 }
 0x562   :  { %v11081_v43 = vadd.f32 %v13586_v27, %v3065_v51  ;;  %v11084_v39 = vadd.f32 %v13586_v27, %v3066_v55  ;;  %v11087_v36 = vadd.f32 %v13586_v27, %v3067_v38  ;;  %v11090_v5 = vadd.f32 %v13586_v27, %v3068_v25 }
 0x563   :  { %v11093_v53 = vadd.f32 %v13586_v27, %v3069_v10  ;;  %v11096_v37 = vadd.f32 %v13586_v27, %v3070_v11  ;;  %v11099_v16 = vadd.f32 %v13586_v27, %v3071_v35  ;;  %v11102_v51 = vadd.f32 %v13586_v27, %v3072_v3 }
 0x564   :  { %v11105_v55 = vadd.f32 %v13586_v27, %v3073_v33  ;;  %v11108_v38 = vadd.f32 %v13586_v27, %v3074_v46  ;;  %v11111_v25 = vadd.f32 %v13586_v27, %v3075_v41  ;;  %v11113_v10 = vmax.f32 %v3084_v48, 0.0 }
 0x565   :  { %13592 = vst [vmem:[#allocation53_spill] sm:$0xff] %v11093_v53  ;;  %13593 = vst [vmem:[#allocation52_spill] sm:$0xff] %v11099_v16  ;;  %v11115_v53 = vmax.f32 %v3082_v0, 0.0  ;;  %v11117_v11 = vmax.f32 %v3083_v60, 0.0  ;;  %v11119_v35 = vmax.f32 %v3085_v31, 0.0  ;;  %v11121_v16 = vmax.f32 %v3086_v24, 0.0 }
 0x566   :  { %13594 = vst [vmem:[#allocation57_spill] sm:$0xff] %v11105_v55  ;;  %v11123_v3 = vmax.f32 %v3087_v20, 0.0  ;;  %v11125_v33 = vmax.f32 %v3088_v1, 0.0  ;;  %v11127_v55 = vmax.f32 %v3089_v30, 0.0  ;;  %3330 = vrot.lane.b32.xlu1 %v11113_v10, %s8369_s18  ;;  %v11131_v46 = vmax.f32 %v3090_v59, 0.0  ;;  %3207 = vst.msk [vmem:[#allocation3 + $0x10] sm:$0xff] %vm3204_vm13, %v11113_v10 }
 0x567   :  { %v11133_v41 = vmax.f32 %v3091_v40, 0.0  ;;  %v11135_v27 = vmax.f32 %v3092_v63, 0.0  ;;  %v11137_v0 = vmax.f32 %v3093_v32, 0.0  ;;  %3328 = vrot.lane.b32.xlu0 %v11117_v11, %s8369_s18  ;;  %3206 = vst.msk [vmem:[#allocation3 + $0x8] sm:$0xff] %vm3204_vm13, %v11117_v11  ;;  %3205 = vst.msk [vmem:[#allocation3] sm:$0xff] %vm3204_vm13, %v11115_v53  ;;  %v13595_v60 = vld [vmem:[#allocation39_spill] sm:$0xff] }
 0x568   :  { %3208 = vst.msk [vmem:[#allocation3 + $0x18] sm:$0xff] %vm3204_vm13, %v11119_v35  ;;  %v11150_v48 = vmax.f32 %v13595_v60, 0.0  ;;  %v13596_v31 = vld [vmem:[#allocation45_spill] sm:$0xff]  ;;  %v13597_v20 = vld [vmem:[#allocation44_spill] sm:$0xff]  ;;  %3209 = vst.msk [vmem:[#allocation3 + $0x20] sm:$0xff] %vm3204_vm13, %v11121_v16  ;;  %v11173_v32 = vmax.f32 %v10982_v2, 0.0 }
 0x569   :  { %v11153_v24 = vmax.f32 %v13596_v31, 0.0  ;;  %v11156_v1 = vmax.f32 %v13597_v20, 0.0  ;;  %v13598_v30 = vld [vmem:[#allocation49_spill] sm:$0xff]  ;;  %3210 = vst.msk [vmem:[#allocation3 + $0x28] sm:$0xff] %vm3204_vm13, %v11123_v3  ;;  %3211 = vst.msk [vmem:[#allocation3 + $0x30] sm:$0xff] %vm3204_vm13, %v11125_v33  ;;  %v13599_v40 = vld [vmem:[#allocation48_spill] sm:$0xff] }
 0x56a   :  { %v11159_v59 = vmax.f32 %v13598_v30, 0.0  ;;  %3212 = vst.msk [vmem:[#allocation3 + $0x38] sm:$0xff] %vm3204_vm13, %v11127_v55  ;;  %v11170_v63 = vmax.f32 %v13599_v40, 0.0  ;;  %v11176_v60 = vmax.f32 %v10985_v57, 0.0  ;;  %v11179_v31 = vmax.f32 %v10988_v34, 0.0  ;;  %3213 = vst.msk [vmem:[#allocation3 + $0x40] sm:$0xff] %vm3204_vm13, %v11131_v46  ;;  %3334 = vrot.lane.b32.xlu1 %v11121_v16, %s8369_s18 }
 0x56b   :  { %3214 = vst.msk [vmem:[#allocation3 + $0x48] sm:$0xff] %vm3204_vm13, %v11133_v41  ;;  %3215 = vst.msk [vmem:[#allocation3 + $0x50] sm:$0xff] %vm3204_vm13, %v11135_v27  ;;  %v11190_v2 = vmax.f32 %v10991_v62, 0.0  ;;  %v11193_v57 = vmax.f32 %v10994_v58, 0.0  ;;  %v11196_v34 = vmax.f32 %v10997_v22, 0.0  ;;  %v11199_v20 = vmax.f32 %v11000_v19, 0.0  ;;  %3332 = vrot.lane.b32.xlu0 %v11119_v35, %s8369_s18 }
 0x56c   :  { %3216 = vst.msk [vmem:[#allocation3 + $0x58] sm:$0xff] %vm3204_vm13, %v11137_v0  ;;  %3217 = vst.msk [vmem:[#allocation3 + $0x60] sm:$0xff] %vm3204_vm13, %v11150_v48  ;;  %v11210_v58 = vmax.f32 %v11003_v42, 0.0  ;;  %v11213_v62 = vmax.f32 %v11006_v28, 0.0  ;;  %v11216_v19 = vmax.f32 %v11009_v49, 0.0  ;;  %v11219_v22 = vmax.f32 %v11012_v9, 0.0 }
 0x56d   :  { %3218 = vst.msk [vmem:[#allocation3 + $0x68] sm:$0xff] %vm3204_vm13, %v11153_v24  ;;  %3219 = vst.msk [vmem:[#allocation3 + $0x70] sm:$0xff] %vm3204_vm13, %v11156_v1  ;;  %v11234_v42 = vmax.f32 %v11015_v21, 0.0  ;;  %v11237_v28 = vmax.f32 %v11018_v7, 0.0  ;;  %v11240_v49 = vmax.f32 %v11021_v56, 0.0  ;;  %v11243_v9 = vmax.f32 %v11024_v50, 0.0 }
 0x56e   :  { %3220 = vst.msk [vmem:[#allocation3 + $0x78] sm:$0xff] %vm3204_vm13, %v11159_v59  ;;  %3221 = vst.msk [vmem:[#allocation3 + $0x80] sm:$0xff] %vm3204_vm13, %v11170_v63  ;;  %v11254_v21 = vmax.f32 %v11027_v26, 0.0  ;;  %v11257_v7 = vmax.f32 %v11030_v61, 0.0  ;;  %v11260_v56 = vmax.f32 %v11033_v29, 0.0  ;;  %v11263_v50 = vmax.f32 %v11036_v15, 0.0  ;;  %3579 = vrot.lane.b32.xlu1 %v11119_v35, %s8371_s29 }
 0x56f   :  { %3222 = vst.msk [vmem:[#allocation3 + $0x88] sm:$0xff] %vm3204_vm13, %v11173_v32  ;;  %3223 = vst.msk [vmem:[#allocation3 + $0x90] sm:$0xff] %vm3204_vm13, %v11176_v60  ;;  %v11274_v26 = vmax.f32 %v11039_v45, 0.0  ;;  %v11277_v61 = vmax.f32 %v11042_v13, 0.0  ;;  %v11280_v29 = vmax.f32 %v11045_v54, 0.0  ;;  %v11283_v15 = vmax.f32 %v11048_v44, 0.0  ;;  %3577 = vrot.lane.b32.xlu0 %v11113_v10, %s8371_s29 }
 0x570   :  { %3224 = vst.msk [vmem:[#allocation3 + $0x98] sm:$0xff] %vm3204_vm13, %v11179_v31  ;;  %3225 = vst.msk [vmem:[#allocation3 + $0xa0] sm:$0xff] %vm3204_vm13, %v11190_v2  ;;  %v6185_v45 = vld [vmem:[%s13269_s6 + $0x18] sm:$0xff]  ;;  %v6186_v13 = vld [vmem:[%s13269_s6 + $0x20] sm:$0xff]  ;;  %v11300_v54 = vmax.f32 %v11051_v52, 0.0  ;;  %v11303_v44 = vmax.f32 %v11054_v17, 0.0 }
 0x571   :  { %3226 = vst.msk [vmem:[#allocation3 + $0xa8] sm:$0xff] %vm3204_vm13, %v11193_v57  ;;  %3227 = vst.msk [vmem:[#allocation3 + $0xb0] sm:$0xff] %vm3204_vm13, %v11196_v34  ;;  %v11306_v30 = vmax.f32 %v11057_v23, 0.0  ;;  %v11309_v40 = vmax.f32 %v11060_v8, 0.0  ;;  %v11324_v52 = vmax.f32 %v11063_v6, 0.0  ;;  %v11327_v17 = vmax.f32 %v11066_v14, 0.0 }
 0x572   :  { %3228 = vst.msk [vmem:[#allocation3 + $0xb8] sm:$0xff] %vm3204_vm13, %v11199_v20  ;;  %3229 = vst.msk [vmem:[#allocation3 + $0xc0] sm:$0xff] %vm3204_vm13, %v11210_v58  ;;  %v11330_v23 = vmax.f32 %v11069_v12, 0.0  ;;  %v11333_v8 = vmax.f32 %v11072_v18, 0.0  ;;  %v7858_v6 = vpack.c.bf16 %v6186_v13, %v6185_v45  ;;  %v11360_v14 = vmax.f32 %v11075_v47, 0.0  ;;  %3336 = vrot.lane.b32.xlu1 %v11123_v3, %s8369_s18  ;;  %v6187_v47 = vld [vmem:[%s13269_s6 + $0x28] sm:$0xff] }
 0x573   :  { %3230 = vst.msk [vmem:[#allocation3 + $0xc8] sm:$0xff] %vm3204_vm13, %v11213_v62  ;;  %3231 = vst.msk [vmem:[#allocation3 + $0xd0] sm:$0xff] %vm3204_vm13, %v11216_v19  ;;  %v11363_v12 = vmax.f32 %v11078_v4, 0.0  ;;  %v11366_v18 = vmax.f32 %v11081_v43, 0.0  ;;  %v11369_v10 = vmax.f32 %v11084_v39, 0.0  ;;  %3581 = vrot.lane.b32.xlu0 %v11121_v16, %s8371_s29  ;;  %v11379_v35 = vmax.f32 %v11087_v36, 0.0 }
 0x574   :  { %3232 = vst.msk [vmem:[#allocation3 + $0xd8] sm:$0xff] %vm3204_vm13, %v11219_v22  ;;  %3233 = vst.msk [vmem:[#allocation3 + $0xe0] sm:$0xff] %vm3204_vm13, %v11234_v42  ;;  %v11382_v4 = vmax.f32 %v11090_v5, 0.0  ;;  %v13600_v43 = vld [vmem:[#allocation53_spill] sm:$0xff]  ;;  %v11388_v39 = vmax.f32 %v11096_v37, 0.0  ;;  %7859 = vmatprep.subr.bf16.mxu1 %v7858_v6  ;;  %v13601_v36 = vld [vmem:[#allocation52_spill] sm:$0xff] }
 0x575   :  { %3234 = vst.msk [vmem:[#allocation3 + $0xe8] sm:$0xff] %vm3204_vm13, %v11237_v28  ;;  %3235 = vst.msk [vmem:[#allocation3 + $0xf0] sm:$0xff] %vm3204_vm13, %v11240_v49  ;;  %v11385_v45 = vmax.f32 %v13600_v43, 0.0  ;;  %v11399_v5 = vmax.f32 %v13601_v36, 0.0  ;;  %v11402_v16 = vmax.f32 %v11102_v51, 0.0  ;;  %v13602_v37 = vld [vmem:[#allocation57_spill] sm:$0xff]  ;;  %7861 = vmatpush3.bf16.msra.mxu1 %v7858_v6 }
 0x576   :  { %3236 = vst.msk [vmem:[#allocation3 + $0xf8] sm:$0xff] %vm3204_vm13, %v11243_v9  ;;  %3237 = vst.msk [vmem:[#allocation3 + $0x100] sm:$0xff] %vm3204_vm13, %v11254_v21  ;;  %v11405_v13 = vmax.f32 %v13602_v37, 0.0  ;;  %v11408_v43 = vmax.f32 %v11108_v38, 0.0  ;;  %7432 = vmatprep.subr.mxu1 %v6187_v47  ;;  %3583 = vrot.lane.b32.xlu1 %v11123_v3, %s8371_s29 }
 0x577   :  { %3238 = vst.msk [vmem:[#allocation3 + $0x108] sm:$0xff] %vm3204_vm13, %v11257_v7  ;;  %3239 = vst.msk [vmem:[#allocation3 + $0x110] sm:$0xff] %vm3204_vm13, %v11260_v56  ;;  %3338 = vrot.lane.b32.xlu0 %v11125_v33, %s8369_s18 }
 0x578   :  { %3240 = vst.msk [vmem:[#allocation3 + $0x118] sm:$0xff] %vm3204_vm13, %v11263_v50  ;;  %3241 = vst.msk [vmem:[#allocation3 + $0x120] sm:$0xff] %vm3204_vm13, %v11274_v26 }
 0x579   :  { %3242 = vst.msk [vmem:[#allocation3 + $0x128] sm:$0xff] %vm3204_vm13, %v11277_v61  ;;  %3243 = vst.msk [vmem:[#allocation3 + $0x130] sm:$0xff] %vm3204_vm13, %v11280_v29  ;;  %7433 = vmatpush3.msra.mxu1 %v6187_v47 }
 0x57a   :  { %3244 = vst.msk [vmem:[#allocation3 + $0x138] sm:$0xff] %vm3204_vm13, %v11283_v15  ;;  %3245 = vst.msk [vmem:[#allocation3 + $0x140] sm:$0xff] %vm3204_vm13, %v11300_v54  ;;  %3340 = vrot.lane.b32.xlu1 %v11127_v55, %s8369_s18 }
 0x57b   :  { %3246 = vst.msk [vmem:[#allocation3 + $0x148] sm:$0xff] %vm3204_vm13, %v11303_v44  ;;  %3247 = vst.msk [vmem:[#allocation3 + $0x150] sm:$0xff] %vm3204_vm13, %v11306_v30  ;;  %3585 = vrot.lane.b32.xlu0 %v11125_v33, %s8371_s29 }
 0x57c   :  { %3248 = vst.msk [vmem:[#allocation3 + $0x158] sm:$0xff] %vm3204_vm13, %v11309_v40  ;;  %3249 = vst.msk [vmem:[#allocation3 + $0x160] sm:$0xff] %vm3204_vm13, %v11324_v52 }
 0x57d   :  { %3250 = vst.msk [vmem:[#allocation3 + $0x168] sm:$0xff] %vm3204_vm13, %v11327_v17  ;;  %3251 = vst.msk [vmem:[#allocation3 + $0x170] sm:$0xff] %vm3204_vm13, %v11330_v23 }
 0x57e   :  { %3252 = vst.msk [vmem:[#allocation3 + $0x178] sm:$0xff] %vm3204_vm13, %v11333_v8  ;;  %3253 = vst.msk [vmem:[#allocation3 + $0x180] sm:$0xff] %vm3204_vm13, %v11360_v14  ;;  %3587 = vrot.lane.b32.xlu1 %v11127_v55, %s8371_s29 }
 0x57f   :  { %3254 = vst.msk [vmem:[#allocation3 + $0x188] sm:$0xff] %vm3204_vm13, %v11363_v12  ;;  %3255 = vst.msk [vmem:[#allocation3 + $0x190] sm:$0xff] %vm3204_vm13, %v11366_v18  ;;  %3342 = vrot.lane.b32.xlu0 %v11131_v46, %s8369_s18 }
 0x580   :  { %3256 = vst.msk [vmem:[#allocation3 + $0x198] sm:$0xff] %vm3204_vm13, %v11369_v10  ;;  %3257 = vst.msk [vmem:[#allocation3 + $0x1a0] sm:$0xff] %vm3204_vm13, %v11379_v35 }
 0x581   :  { %3258 = vst.msk [vmem:[#allocation3 + $0x1a8] sm:$0xff] %vm3204_vm13, %v11382_v4  ;;  %3259 = vst.msk [vmem:[#allocation3 + $0x1b0] sm:$0xff] %vm3204_vm13, %v11385_v45 }
 0x582   :  { %3260 = vst.msk [vmem:[#allocation3 + $0x1b8] sm:$0xff] %vm3204_vm13, %v11388_v39  ;;  %3261 = vst.msk [vmem:[#allocation3 + $0x1c0] sm:$0xff] %vm3204_vm13, %v11399_v5  ;;  %3344 = vrot.lane.b32.xlu1 %v11133_v41, %s8369_s18 }
 0x583   :  { %3262 = vst.msk [vmem:[#allocation3 + $0x1c8] sm:$0xff] %vm3204_vm13, %v11402_v16  ;;  %3263 = vst.msk [vmem:[#allocation3 + $0x1d0] sm:$0xff] %vm3204_vm13, %v11405_v13  ;;  %3589 = vrot.lane.b32.xlu0 %v11131_v46, %s8371_s29 }
 0x584   :  { %3264 = vst.msk [vmem:[#allocation3 + $0x1d8] sm:$0xff] %vm3204_vm13, %v11408_v43 }
 0x586   :  { %3591 = vrot.lane.b32.xlu1 %v11133_v41, %s8371_s29 }
 0x587   :  { %3346 = vrot.lane.b32.xlu0 %v11135_v27, %s8369_s18 }
 0x58a   :  { %3348 = vrot.lane.b32.xlu1 %v11137_v0, %s8369_s18 }
 0x58b   :  { %3593 = vrot.lane.b32.xlu0 %v11135_v27, %s8371_s29 }
 0x58e   :  { %3595 = vrot.lane.b32.xlu1 %v11137_v0, %s8371_s29 }
 0x58f   :  { %3350 = vrot.lane.b32.xlu0 %v11150_v48, %s8369_s18 }
 0x592   :  { %3352 = vrot.lane.b32.xlu1 %v11153_v24, %s8369_s18 }
 0x593   :  { %3597 = vrot.lane.b32.xlu0 %v11150_v48, %s8371_s29 }
 0x596   :  { %3599 = vrot.lane.b32.xlu1 %v11153_v24, %s8371_s29 }
 0x597   :  { %3354 = vrot.lane.b32.xlu0 %v11156_v1, %s8369_s18 }
 0x59a   :  { %3356 = vrot.lane.b32.xlu1 %v11159_v59, %s8369_s18 }
 0x59b   :  { %3601 = vrot.lane.b32.xlu0 %v11156_v1, %s8371_s29 }
 0x59e   :  { %3603 = vrot.lane.b32.xlu1 %v11159_v59, %s8371_s29 }
 0x59f   :  { %3358 = vrot.lane.b32.xlu0 %v11170_v63, %s8369_s18 }
 0x5a2   :  { %3360 = vrot.lane.b32.xlu1 %v11173_v32, %s8369_s18 }
 0x5a3   :  { %3605 = vrot.lane.b32.xlu0 %v11170_v63, %s8371_s29 }
 0x5a6   :  { %3607 = vrot.lane.b32.xlu1 %v11173_v32, %s8371_s29 }
 0x5a7   :  { %3362 = vrot.lane.b32.xlu0 %v11176_v60, %s8369_s18 }
 0x5aa   :  { %3364 = vrot.lane.b32.xlu1 %v11179_v31, %s8369_s18 }
 0x5ab   :  { %3609 = vrot.lane.b32.xlu0 %v11176_v60, %s8371_s29 }
 0x5ae   :  { %3611 = vrot.lane.b32.xlu1 %v11179_v31, %s8371_s29 }
 0x5af   :  { %3366 = vrot.lane.b32.xlu0 %v11190_v2, %s8369_s18 }
 0x5b2   :  { %3368 = vrot.lane.b32.xlu1 %v11193_v57, %s8369_s18 }
 0x5b3   :  { %3613 = vrot.lane.b32.xlu0 %v11190_v2, %s8371_s29 }
 0x5b6   :  { %3615 = vrot.lane.b32.xlu1 %v11193_v57, %s8371_s29 }
 0x5b7   :  { %3370 = vrot.lane.b32.xlu0 %v11196_v34, %s8369_s18 }
 0x5ba   :  { %3372 = vrot.lane.b32.xlu1 %v11199_v20, %s8369_s18 }
 0x5bb   :  { %3617 = vrot.lane.b32.xlu0 %v11196_v34, %s8371_s29 }
 0x5be   :  { %3619 = vrot.lane.b32.xlu1 %v11199_v20, %s8371_s29 }
 0x5bf   :  { %3374 = vrot.lane.b32.xlu0 %v11210_v58, %s8369_s18 }
 0x5c2   :  { %3376 = vrot.lane.b32.xlu1 %v11213_v62, %s8369_s18 }
 0x5c3   :  { %3621 = vrot.lane.b32.xlu0 %v11210_v58, %s8371_s29 }
 0x5c6   :  { %3623 = vrot.lane.b32.xlu1 %v11213_v62, %s8371_s29 }
 0x5c7   :  { %3378 = vrot.lane.b32.xlu0 %v11216_v19, %s8369_s18 }
 0x5ca   :  { %3380 = vrot.lane.b32.xlu1 %v11219_v22, %s8369_s18 }
 0x5cb   :  { %3625 = vrot.lane.b32.xlu0 %v11216_v19, %s8371_s29 }
 0x5ce   :  { %3627 = vrot.lane.b32.xlu1 %v11219_v22, %s8371_s29 }
 0x5cf   :  { %3382 = vrot.lane.b32.xlu0 %v11234_v42, %s8369_s18 }
 0x5d2   :  { %3384 = vrot.lane.b32.xlu1 %v11237_v28, %s8369_s18 }
 0x5d3   :  { %3629 = vrot.lane.b32.xlu0 %v11234_v42, %s8371_s29 }
 0x5d6   :  { %3631 = vrot.lane.b32.xlu1 %v11237_v28, %s8371_s29 }
 0x5d7   :  { %3386 = vrot.lane.b32.xlu0 %v11240_v49, %s8369_s18 }
 0x5d8   :  { %v3331_v51 = vpop.permute.xlu1 %3330 }
 0x5d9   :  { %v3329_v55 = vpop.permute.xlu0 %3328  ;;  %3513 = vst.msk [vmem:[#allocation3 + $0xf] sm:$0xff] %vm3511_vm14, %v3331_v51 }
 0x5da   :  { %3512 = vst.msk [vmem:[#allocation3 + $0x7] sm:$0xff] %vm3511_vm14, %v3329_v55  ;;  %3388 = vrot.lane.b32.xlu1 %v11243_v9, %s8369_s18 }
 0x5db   :  { %3633 = vrot.lane.b32.xlu0 %v11240_v49, %s8371_s29 }
 0x5dc   :  { %v3335_v38 = vpop.permute.xlu1 %3334 }
 0x5dd   :  { %v3333_v3 = vpop.permute.xlu0 %3332  ;;  %3515 = vst.msk [vmem:[#allocation3 + $0x1f] sm:$0xff] %vm3511_vm14, %v3335_v38 }
 0x5de   :  { %3514 = vst.msk [vmem:[#allocation3 + $0x17] sm:$0xff] %vm3511_vm14, %v3333_v3  ;;  %3635 = vrot.lane.b32.xlu1 %v11243_v9, %s8371_s29 }
 0x5df   :  { %3390 = vrot.lane.b32.xlu0 %v11254_v21, %s8369_s18 }
 0x5e0   :  { %v3580_v33 = vpop.permute.xlu1 %3579 }
 0x5e1   :  { %v3578_v46 = vpop.permute.xlu0 %3577  ;;  %3761 = vst.msk [vmem:[#allocation3 + $0x16] sm:$0xff] %vm3758_vm15, %v3580_v33 }
 0x5e2   :  { %3760 = vst.msk [vmem:[#allocation3 + $0xe] sm:$0xff] %vm3758_vm15, %v3578_v46  ;;  %3392 = vrot.lane.b32.xlu1 %v11257_v7, %s8369_s18 }
 0x5e3   :  { %3637 = vrot.lane.b32.xlu0 %v11254_v21, %s8371_s29 }
 0x5e4   :  { %v3337_v41 = vpop.permute.xlu1 %3336 }
 0x5e5   :  { %v3582_v27 = vpop.permute.xlu0 %3581  ;;  %3516 = vst.msk [vmem:[#allocation3 + $0x27] sm:$0xff] %vm3511_vm14, %v3337_v41 }
 0x5e6   :  { %3762 = vst.msk [vmem:[#allocation3 + $0x1e] sm:$0xff] %vm3758_vm15, %v3582_v27  ;;  %3639 = vrot.lane.b32.xlu1 %v11257_v7, %s8371_s29 }
 0x5e7   :  { %3394 = vrot.lane.b32.xlu0 %v11260_v56, %s8369_s18 }
 0x5e8   :  { %v3584_v0 = vpop.permute.xlu1 %3583 }
 0x5e9   :  { %v3339_v48 = vpop.permute.xlu0 %3338  ;;  %v11550_v24 = vld [vmem:[#allocation3 + $0x10] sm:$0xff]  ;;  %3763 = vst.msk [vmem:[#allocation3 + $0x26] sm:$0xff] %vm3758_vm15, %v3584_v0 }
 0x5ea   :  { %3517 = vst.msk [vmem:[#allocation3 + $0x2f] sm:$0xff] %vm3511_vm14, %v3339_v48  ;;  %7434 = vmatprep.mubr.msk.f32.mxu1 %vm3885_vm0, %v11550_v24  ;;  %3396 = vrot.lane.b32.xlu1 %v11263_v50, %s8369_s18  ;;  %v3876_v48 = vld [vmem:[%s13269_s6] sm:$0xff] }
 0x5eb   :  { %3641 = vrot.lane.b32.xlu0 %v11260_v56, %s8371_s29 }
 0x5ec   :  { %v3341_v1 = vpop.permute.xlu1 %3340 }
 0x5ed   :  { %v3586_v59 = vpop.permute.xlu0 %3585  ;;  %v11560_v63 = vld [vmem:[#allocation3 + $0x18] sm:$0xff]  ;;  %3518 = vst.msk [vmem:[#allocation3 + $0x37] sm:$0xff] %vm3511_vm14, %v3341_v1 }
 0x5ee   :  { %3764 = vst.msk [vmem:[#allocation3 + $0x2e] sm:$0xff] %vm3758_vm15, %v3586_v59  ;;  %7435 = vmatmul.mubr.msk.f32.vlgmr.msra.gmra.mrb[34].mxu1 %vm3885_vm0, %v11560_v63  ;;  %3643 = vrot.lane.b32.xlu1 %v11263_v50, %s8371_s29 }
 0x5ef   :  { %3398 = vrot.lane.b32.xlu0 %v11274_v26, %s8369_s18 }
 0x5f0   :  { %v3588_v32 = vpop.permute.xlu1 %3587  ;;  %v11570_v31 = vld [vmem:[#allocation3 + $0x20] sm:$0xff] }
 0x5f1   :  { %v3343_v60 = vpop.permute.xlu0 %3342  ;;  %3765 = vst.msk [vmem:[#allocation3 + $0x36] sm:$0xff] %vm3758_vm15, %v3588_v32  ;;  %7437 = vmatprep.mubr.msk.f32.mxu1 %vm3885_vm0, %v11570_v31 }
 0x5f2   :  { %3519 = vst.msk [vmem:[#allocation3 + $0x3f] sm:$0xff] %vm3511_vm14, %v3343_v60  ;;  %3400 = vrot.lane.b32.xlu1 %v11277_v61, %s8369_s18 }
 0x5f3   :  { %3645 = vrot.lane.b32.xlu0 %v11274_v26, %s8371_s29 }
 0x5f4   :  { %v3345_v2 = vpop.permute.xlu1 %3344 }
 0x5f5   :  { %v3590_v57 = vpop.permute.xlu0 %3589  ;;  %v11580_v34 = vld [vmem:[#allocation3 + $0x28] sm:$0xff]  ;;  %3520 = vst.msk [vmem:[#allocation3 + $0x47] sm:$0xff] %vm3511_vm14, %v3345_v2 }
 0x5f6   :  { %3766 = vst.msk [vmem:[#allocation3 + $0x3e] sm:$0xff] %vm3758_vm15, %v3590_v57  ;;  %7438 = vmatmul.mubr.msk.f32.gmra.mrb[36].mxu1 %vm3885_vm0, %v11580_v34  ;;  %3647 = vrot.lane.b32.xlu1 %v11277_v61, %s8371_s29 }
 0x5f7   :  { %3402 = vrot.lane.b32.xlu0 %v11280_v29, %s8369_s18 }
 0x5f8   :  { %v3592_v20 = vpop.permute.xlu1 %3591  ;;  %v11590_v62 = vld [vmem:[#allocation3 + $0x30] sm:$0xff] }
 0x5f9   :  { %v3347_v58 = vpop.permute.xlu0 %3346  ;;  %3767 = vst.msk [vmem:[#allocation3 + $0x46] sm:$0xff] %vm3758_vm15, %v3592_v20  ;;  %7440 = vmatprep.mubr.msk.f32.mxu1 %vm3885_vm0, %v11590_v62 }
 0x5fa   :  { %3521 = vst.msk [vmem:[#allocation3 + $0x4f] sm:$0xff] %vm3511_vm14, %v3347_v58  ;;  %3404 = vrot.lane.b32.xlu1 %v11283_v15, %s8369_s18 }
 0x5fb   :  { %3649 = vrot.lane.b32.xlu0 %v11280_v29, %s8371_s29 }
 0x5fc   :  { %v3349_v19 = vpop.permute.xlu1 %3348 }
 0x5fd   :  { %v3594_v22 = vpop.permute.xlu0 %3593  ;;  %v11600_v42 = vld [vmem:[#allocation3 + $0x38] sm:$0xff]  ;;  %3522 = vst.msk [vmem:[#allocation3 + $0x57] sm:$0xff] %vm3511_vm14, %v3349_v19 }
 0x5fe   :  { %3768 = vst.msk [vmem:[#allocation3 + $0x4e] sm:$0xff] %vm3758_vm15, %v3594_v22  ;;  %7441 = vmatmul.mubr.msk.f32.gmra.mrb[38].mxu1 %vm3885_vm0, %v11600_v42  ;;  %3651 = vrot.lane.b32.xlu1 %v11283_v15, %s8371_s29 }
 0x5ff   :  { %3406 = vrot.lane.b32.xlu0 %v11300_v54, %s8369_s18 }
 0x600   :  { %v3596_v28 = vpop.permute.xlu1 %3595  ;;  %v11610_v9 = vld [vmem:[#allocation3 + $0x40] sm:$0xff] }
 0x601   :  { %v3351_v49 = vpop.permute.xlu0 %3350  ;;  %3769 = vst.msk [vmem:[#allocation3 + $0x56] sm:$0xff] %vm3758_vm15, %v3596_v28  ;;  %7443 = vmatprep.mubr.msk.f32.mxu1 %vm3885_vm0, %v11610_v9 }
 0x602   :  { %3523 = vst.msk [vmem:[#allocation3 + $0x5f] sm:$0xff] %vm3511_vm14, %v3351_v49  ;;  %3408 = vrot.lane.b32.xlu1 %v11303_v44, %s8369_s18 }
 0x603   :  { %3653 = vrot.lane.b32.xlu0 %v11300_v54, %s8371_s29 }
 0x604   :  { %v3353_v21 = vpop.permute.xlu1 %3352 }
 0x605   :  { %v3598_v7 = vpop.permute.xlu0 %3597  ;;  %v11620_v56 = vld [vmem:[#allocation3 + $0x48] sm:$0xff]  ;;  %3524 = vst.msk [vmem:[#allocation3 + $0x67] sm:$0xff] %vm3511_vm14, %v3353_v21 }
 0x606   :  { %3770 = vst.msk [vmem:[#allocation3 + $0x5e] sm:$0xff] %vm3758_vm15, %v3598_v7  ;;  %7444 = vmatmul.mubr.msk.f32.gmra.mrb[40].mxu1 %vm3885_vm0, %v11620_v56  ;;  %3655 = vrot.lane.b32.xlu1 %v11303_v44, %s8371_s29 }
 0x607   :  { %3410 = vrot.lane.b32.xlu0 %v11306_v30, %s8369_s18 }
 0x608   :  { %v3600_v50 = vpop.permute.xlu1 %3599  ;;  %v11630_v61 = vld [vmem:[#allocation3 + $0x50] sm:$0xff] }
 0x609   :  { %v3355_v26 = vpop.permute.xlu0 %3354  ;;  %3771 = vst.msk [vmem:[#allocation3 + $0x66] sm:$0xff] %vm3758_vm15, %v3600_v50  ;;  %7446 = vmatprep.mubr.msk.f32.mxu1 %vm3885_vm0, %v11630_v61 }
 0x60a   :  { %3525 = vst.msk [vmem:[#allocation3 + $0x6f] sm:$0xff] %vm3511_vm14, %v3355_v26  ;;  %3412 = vrot.lane.b32.xlu1 %v11309_v40, %s8369_s18 }
 0x60b   :  { %3657 = vrot.lane.b32.xlu0 %v11306_v30, %s8371_s29 }
 0x60c   :  { %v3357_v29 = vpop.permute.xlu1 %3356 }
 0x60d   :  { %v3602_v15 = vpop.permute.xlu0 %3601  ;;  %v11640_v54 = vld [vmem:[#allocation3 + $0x58] sm:$0xff]  ;;  %3526 = vst.msk [vmem:[#allocation3 + $0x77] sm:$0xff] %vm3511_vm14, %v3357_v29 }
 0x60e   :  { %3772 = vst.msk [vmem:[#allocation3 + $0x6e] sm:$0xff] %vm3758_vm15, %v3602_v15  ;;  %7447 = vmatmul.mubr.msk.f32.gmra.mrb[42].mxu1 %vm3885_vm0, %v11640_v54  ;;  %3659 = vrot.lane.b32.xlu1 %v11309_v40, %s8371_s29 }
 0x60f   :  { %3414 = vrot.lane.b32.xlu0 %v11324_v52, %s8369_s18 }
 0x610   :  { %v3604_v44 = vpop.permute.xlu1 %3603  ;;  %v11650_v30 = vld [vmem:[#allocation3 + $0x60] sm:$0xff] }
 0x611   :  { %v3359_v6 = vpop.permute.xlu0 %3358  ;;  %3773 = vst.msk [vmem:[#allocation3 + $0x76] sm:$0xff] %vm3758_vm15, %v3604_v44  ;;  %7449 = vmatprep.mubr.msk.f32.mxu1 %vm3885_vm0, %v11650_v30  ;;  %v3878_v44 = vld [vmem:[%s13269_s6 + $0x10] sm:$0xff] }
 0x612   :  { %3527 = vst.msk [vmem:[#allocation3 + $0x7f] sm:$0xff] %vm3511_vm14, %v3359_v6  ;;  %3416 = vrot.lane.b32.xlu1 %v11327_v17, %s8369_s18 }
 0x613   :  { %3661 = vrot.lane.b32.xlu0 %v11324_v52, %s8371_s29 }
 0x614   :  { %v3361_v40 = vpop.permute.xlu1 %3360 }
 0x615   :  { %v3606_v47 = vpop.permute.xlu0 %3605  ;;  %v11660_v36 = vld [vmem:[#allocation3 + $0x68] sm:$0xff]  ;;  %3528 = vst.msk [vmem:[#allocation3 + $0x87] sm:$0xff] %vm3511_vm14, %v3361_v40 }
 0x616   :  { %3774 = vst.msk [vmem:[#allocation3 + $0x7e] sm:$0xff] %vm3758_vm15, %v3606_v47  ;;  %7450 = vmatmul.mubr.msk.f32.gmra.mrb[44].mxu1 %vm3885_vm0, %v11660_v36  ;;  %3663 = vrot.lane.b32.xlu1 %v11327_v17, %s8371_s29 }
 0x617   :  { %3418 = vrot.lane.b32.xlu0 %v11330_v23, %s8369_s18 }
 0x618   :  { %v3608_v37 = vpop.permute.xlu1 %3607  ;;  %v11670_v52 = vld [vmem:[#allocation3 + $0x70] sm:$0xff] }
 0x619   :  { %v3363_v51 = vpop.permute.xlu0 %3362  ;;  %3775 = vst.msk [vmem:[#allocation3 + $0x86] sm:$0xff] %vm3758_vm15, %v3608_v37  ;;  %7452 = vmatprep.mubr.msk.f32.mxu1 %vm3885_vm0, %v11670_v52 }
 0x61a   :  { %3529 = vst.msk [vmem:[#allocation3 + $0x8f] sm:$0xff] %vm3511_vm14, %v3363_v51  ;;  %3420 = vrot.lane.b32.xlu1 %v11333_v8, %s8369_s18  ;;  %v3203_v51 = vmax.f32 %v11111_v25, 0.0 }
 0x61b   :  { %3665 = vrot.lane.b32.xlu0 %v11330_v23, %s8371_s29 }
 0x61c   :  { %v3365_v17 = vpop.permute.xlu1 %3364 }
 0x61d   :  { %v3610_v55 = vpop.permute.xlu0 %3609  ;;  %v11680_v38 = vld [vmem:[#allocation3 + $0x78] sm:$0xff]  ;;  %3530 = vst.msk [vmem:[#allocation3 + $0x97] sm:$0xff] %vm3511_vm14, %v3365_v17 }
 0x61e   :  { %3776 = vst.msk [vmem:[#allocation3 + $0x8e] sm:$0xff] %vm3758_vm15, %v3610_v55  ;;  %7453 = vmatmul.mubr.msk.f32.gmra.mrb[46].mxu1 %vm3885_vm0, %v11680_v38  ;;  %3667 = vrot.lane.b32.xlu1 %v11333_v8, %s8371_s29 }
 0x61f   :  { %3422 = vrot.lane.b32.xlu0 %v11360_v14, %s8369_s18 }
 0x620   :  { %v3612_v3 = vpop.permute.xlu1 %3611  ;;  %v11690_v23 = vld [vmem:[#allocation3 + $0x80] sm:$0xff] }
 0x621   :  { %v3367_v33 = vpop.permute.xlu0 %3366  ;;  %3777 = vst.msk [vmem:[#allocation3 + $0x96] sm:$0xff] %vm3758_vm15, %v3612_v3  ;;  %7455 = vmatprep.mubr.msk.f32.mxu1 %vm3885_vm0, %v11690_v23 }
 0x622   :  { %3531 = vst.msk [vmem:[#allocation3 + $0x9f] sm:$0xff] %vm3511_vm14, %v3367_v33  ;;  %3424 = vrot.lane.b32.xlu1 %v11363_v12, %s8369_s18 }
 0x623   :  { %3669 = vrot.lane.b32.xlu0 %v11360_v14, %s8371_s29 }
 0x624   :  { %v3369_v8 = vpop.permute.xlu1 %3368 }
 0x625   :  { %v3614_v46 = vpop.permute.xlu0 %3613  ;;  %v11700_v41 = vld [vmem:[#allocation3 + $0x88] sm:$0xff]  ;;  %3532 = vst.msk [vmem:[#allocation3 + $0xa7] sm:$0xff] %vm3511_vm14, %v3369_v8 }
 0x626   :  { %3778 = vst.msk [vmem:[#allocation3 + $0x9e] sm:$0xff] %vm3758_vm15, %v3614_v46  ;;  %7456 = vmatmul.mubr.msk.f32.gmra.mrb[48].mxu1 %vm3885_vm0, %v11700_v41  ;;  %3671 = vrot.lane.b32.xlu1 %v11363_v12, %s8371_s29  ;;  %v3877_v12 = vld [vmem:[%s13269_s6 + $0x8] sm:$0xff] }
 0x627   :  { %3426 = vrot.lane.b32.xlu0 %v11366_v18, %s8369_s18  ;;  %v7862_v1 = vpack.c.bf16 %v3877_v12, %v3876_v48 }
 0x628   :  { %v3616_v27 = vpop.permute.xlu1 %3615  ;;  %v11710_v14 = vld [vmem:[#allocation3 + $0x90] sm:$0xff] }
 0x629   :  { %v3371_v0 = vpop.permute.xlu0 %3370  ;;  %3779 = vst.msk [vmem:[#allocation3 + $0xa6] sm:$0xff] %vm3758_vm15, %v3616_v27  ;;  %7458 = vmatprep.mubr.msk.f32.mxu1 %vm3885_vm0, %v11710_v14  ;;  %7863 = vmatprep.subr.bf16.mxu1 %v7862_v1 }
 0x62a   :  { %3533 = vst.msk [vmem:[#allocation3 + $0xaf] sm:$0xff] %vm3511_vm14, %v3371_v0  ;;  %3428 = vrot.lane.b32.xlu1 %v11369_v10, %s8369_s18  ;;  %7865 = vmatpush3.bf16.msra.mxu1 %v7862_v1 }
 0x62b   :  { %3673 = vrot.lane.b32.xlu0 %v11366_v18, %s8371_s29  ;;  %7522 = vmatprep.subr.mxu1 %v3878_v44 }
 0x62c   :  { %v3373_v59 = vpop.permute.xlu1 %3372 }
 0x62d   :  { %v3618_v32 = vpop.permute.xlu0 %3617  ;;  %v11726_v60 = vld [vmem:[#allocation3 + $0x98] sm:$0xff]  ;;  %3534 = vst.msk [vmem:[#allocation3 + $0xb7] sm:$0xff] %vm3511_vm14, %v3373_v59 }
 0x62e   :  { %3780 = vst.msk [vmem:[#allocation3 + $0xae] sm:$0xff] %vm3758_vm15, %v3618_v32  ;;  %7459 = vmatmul.mubr.msk.f32.gmra.mrb[50].mxu1 %vm3885_vm0, %v11726_v60  ;;  %3675 = vrot.lane.b32.xlu1 %v11369_v10, %s8371_s29 }
 0x62f   :  { %3430 = vrot.lane.b32.xlu0 %v11379_v35, %s8369_s18  ;;  %7523 = vmatpush3.msra.mxu1 %v3878_v44 }
 0x630   :  { %v3620_v18 = vpop.permute.xlu1 %3619  ;;  %v11736_v57 = vld [vmem:[#allocation3 + $0xa0] sm:$0xff] }
 0x631   :  { %v3375_v2 = vpop.permute.xlu0 %3374  ;;  %3781 = vst.msk [vmem:[#allocation3 + $0xb6] sm:$0xff] %vm3758_vm15, %v3620_v18  ;;  %7461 = vmatprep.mubr.msk.f32.mxu1 %vm3885_vm0, %v11736_v57 }
 0x632   :  { %3535 = vst.msk [vmem:[#allocation3 + $0xbf] sm:$0xff] %vm3511_vm14, %v3375_v2  ;;  %3432 = vrot.lane.b32.xlu1 %v11382_v4, %s8369_s18 }
 0x633   :  { %3677 = vrot.lane.b32.xlu0 %v11379_v35, %s8371_s29 }
 0x634   :  { %v3377_v10 = vpop.permute.xlu1 %3376 }
 0x635   :  { %v3622_v20 = vpop.permute.xlu0 %3621  ;;  %v11746_v58 = vld [vmem:[#allocation3 + $0xa8] sm:$0xff]  ;;  %3536 = vst.msk [vmem:[#allocation3 + $0xc7] sm:$0xff] %vm3511_vm14, %v3377_v10 }
 0x636   :  { %3782 = vst.msk [vmem:[#allocation3 + $0xbe] sm:$0xff] %vm3758_vm15, %v3622_v20  ;;  %7462 = vmatmul.mubr.msk.f32.gmra.mrb[52].mxu1 %vm3885_vm0, %v11746_v58  ;;  %3679 = vrot.lane.b32.xlu1 %v11382_v4, %s8371_s29 }
 0x637   :  { %3434 = vrot.lane.b32.xlu0 %v11385_v45, %s8369_s18 }
 0x638   :  { %v3624_v19 = vpop.permute.xlu1 %3623  ;;  %v11756_v35 = vld [vmem:[#allocation3 + $0xb0] sm:$0xff] }
 0x639   :  { %v3379_v22 = vpop.permute.xlu0 %3378  ;;  %3783 = vst.msk [vmem:[#allocation3 + $0xc6] sm:$0xff] %vm3758_vm15, %v3624_v19  ;;  %7464 = vmatprep.mubr.msk.f32.mxu1 %vm3885_vm0, %v11756_v35 }
 0x63a   :  { %3537 = vst.msk [vmem:[#allocation3 + $0xcf] sm:$0xff] %vm3511_vm14, %v3379_v22  ;;  %3436 = vrot.lane.b32.xlu1 %v11388_v39, %s8369_s18 }
 0x63b   :  { %3681 = vrot.lane.b32.xlu0 %v11385_v45, %s8371_s29 }
 0x63c   :  { %v3381_v4 = vpop.permute.xlu1 %3380 }
 0x63d   :  { %v3626_v28 = vpop.permute.xlu0 %3625  ;;  %v11766_v49 = vld [vmem:[#allocation3 + $0xb8] sm:$0xff]  ;;  %3538 = vst.msk [vmem:[#allocation3 + $0xd7] sm:$0xff] %vm3511_vm14, %v3381_v4 }
 0x63e   :  { %3784 = vst.msk [vmem:[#allocation3 + $0xce] sm:$0xff] %vm3758_vm15, %v3626_v28  ;;  %7465 = vmatmul.mubr.msk.f32.gmra.mrb[54].mxu1 %vm3885_vm0, %v11766_v49  ;;  %3683 = vrot.lane.b32.xlu1 %v11388_v39, %s8371_s29 }
 0x63f   :  { %3438 = vrot.lane.b32.xlu0 %v11399_v5, %s8369_s18 }
 0x640   :  { %v3628_v21 = vpop.permute.xlu1 %3627  ;;  %v11776_v45 = vld [vmem:[#allocation3 + $0xc0] sm:$0xff] }
 0x641   :  { %v3383_v7 = vpop.permute.xlu0 %3382  ;;  %3785 = vst.msk [vmem:[#allocation3 + $0xd6] sm:$0xff] %vm3758_vm15, %v3628_v21  ;;  %7467 = vmatprep.mubr.msk.f32.mxu1 %vm3885_vm0, %v11776_v45 }
 0x642   :  { %3539 = vst.msk [vmem:[#allocation3 + $0xdf] sm:$0xff] %vm3511_vm14, %v3383_v7  ;;  %3440 = vrot.lane.b32.xlu1 %v11402_v16, %s8369_s18 }
 0x643   :  { %3685 = vrot.lane.b32.xlu0 %v11399_v5, %s8371_s29 }
 0x644   :  { %v3385_v39 = vpop.permute.xlu1 %3384 }
 0x645   :  { %v3630_v50 = vpop.permute.xlu0 %3629  ;;  %v11786_v26 = vld [vmem:[#allocation3 + $0xc8] sm:$0xff]  ;;  %3540 = vst.msk [vmem:[#allocation3 + $0xe7] sm:$0xff] %vm3511_vm14, %v3385_v39 }
 0x646   :  { %3786 = vst.msk [vmem:[#allocation3 + $0xde] sm:$0xff] %vm3758_vm15, %v3630_v50  ;;  %7468 = vmatmul.mubr.msk.f32.gmra.mrb[56].mxu1 %vm3885_vm0, %v11786_v26  ;;  %3687 = vrot.lane.b32.xlu1 %v11402_v16, %s8371_s29 }
 0x647   :  { %3442 = vrot.lane.b32.xlu0 %v11405_v13, %s8369_s18 }
 0x648   :  { %v3632_v29 = vpop.permute.xlu1 %3631  ;;  %v11796_v5 = vld [vmem:[#allocation3 + $0xd0] sm:$0xff] }
 0x649   :  { %v3387_v15 = vpop.permute.xlu0 %3386  ;;  %3787 = vst.msk [vmem:[#allocation3 + $0xe6] sm:$0xff] %vm3758_vm15, %v3632_v29  ;;  %7470 = vmatprep.mubr.msk.f32.mxu1 %vm3885_vm0, %v11796_v5 }
 0x64a   :  { %3541 = vst.msk [vmem:[#allocation3 + $0xef] sm:$0xff] %vm3511_vm14, %v3387_v15  ;;  %3326 = vrot.lane.b32.xlu1 %v11115_v53, %s8369_s18 }
 0x64b   :  { %3689 = vrot.lane.b32.xlu0 %v11405_v13, %s8371_s29 }
 0x64c   :  { %v3389_v16 = vpop.permute.xlu1 %3388 }
 0x64d   :  { %v3634_v6 = vpop.permute.xlu0 %3633  ;;  %v11809_v40 = vld [vmem:[#allocation3 + $0xd8] sm:$0xff]  ;;  %3542 = vst.msk [vmem:[#allocation3 + $0xf7] sm:$0xff] %vm3511_vm14, %v3389_v16 }
 0x64e   :  { %3788 = vst.msk [vmem:[#allocation3 + $0xee] sm:$0xff] %vm3758_vm15, %v3634_v6  ;;  %7471 = vmatmul.mubr.msk.f32.gmra.mrb[58].mxu1 %vm3885_vm0, %v11809_v40  ;;  %3575 = vrot.lane.b32.xlu1 %v11117_v11, %s8371_s29 }
 0x64f   :  { %3573 = vrot.lane.b32.xlu0 %v11115_v53, %s8371_s29 }
 0x650   :  { %v3636_v13 = vpop.permute.xlu1 %3635  ;;  %v11819_v37 = vld [vmem:[#allocation3 + $0xe0] sm:$0xff] }
 0x651   :  { %v3391_v47 = vpop.permute.xlu0 %3390  ;;  %3789 = vst.msk [vmem:[#allocation3 + $0xf6] sm:$0xff] %vm3758_vm15, %v3636_v13  ;;  %7473 = vmatprep.mubr.msk.f32.mxu1 %vm3885_vm0, %v11819_v37 }
 0x652   :  { %3543 = vst.msk [vmem:[#allocation3 + $0xff] sm:$0xff] %vm3511_vm14, %v3391_v47  ;;  %3446 = vrot.lane.b32.xlu1 %v3203_v51, %s8369_s18 }
 0x653   :  { %3444 = vrot.lane.b32.xlu0 %v11408_v43, %s8369_s18 }
 0x654   :  { %v3393_v53 = vpop.permute.xlu1 %3392 }
 0x655   :  { %v3638_v11 = vpop.permute.xlu0 %3637  ;;  %v11829_v17 = vld [vmem:[#allocation3 + $0xe8] sm:$0xff]  ;;  %3544 = vst.msk [vmem:[#allocation3 + $0x107] sm:$0xff] %vm3511_vm14, %v3393_v53 }
 0x656   :  { %3790 = vst.msk [vmem:[#allocation3 + $0xfe] sm:$0xff] %vm3758_vm15, %v3638_v11  ;;  %7474 = vmatmul.mubr.msk.f32.gmra.mrb[60].mxu1 %vm3885_vm0, %v11829_v17  ;;  %3693 = vrot.lane.b32.xlu1 %v3203_v51, %s8371_s29 }
 0x657   :  { %3691 = vrot.lane.b32.xlu0 %v11408_v43, %s8371_s29 }
 0x658   :  { %v3640_v25 = vpop.permute.xlu1 %3639  ;;  %v11838_v3 = vld [vmem:[#allocation3 + $0xf0] sm:$0xff] }
 0x659   :  { %v3395_v55 = vpop.permute.xlu0 %3394  ;;  %3791 = vst.msk [vmem:[#allocation3 + $0x106] sm:$0xff] %vm3758_vm15, %v3640_v25  ;;  %7476 = vmatprep.mubr.msk.f32.mxu1 %vm3885_vm0, %v11838_v3 }
 0x65a   :  { %3545 = vst.msk [vmem:[#allocation3 + $0x10f] sm:$0xff] %vm3511_vm14, %v3395_v55 }
 0x65c   :  { %v3397_v33 = vpop.permute.xlu1 %3396 }
 0x65d   :  { %v3642_v8 = vpop.permute.xlu0 %3641  ;;  %v11844_v46 = vld [vmem:[#allocation3 + $0xf8] sm:$0xff]  ;;  %3546 = vst.msk [vmem:[#allocation3 + $0x117] sm:$0xff] %vm3511_vm14, %v3397_v33 }
 0x65e   :  { %3792 = vst.msk [vmem:[#allocation3 + $0x10e] sm:$0xff] %vm3758_vm15, %v3642_v8  ;;  %7477 = vmatmul.mubr.msk.f32.gmra.mrb[62].mxu1 %vm3885_vm0, %v11844_v46 }
 0x660   :  { %v3644_v43 = vpop.permute.xlu1 %3643  ;;  %v11850_v0 = vld [vmem:[#allocation3 + $0x100] sm:$0xff] }
 0x661   :  { %v3399_v27 = vpop.permute.xlu0 %3398  ;;  %3793 = vst.msk [vmem:[#allocation3 + $0x116] sm:$0xff] %vm3758_vm15, %v3644_v43  ;;  %7479 = vmatprep.mubr.msk.f32.mxu1 %vm3885_vm0, %v11850_v0 }
 0x662   :  { %3547 = vst.msk [vmem:[#allocation3 + $0x11f] sm:$0xff] %vm3511_vm14, %v3399_v27 }
 0x664   :  { %v3401_v48 = vpop.permute.xlu1 %3400 }
 0x665   :  { %v3646_v12 = vpop.permute.xlu0 %3645  ;;  %v11856_v1 = vld [vmem:[#allocation3 + $0x108] sm:$0xff]  ;;  %3548 = vst.msk [vmem:[#allocation3 + $0x127] sm:$0xff] %vm3511_vm14, %v3401_v48 }
 0x666   :  { %3794 = vst.msk [vmem:[#allocation3 + $0x11e] sm:$0xff] %vm3758_vm15, %v3646_v12  ;;  %7480 = vmatmul.mubr.msk.f32.gmra.mrb[64].mxu1 %vm3885_vm0, %v11856_v1 }
 0x668   :  { %v3648_v59 = vpop.permute.xlu1 %3647  ;;  %v11862_v18 = vld [vmem:[#allocation3 + $0x110] sm:$0xff] }
 0x669   :  { %v3403_v32 = vpop.permute.xlu0 %3402  ;;  %3795 = vst.msk [vmem:[#allocation3 + $0x126] sm:$0xff] %vm3758_vm15, %v3648_v59  ;;  %7482 = vmatprep.mubr.msk.f32.mxu1 %vm3885_vm0, %v11862_v18 }
 0x66a   :  { %3549 = vst.msk [vmem:[#allocation3 + $0x12f] sm:$0xff] %vm3511_vm14, %v3403_v32 }
 0x66c   :  { %v3405_v2 = vpop.permute.xlu1 %3404 }
 0x66d   :  { %v3650_v10 = vpop.permute.xlu0 %3649  ;;  %v11868_v20 = vld [vmem:[#allocation3 + $0x118] sm:$0xff]  ;;  %3550 = vst.msk [vmem:[#allocation3 + $0x137] sm:$0xff] %vm3511_vm14, %v3405_v2 }
 0x66e   :  { %3796 = vst.msk [vmem:[#allocation3 + $0x12e] sm:$0xff] %vm3758_vm15, %v3650_v10  ;;  %7483 = vmatmul.mubr.msk.f32.gmra.mrb[66].mxu1 %vm3885_vm0, %v11868_v20 }
 0x670   :  { %v3652_v19 = vpop.permute.xlu1 %3651  ;;  %v11874_v4 = vld [vmem:[#allocation3 + $0x120] sm:$0xff] }
 0x671   :  { %v3407_v22 = vpop.permute.xlu0 %3406  ;;  %3797 = vst.msk [vmem:[#allocation3 + $0x136] sm:$0xff] %vm3758_vm15, %v3652_v19  ;;  %7485 = vmatprep.mubr.msk.f32.mxu1 %vm3885_vm0, %v11874_v4  ;;  %v6300_v19 = vld [vmem:[%s13269_s6 + $0x30] sm:$0xff] }
 0x672   :  { %3551 = vst.msk [vmem:[#allocation3 + $0x13f] sm:$0xff] %vm3511_vm14, %v3407_v22  ;;  %v6301_v22 = vld [vmem:[%s13269_s6 + $0x38] sm:$0xff] }
 0x674   :  { %v3409_v28 = vpop.permute.xlu1 %3408 }
 0x675   :  { %v3654_v21 = vpop.permute.xlu0 %3653  ;;  %v11880_v7 = vld [vmem:[#allocation3 + $0x128] sm:$0xff]  ;;  %3552 = vst.msk [vmem:[#allocation3 + $0x147] sm:$0xff] %vm3511_vm14, %v3409_v28 }
 0x676   :  { %3798 = vst.msk [vmem:[#allocation3 + $0x13e] sm:$0xff] %vm3758_vm15, %v3654_v21  ;;  %7486 = vmatmul.mubr.msk.f32.gmra.mrb[68].mxu1 %vm3885_vm0, %v11880_v7 }
 0x678   :  { %v3656_v39 = vpop.permute.xlu1 %3655  ;;  %v11886_v29 = vld [vmem:[#allocation3 + $0x130] sm:$0xff] }
 0x679   :  { %v3411_v50 = vpop.permute.xlu0 %3410  ;;  %3799 = vst.msk [vmem:[#allocation3 + $0x146] sm:$0xff] %vm3758_vm15, %v3656_v39  ;;  %7488 = vmatprep.mubr.msk.f32.mxu1 %vm3885_vm0, %v11886_v29 }
 0x67a   :  { %3553 = vst.msk [vmem:[#allocation3 + $0x14f] sm:$0xff] %vm3511_vm14, %v3411_v50  ;;  %v11942_v50 = vpack.c.bf16 %v6301_v22, %v6300_v19 }
 0x67c   :  { %v3413_v15 = vpop.permute.xlu1 %3412  ;;  %7867 = vmatprep.subr.bf16.mxu1 %v11942_v50 }
 0x67d   :  { %v3658_v44 = vpop.permute.xlu0 %3657  ;;  %v11892_v16 = vld [vmem:[#allocation3 + $0x138] sm:$0xff]  ;;  %3554 = vst.msk [vmem:[#allocation3 + $0x157] sm:$0xff] %vm3511_vm14, %v3413_v15 }
 0x67e   :  { %3800 = vst.msk [vmem:[#allocation3 + $0x14e] sm:$0xff] %vm3758_vm15, %v3658_v44  ;;  %7489 = vmatmul.mubr.msk.f32.gmra.mrb[70].mxu1 %vm3885_vm0, %v11892_v16 }
 0x680   :  { %v3660_v6 = vpop.permute.xlu1 %3659  ;;  %v11898_v47 = vld [vmem:[#allocation3 + $0x140] sm:$0xff] }
 0x681   :  { %v3415_v13 = vpop.permute.xlu0 %3414  ;;  %3801 = vst.msk [vmem:[#allocation3 + $0x156] sm:$0xff] %vm3758_vm15, %v3660_v6  ;;  %7491 = vmatprep.mubr.msk.f32.mxu1 %vm3885_vm0, %v11898_v47 }
 0x682   :  { %3555 = vst.msk [vmem:[#allocation3 + $0x15f] sm:$0xff] %vm3511_vm14, %v3415_v13 }
 0x684   :  { %v3417_v51 = vpop.permute.xlu1 %3416 }
 0x685   :  { %v3662_v53 = vpop.permute.xlu0 %3661  ;;  %v11904_v11 = vld [vmem:[#allocation3 + $0x148] sm:$0xff]  ;;  %3556 = vst.msk [vmem:[#allocation3 + $0x167] sm:$0xff] %vm3511_vm14, %v3417_v51 }
 0x686   :  { %3802 = vst.msk [vmem:[#allocation3 + $0x15e] sm:$0xff] %vm3758_vm15, %v3662_v53  ;;  %7492 = vmatmul.mubr.msk.f32.gmra.mrb[72].mxu1 %vm3885_vm0, %v11904_v11 }
 0x688   :  { %v3664_v25 = vpop.permute.xlu1 %3663  ;;  %v11910_v33 = vld [vmem:[#allocation3 + $0x150] sm:$0xff] }
 0x689   :  { %v3419_v55 = vpop.permute.xlu0 %3418  ;;  %3803 = vst.msk [vmem:[#allocation3 + $0x166] sm:$0xff] %vm3758_vm15, %v3664_v25  ;;  %7494 = vmatprep.mubr.msk.f32.mxu1 %vm3885_vm0, %v11910_v33 }
 0x68a   :  { %3557 = vst.msk [vmem:[#allocation3 + $0x16f] sm:$0xff] %vm3511_vm14, %v3419_v55 }
 0x68c   :  { %v3421_v8 = vpop.permute.xlu1 %3420 }
 0x68d   :  { %v3666_v43 = vpop.permute.xlu0 %3665  ;;  %v11916_v27 = vld [vmem:[#allocation3 + $0x158] sm:$0xff]  ;;  %3558 = vst.msk [vmem:[#allocation3 + $0x177] sm:$0xff] %vm3511_vm14, %v3421_v8 }
 0x68e   :  { %3804 = vst.msk [vmem:[#allocation3 + $0x16e] sm:$0xff] %vm3758_vm15, %v3666_v43  ;;  %7495 = vmatmul.mubr.msk.f32.gmra.mrb[74].mxu1 %vm3885_vm0, %v11916_v27 }
 0x690   :  { %v3668_v48 = vpop.permute.xlu1 %3667  ;;  %v11922_v59 = vld [vmem:[#allocation3 + $0x160] sm:$0xff] }
 0x691   :  { %v3423_v12 = vpop.permute.xlu0 %3422  ;;  %3805 = vst.msk [vmem:[#allocation3 + $0x176] sm:$0xff] %vm3758_vm15, %v3668_v48  ;;  %7497 = vmatprep.mubr.msk.f32.mxu1 %vm3885_vm0, %v11922_v59 }
 0x692   :  { %3559 = vst.msk [vmem:[#allocation3 + $0x17f] sm:$0xff] %vm3511_vm14, %v3423_v12 }
 0x694   :  { %v3425_v32 = vpop.permute.xlu1 %3424 }
 0x695   :  { %v3670_v2 = vpop.permute.xlu0 %3669  ;;  %v11928_v10 = vld [vmem:[#allocation3 + $0x168] sm:$0xff]  ;;  %3560 = vst.msk [vmem:[#allocation3 + $0x187] sm:$0xff] %vm3511_vm14, %v3425_v32 }
 0x696   :  { %3806 = vst.msk [vmem:[#allocation3 + $0x17e] sm:$0xff] %vm3758_vm15, %v3670_v2  ;;  %7498 = vmatmul.mubr.msk.f32.gmra.mrb[76].mxu1 %vm3885_vm0, %v11928_v10 }
 0x698   :  { %v3672_v28 = vpop.permute.xlu1 %3671  ;;  %v11940_v39 = vld [vmem:[#allocation3 + $0x170] sm:$0xff] }
 0x699   :  { %v3427_v21 = vpop.permute.xlu0 %3426  ;;  %3807 = vst.msk [vmem:[#allocation3 + $0x186] sm:$0xff] %vm3758_vm15, %v3672_v28  ;;  %7500 = vmatprep.mubr.msk.f32.mxu1 %vm3885_vm0, %v11940_v39 }
 0x69a   :  { %3561 = vst.msk [vmem:[#allocation3 + $0x18f] sm:$0xff] %vm3511_vm14, %v3427_v21 }
 0x69c   :  { %v3429_v15 = vpop.permute.xlu1 %3428 }
 0x69d   :  { %v3674_v44 = vpop.permute.xlu0 %3673  ;;  %v11949_v6 = vld [vmem:[#allocation3 + $0x178] sm:$0xff]  ;;  %3562 = vst.msk [vmem:[#allocation3 + $0x197] sm:$0xff] %vm3511_vm14, %v3429_v15 }
 0x69e   :  { %3808 = vst.msk [vmem:[#allocation3 + $0x18e] sm:$0xff] %vm3758_vm15, %v3674_v44  ;;  %7501 = vmatmul.mubr.msk.f32.gmra.mrb[78].mxu1 %vm3885_vm0, %v11949_v6 }
 0x6a0   :  { %v3676_v13 = vpop.permute.xlu1 %3675  ;;  %v11955_v53 = vld [vmem:[#allocation3 + $0x180] sm:$0xff] }
 0x6a1   :  { %v3431_v51 = vpop.permute.xlu0 %3430  ;;  %3809 = vst.msk [vmem:[#allocation3 + $0x196] sm:$0xff] %vm3758_vm15, %v3676_v13  ;;  %7503 = vmatprep.mubr.msk.f32.mxu1 %vm3885_vm0, %v11955_v53 }
 0x6a2   :  { %3563 = vst.msk [vmem:[#allocation3 + $0x19f] sm:$0xff] %vm3511_vm14, %v3431_v51 }
 0x6a4   :  { %v3433_v25 = vpop.permute.xlu1 %3432 }
 0x6a5   :  { %v3678_v55 = vpop.permute.xlu0 %3677  ;;  %v11961_v8 = vld [vmem:[#allocation3 + $0x188] sm:$0xff]  ;;  %3564 = vst.msk [vmem:[#allocation3 + $0x1a7] sm:$0xff] %vm3511_vm14, %v3433_v25 }
 0x6a6   :  { %3810 = vst.msk [vmem:[#allocation3 + $0x19e] sm:$0xff] %vm3758_vm15, %v3678_v55  ;;  %7504 = vmatmul.mubr.msk.f32.gmra.mrb[80].mxu1 %vm3885_vm0, %v11961_v8 }
 0x6a8   :  { %v3680_v43 = vpop.permute.xlu1 %3679  ;;  %v11967_v12 = vld [vmem:[#allocation3 + $0x190] sm:$0xff] }
 0x6a9   :  { %v3435_v48 = vpop.permute.xlu0 %3434  ;;  %3811 = vst.msk [vmem:[#allocation3 + $0x1a6] sm:$0xff] %vm3758_vm15, %v3680_v43  ;;  %7506 = vmatprep.mubr.msk.f32.mxu1 %vm3885_vm0, %v11967_v12 }
 0x6aa   :  { %3565 = vst.msk [vmem:[#allocation3 + $0x1af] sm:$0xff] %vm3511_vm14, %v3435_v48 }
 0x6ac   :  { %v3437_v32 = vpop.permute.xlu1 %3436 }
 0x6ad   :  { %v3682_v2 = vpop.permute.xlu0 %3681  ;;  %v11973_v19 = vld [vmem:[#allocation3 + $0x198] sm:$0xff]  ;;  %3566 = vst.msk [vmem:[#allocation3 + $0x1b7] sm:$0xff] %vm3511_vm14, %v3437_v32 }
 0x6ae   :  { %3812 = vst.msk [vmem:[#allocation3 + $0x1ae] sm:$0xff] %vm3758_vm15, %v3682_v2  ;;  %7507 = vmatmul.mubr.msk.f32.gmra.mrb[82].mxu1 %vm3885_vm0, %v11973_v19 }
 0x6b0   :  { %v3684_v22 = vpop.permute.xlu1 %3683  ;;  %v11979_v21 = vld [vmem:[#allocation3 + $0x1a0] sm:$0xff] }
 0x6b1   :  { %v3439_v28 = vpop.permute.xlu0 %3438  ;;  %3813 = vst.msk [vmem:[#allocation3 + $0x1b6] sm:$0xff] %vm3758_vm15, %v3684_v22  ;;  %7509 = vmatprep.mubr.msk.f32.mxu1 %vm3885_vm0, %v11979_v21 }
 0x6b2   :  { %3567 = vst.msk [vmem:[#allocation3 + $0x1bf] sm:$0xff] %vm3511_vm14, %v3439_v28 }
 0x6b4   :  { %v3441_v15 = vpop.permute.xlu1 %3440 }
 0x6b5   :  { %v3686_v44 = vpop.permute.xlu0 %3685  ;;  %v11985_v13 = vld [vmem:[#allocation3 + $0x1a8] sm:$0xff]  ;;  %3568 = vst.msk [vmem:[#allocation3 + $0x1c7] sm:$0xff] %vm3511_vm14, %v3441_v15 }
 0x6b6   :  { %3814 = vst.msk [vmem:[#allocation3 + $0x1be] sm:$0xff] %vm3758_vm15, %v3686_v44  ;;  %7510 = vmatmul.mubr.msk.f32.gmra.mrb[84].mxu1 %vm3885_vm0, %v11985_v13 }
 0x6b8   :  { %v3688_v51 = vpop.permute.xlu1 %3687  ;;  %v11991_v55 = vld [vmem:[#allocation3 + $0x1b0] sm:$0xff] }
 0x6b9   :  { %v3443_v25 = vpop.permute.xlu0 %3442  ;;  %3815 = vst.msk [vmem:[#allocation3 + $0x1c6] sm:$0xff] %vm3758_vm15, %v3688_v51  ;;  %7512 = vmatprep.mubr.msk.f32.mxu1 %vm3885_vm0, %v11991_v55 }
 0x6ba   :  { %3569 = vst.msk [vmem:[#allocation3 + $0x1cf] sm:$0xff] %vm3511_vm14, %v3443_v25 }
 0x6bc   :  { %v3327_v48 = vpop.permute.xlu1 %3326 }
 0x6bd   :  { %v3690_v43 = vpop.permute.xlu0 %3689  ;;  %v11997_v32 = vld [vmem:[#allocation3 + $0x1b8] sm:$0xff]  ;;  %3510 = vst.msk [vmem:[#allocation3 - $0x1] sm:$0xfe] %vm3509_vm1, %v3327_v48 }
 0x6be   :  { %3816 = vst.msk [vmem:[#allocation3 + $0x1ce] sm:$0xff] %vm3758_vm15, %v3690_v43  ;;  %7513 = vmatmul.mubr.msk.f32.gmra.mrb[86].mxu1 %vm3885_vm0, %v11997_v32 }
 0x6c0   :  { %v3576_v22 = vpop.permute.xlu1 %3575  ;;  %v12002_v28 = vld [vmem:[#allocation3 + $0x1c0] sm:$0xff] }
 0x6c1   :  { %v3574_v2 = vpop.permute.xlu0 %3573  ;;  %3759 = vst.msk [vmem:[#allocation3 + $0x6] sm:$0xff] %vm3758_vm15, %v3576_v22  ;;  %7515 = vmatprep.mubr.msk.f32.mxu1 %vm3885_vm0, %v12002_v28  ;;  %v6302_v22 = vld [vmem:[%s13269_s6 + $0x40] sm:$0xff] }
 0x6c2   :  { %3757 = vst.msk [vmem:[#allocation3 - $0x2] sm:$0xfc] %vm3756_vm2, %v3574_v2 }
 0x6c4   :  { %v3447_v44 = vpop.permute.xlu1 %3446 }
 0x6c5   :  { %v3445_v15 = vpop.permute.xlu0 %3444  ;;  %v12007_v51 = vld [vmem:[#allocation3 + $0x1c8] sm:$0xff]  ;;  %3572 = vst.msk [vmem:[#allocation3 + $0x1df] sm:$0x1] %vm3571_vm3, %v3447_v44 }
 0x6c6   :  { %3570 = vst.msk [vmem:[#allocation3 + $0x1d7] sm:$0xff] %vm3511_vm14, %v3445_v15  ;;  %7516 = vmatmul.mubr.msk.f32.gmra.mrb[88].mxu1 %vm3885_vm0, %v12007_v51 }
 0x6c8   :  { %v3694_v43 = vpop.permute.xlu1 %3693  ;;  %v3821_v2 = vld [vmem:[#allocation3 + $0x8] sm:$0xff] }
 0x6c9   :  { %v3692_v25 = vpop.permute.xlu0 %3691  ;;  %v3820_v48 = vld [vmem:[#allocation3] sm:$0xff]  ;;  %3819 = vst.msk [vmem:[#allocation3 + $0x1de] sm:$0x3] %vm3818_vm4, %v3694_v43 }
 0x6ca   :  { %3817 = vst.msk [vmem:[#allocation3 + $0x1d6] sm:$0xff] %vm3758_vm15, %v3692_v25  ;;  %7524 = vmatprep.mubr.msk.f32.mxu1 %vm3885_vm0, %v3820_v48 }
 0x6cb   :  { %7525 = vmatmul.mubr.msk.f32.vlgmr.msra.gmra.mrb[34].mxu1 %vm3885_vm0, %v3821_v2 }
 0x6cc   :  { %7527 = vmatprep.mubr.msk.f32.mxu1 %vm3885_vm0, %v11550_v24  ;;  %7869 = vmatpush3.bf16.msra.mxu1 %v11942_v50 }
 0x6cd   :  { %7612 = vmatprep.subr.mxu1 %v6302_v22 }
 0x6cf   :  { %7528 = vmatmul.mubr.msk.f32.gmra.mrb[36].mxu1 %vm3885_vm0, %v11560_v63 }
 0x6d0   :  { %7530 = vmatprep.mubr.msk.f32.mxu1 %vm3885_vm0, %v11570_v31  ;;  %7613 = vmatpush3.msra.mxu1 %v6302_v22 }
 0x6d1   :  { %v4804_v24 = vld [vmem:[#allocation3 + $0x1d0] sm:$0xff]  ;;  %v4805_v63 = vld [vmem:[#allocation3 + $0x1d8] sm:$0xff] }
 0x6d3   :  { %7531 = vmatmul.mubr.msk.f32.gmra.mrb[38].mxu1 %vm3885_vm0, %v11580_v34 }
 0x6d4   :  { %7533 = vmatprep.mubr.msk.f32.mxu1 %vm3885_vm0, %v11590_v62 }
 0x6d7   :  { %7534 = vmatmul.mubr.msk.f32.gmra.mrb[40].mxu1 %vm3885_vm0, %v11600_v42 }
 0x6d8   :  { %7536 = vmatprep.mubr.msk.f32.mxu1 %vm3885_vm0, %v11610_v9 }
 0x6db   :  { %7537 = vmatmul.mubr.msk.f32.gmra.mrb[42].mxu1 %vm3885_vm0, %v11620_v56 }
 0x6dc   :  { %7539 = vmatprep.mubr.msk.f32.mxu1 %vm3885_vm0, %v11630_v61 }
 0x6df   :  { %7540 = vmatmul.mubr.msk.f32.gmra.mrb[44].mxu1 %vm3885_vm0, %v11640_v54 }
 0x6e0   :  { %7542 = vmatprep.mubr.msk.f32.mxu1 %vm3885_vm0, %v11650_v30 }
 0x6e3   :  { %7543 = vmatmul.mubr.msk.f32.gmra.mrb[46].mxu1 %vm3885_vm0, %v11660_v36 }
 0x6e4   :  { %7545 = vmatprep.mubr.msk.f32.mxu1 %vm3885_vm0, %v11670_v52 }
 0x6e7   :  { %7546 = vmatmul.mubr.msk.f32.gmra.mrb[48].mxu1 %vm3885_vm0, %v11680_v38 }
 0x6e8   :  { %7548 = vmatprep.mubr.msk.f32.mxu1 %vm3885_vm0, %v11690_v23 }
 0x6eb   :  { %7549 = vmatmul.mubr.msk.f32.gmra.mrb[50].mxu1 %vm3885_vm0, %v11700_v41 }
 0x6ec   :  { %7551 = vmatprep.mubr.msk.f32.mxu1 %vm3885_vm0, %v11710_v14 }
 0x6ef   :  { %7552 = vmatmul.mubr.msk.f32.gmra.mrb[52].mxu1 %vm3885_vm0, %v11726_v60 }
 0x6f0   :  { %7554 = vmatprep.mubr.msk.f32.mxu1 %vm3885_vm0, %v11736_v57 }
 0x6f3   :  { %7555 = vmatmul.mubr.msk.f32.gmra.mrb[54].mxu1 %vm3885_vm0, %v11746_v58 }
 0x6f4   :  { %7557 = vmatprep.mubr.msk.f32.mxu1 %vm3885_vm0, %v11756_v35 }
 0x6f7   :  { %7558 = vmatmul.mubr.msk.f32.gmra.mrb[56].mxu1 %vm3885_vm0, %v11766_v49 }
 0x6f8   :  { %7560 = vmatprep.mubr.msk.f32.mxu1 %vm3885_vm0, %v11776_v45 }
 0x6fb   :  { %7561 = vmatmul.mubr.msk.f32.gmra.mrb[58].mxu1 %vm3885_vm0, %v11786_v26 }
 0x6fc   :  { %7563 = vmatprep.mubr.msk.f32.mxu1 %vm3885_vm0, %v11796_v5 }
 0x6ff   :  { %7564 = vmatmul.mubr.msk.f32.gmra.mrb[60].mxu1 %vm3885_vm0, %v11809_v40 }
 0x700   :  { %7566 = vmatprep.mubr.msk.f32.mxu1 %vm3885_vm0, %v11819_v37 }
 0x703   :  { %7567 = vmatmul.mubr.msk.f32.gmra.mrb[62].mxu1 %vm3885_vm0, %v11829_v17 }
 0x704   :  { %7569 = vmatprep.mubr.msk.f32.mxu1 %vm3885_vm0, %v11838_v3 }
 0x707   :  { %7570 = vmatmul.mubr.msk.f32.gmra.mrb[64].mxu1 %vm3885_vm0, %v11844_v46 }
 0x708   :  { %7572 = vmatprep.mubr.msk.f32.mxu1 %vm3885_vm0, %v11850_v0 }
 0x70b   :  { %7573 = vmatmul.mubr.msk.f32.gmra.mrb[66].mxu1 %vm3885_vm0, %v11856_v1 }
 0x70c   :  { %7575 = vmatprep.mubr.msk.f32.mxu1 %vm3885_vm0, %v11862_v18 }
 0x70f   :  { %7576 = vmatmul.mubr.msk.f32.gmra.mrb[68].mxu1 %vm3885_vm0, %v11868_v20 }
 0x710   :  { %7578 = vmatprep.mubr.msk.f32.mxu1 %vm3885_vm0, %v11874_v4 }
 0x713   :  { %7579 = vmatmul.mubr.msk.f32.gmra.mrb[70].mxu1 %vm3885_vm0, %v11880_v7 }
 0x714   :  { %7581 = vmatprep.mubr.msk.f32.mxu1 %vm3885_vm0, %v11886_v29 }
 0x717   :  { %7582 = vmatmul.mubr.msk.f32.gmra.mrb[72].mxu1 %vm3885_vm0, %v11892_v16 }
 0x718   :  { %7584 = vmatprep.mubr.msk.f32.mxu1 %vm3885_vm0, %v11898_v47 }
 0x71b   :  { %7585 = vmatmul.mubr.msk.f32.gmra.mrb[74].mxu1 %vm3885_vm0, %v11904_v11 }
 0x71c   :  { %7587 = vmatprep.mubr.msk.f32.mxu1 %vm3885_vm0, %v11910_v33 }
 0x71f   :  { %7588 = vmatmul.mubr.msk.f32.gmra.mrb[76].mxu1 %vm3885_vm0, %v11916_v27 }
 0x720   :  { %7590 = vmatprep.mubr.msk.f32.mxu1 %vm3885_vm0, %v11922_v59 }
 0x723   :  { %7591 = vmatmul.mubr.msk.f32.gmra.mrb[78].mxu1 %vm3885_vm0, %v11928_v10 }
 0x724   :  { %7593 = vmatprep.mubr.msk.f32.mxu1 %vm3885_vm0, %v11940_v39 }
 0x727   :  { %7594 = vmatmul.mubr.msk.f32.gmra.mrb[80].mxu1 %vm3885_vm0, %v11949_v6 }
 0x728   :  { %7596 = vmatprep.mubr.msk.f32.mxu1 %vm3885_vm0, %v11955_v53 }
 0x72b   :  { %7597 = vmatmul.mubr.msk.f32.gmra.mrb[82].mxu1 %vm3885_vm0, %v11961_v8 }
 0x72c   :  { %7599 = vmatprep.mubr.msk.f32.mxu1 %vm3885_vm0, %v11967_v12 }
 0x72f   :  { %7600 = vmatmul.mubr.msk.f32.gmra.mrb[84].mxu1 %vm3885_vm0, %v11973_v19 }
 0x730   :  { %7602 = vmatprep.mubr.msk.f32.mxu1 %vm3885_vm0, %v11979_v21 }
 0x733   :  { %7603 = vmatmul.mubr.msk.f32.gmra.mrb[86].mxu1 %vm3885_vm0, %v11985_v13 }
 0x734   :  { %7605 = vmatprep.mubr.msk.f32.mxu1 %vm3885_vm0, %v11991_v55 }
 0x737   :  { %7606 = vmatmul.mubr.msk.f32.gmra.mrb[88].mxu1 %vm3885_vm0, %v11997_v32 }
 0x738   :  { %7614 = vmatprep.mubr.msk.f32.mxu1 %vm3885_vm0, %v11570_v31  ;;  %v12240_v31 = vld [vmem:[%s13270_s2] sm:$0xf] }
 0x73b   :  { %7615 = vmatmul.mubr.msk.f32.vlgmr.msra.gmra.mrb[34].mxu1 %vm3885_vm0, %v11580_v34  ;;  %v13603_v34 = vld [vmem:[#allocation5_spill] sm:$0xff] }
 0x73c   :  { %7617 = vmatprep.mubr.msk.f32.mxu1 %vm3885_vm0, %v11590_v62  ;;  %v13604_v62 = vsub.s32 1, %v13603_v34 }
 0x73f   :  { %7618 = vmatmul.mubr.msk.f32.gmra.mrb[36].mxu1 %vm3885_vm0, %v11600_v42  ;;  %v12245_v42 = vrot.slane %v12240_v31, %v13604_v62 }
 0x740   :  { %7620 = vmatprep.mubr.msk.f32.mxu1 %vm3885_vm0, %v11610_v9 }
 0x743   :  { %7621 = vmatmul.mubr.msk.f32.gmra.mrb[38].mxu1 %vm3885_vm0, %v11620_v56 }
 0x744   :  { %7623 = vmatprep.mubr.msk.f32.mxu1 %vm3885_vm0, %v11630_v61 }
 0x747   :  { %7624 = vmatmul.mubr.msk.f32.gmra.mrb[40].mxu1 %vm3885_vm0, %v11640_v54 }
 0x748   :  { %7626 = vmatprep.mubr.msk.f32.mxu1 %vm3885_vm0, %v11650_v30 }
 0x74b   :  { %7627 = vmatmul.mubr.msk.f32.gmra.mrb[42].mxu1 %vm3885_vm0, %v11660_v36 }
 0x74c   :  { %7629 = vmatprep.mubr.msk.f32.mxu1 %vm3885_vm0, %v11670_v52 }
 0x74f   :  { %7630 = vmatmul.mubr.msk.f32.gmra.mrb[44].mxu1 %vm3885_vm0, %v11680_v38 }
 0x750   :  { %7632 = vmatprep.mubr.msk.f32.mxu1 %vm3885_vm0, %v11690_v23 }
 0x753   :  { %7633 = vmatmul.mubr.msk.f32.gmra.mrb[46].mxu1 %vm3885_vm0, %v11700_v41 }
 0x754   :  { %7635 = vmatprep.mubr.msk.f32.mxu1 %vm3885_vm0, %v11710_v14 }
 0x757   :  { %7636 = vmatmul.mubr.msk.f32.gmra.mrb[48].mxu1 %vm3885_vm0, %v11726_v60 }
 0x758   :  { %7638 = vmatprep.mubr.msk.f32.mxu1 %vm3885_vm0, %v11736_v57 }
 0x75b   :  { %7639 = vmatmul.mubr.msk.f32.gmra.mrb[50].mxu1 %vm3885_vm0, %v11746_v58 }
 0x75c   :  { %7641 = vmatprep.mubr.msk.f32.mxu1 %vm3885_vm0, %v11756_v35 }
 0x75f   :  { %7642 = vmatmul.mubr.msk.f32.gmra.mrb[52].mxu1 %vm3885_vm0, %v11766_v49 }
 0x760   :  { %7644 = vmatprep.mubr.msk.f32.mxu1 %vm3885_vm0, %v11776_v45 }
 0x763   :  { %7645 = vmatmul.mubr.msk.f32.gmra.mrb[54].mxu1 %vm3885_vm0, %v11786_v26 }
 0x764   :  { %7647 = vmatprep.mubr.msk.f32.mxu1 %vm3885_vm0, %v11796_v5 }
 0x767   :  { %7648 = vmatmul.mubr.msk.f32.gmra.mrb[56].mxu1 %vm3885_vm0, %v11809_v40 }
 0x768   :  { %7650 = vmatprep.mubr.msk.f32.mxu1 %vm3885_vm0, %v11819_v37 }
 0x76b   :  { %7651 = vmatmul.mubr.msk.f32.gmra.mrb[58].mxu1 %vm3885_vm0, %v11829_v17 }
 0x76c   :  { %7653 = vmatprep.mubr.msk.f32.mxu1 %vm3885_vm0, %v11838_v3 }
 0x76f   :  { %7654 = vmatmul.mubr.msk.f32.gmra.mrb[60].mxu1 %vm3885_vm0, %v11844_v46 }
 0x770   :  { %7656 = vmatprep.mubr.msk.f32.mxu1 %vm3885_vm0, %v11850_v0 }
 0x773   :  { %7657 = vmatmul.mubr.msk.f32.gmra.mrb[62].mxu1 %vm3885_vm0, %v11856_v1 }
 0x774   :  { %7659 = vmatprep.mubr.msk.f32.mxu1 %vm3885_vm0, %v11862_v18 }
 0x777   :  { %7660 = vmatmul.mubr.msk.f32.gmra.mrb[64].mxu1 %vm3885_vm0, %v11868_v20 }
 0x778   :  { %7662 = vmatprep.mubr.msk.f32.mxu1 %vm3885_vm0, %v11874_v4 }
 0x77b   :  { %7663 = vmatmul.mubr.msk.f32.gmra.mrb[66].mxu1 %vm3885_vm0, %v11880_v7 }
 0x77c   :  { %7665 = vmatprep.mubr.msk.f32.mxu1 %vm3885_vm0, %v11886_v29 }
 0x77f   :  { %7666 = vmatmul.mubr.msk.f32.gmra.mrb[68].mxu1 %vm3885_vm0, %v11892_v16 }
 0x780   :  { %7668 = vmatprep.mubr.msk.f32.mxu1 %vm3885_vm0, %v11898_v47 }
 0x783   :  { %7669 = vmatmul.mubr.msk.f32.gmra.mrb[70].mxu1 %vm3885_vm0, %v11904_v11 }
 0x784   :  { %7671 = vmatprep.mubr.msk.f32.mxu1 %vm3885_vm0, %v11910_v33 }
 0x787   :  { %7672 = vmatmul.mubr.msk.f32.gmra.mrb[72].mxu1 %vm3885_vm0, %v11916_v27 }
 0x788   :  { %7674 = vmatprep.mubr.msk.f32.mxu1 %vm3885_vm0, %v11922_v59 }
 0x78b   :  { %7675 = vmatmul.mubr.msk.f32.gmra.mrb[74].mxu1 %vm3885_vm0, %v11928_v10 }
 0x78c   :  { %7677 = vmatprep.mubr.msk.f32.mxu1 %vm3885_vm0, %v11940_v39 }
 0x78f   :  { %7678 = vmatmul.mubr.msk.f32.gmra.mrb[76].mxu1 %vm3885_vm0, %v11949_v6 }
 0x790   :  { %7680 = vmatprep.mubr.msk.f32.mxu1 %vm3885_vm0, %v11955_v53 }
 0x793   :  { %7681 = vmatmul.mubr.msk.f32.gmra.mrb[78].mxu1 %vm3885_vm0, %v11961_v8 }
 0x794   :  { %7683 = vmatprep.mubr.msk.f32.mxu1 %vm3885_vm0, %v11967_v12 }
 0x797   :  { %7684 = vmatmul.mubr.msk.f32.gmra.mrb[80].mxu1 %vm3885_vm0, %v11973_v19 }
 0x798   :  { %7686 = vmatprep.mubr.msk.f32.mxu1 %vm3885_vm0, %v11979_v21 }
 0x79b   :  { %7687 = vmatmul.mubr.msk.f32.gmra.mrb[82].mxu1 %vm3885_vm0, %v11985_v13 }
 0x79c   :  { %7689 = vmatprep.mubr.msk.f32.mxu1 %vm3885_vm0, %v11991_v55 }
 0x79f   :  { %7690 = vmatmul.mubr.msk.f32.gmra.mrb[84].mxu1 %vm3885_vm0, %v11997_v32 }
 0x7a0   :  { %7692 = vmatprep.mubr.msk.f32.mxu1 %vm3885_vm0, %v12002_v28 }
 0x7a3   :  { %7693 = vmatmul.mubr.msk.f32.gmra.mrb[86].mxu1 %vm3885_vm0, %v12007_v51 }
 0x7a4   :  { %7695 = vmatprep.mubr.msk.f32.mxu1 %vm3885_vm0, %v4804_v24 }
 0x7a7   :  { %7696 = vmatmul.mubr.msk.f32.gmra.mrb[88].mxu1 %vm3885_vm0, %v4805_v63 }
 0x7a8   :  { %5469 = vmatprep.mubr.f32.mxu1 %v12245_v42 }
 0x80e   :  { %v12248_v9 = vpop.f32.mrb[34].mxu1 }
 0x80f   :  { %13605 = vst [vmem:[#allocation56_spill] sm:$0xff] %v12248_v9  ;;  %v12252_v56 = vmul.f32 %v12248_v9, %v12248_v9  ;;  %v12254_v61 = vpop.f32.mrb[35].mxu1 }
 0x810   :  { %13606 = vst [vmem:[#allocation61_spill] sm:$0xff] %v12254_v61  ;;  %v7872_v54 = vpack.c.bf16 %v12248_v9, %v12254_v61  ;;  %v12260_v30 = vmul.f32 %v12254_v61, %v12254_v61 }
 0x812   :  { %v12264_v52 = vpop.f32.mrb[36].mxu1 }
 0x813   :  { %13607 = vst [vmem:[#allocation60_spill] sm:$0xff] %v12264_v52  ;;  %v12268_v38 = vmul.f32 %v12264_v52, %v12264_v52  ;;  %v12270_v23 = vpop.f32.mrb[37].mxu1 }
 0x814   :  { %13608 = vst [vmem:[#allocation65_spill] sm:$0xff] %v12270_v23  ;;  %v7876_v41 = vpack.c.bf16 %v12264_v52, %v12270_v23  ;;  %v12276_v14 = vmul.f32 %v12270_v23, %v12270_v23 }
 0x816   :  { %v12280_v57 = vpop.f32.mrb[38].mxu1 }
 0x817   :  { %13609 = vst [vmem:[#allocation64_spill] sm:$0xff] %v12280_v57  ;;  %v12284_v58 = vmul.f32 %v12280_v57, %v12280_v57  ;;  %v12286_v35 = vpop.f32.mrb[39].mxu1 }
 0x818   :  { %13610 = vst [vmem:[#allocation4_spill] sm:$0xff] %v12286_v35  ;;  %v7880_v49 = vpack.c.bf16 %v12280_v57, %v12286_v35  ;;  %v12292_v45 = vmul.f32 %v12286_v35, %v12286_v35 }
 0x81a   :  { %v12296_v5 = vpop.f32.mrb[40].mxu1 }
 0x81b   :  { %13611 = vst [vmem:[#allocation6_spill] sm:$0xff] %v12296_v5  ;;  %v12300_v40 = vmul.f32 %v12296_v5, %v12296_v5  ;;  %v12302_v37 = vpop.f32.mrb[41].mxu1 }
 0x81c   :  { %13612 = vst [vmem:[#allocation7_spill] sm:$0xff] %v12302_v37  ;;  %v7884_v17 = vpack.c.bf16 %v12296_v5, %v12302_v37  ;;  %v12308_v3 = vmul.f32 %v12302_v37, %v12302_v37 }
 0x81e   :  { %v12312_v0 = vpop.f32.mrb[42].mxu1 }
 0x81f   :  { %13613 = vst [vmem:[#allocation8_spill] sm:$0xff] %v12312_v0  ;;  %v12316_v1 = vmul.f32 %v12312_v0, %v12312_v0  ;;  %v12318_v18 = vpop.f32.mrb[43].mxu1 }
 0x820   :  { %13614 = vst [vmem:[#allocation9_spill] sm:$0xff] %v12318_v18  ;;  %v7888_v20 = vpack.c.bf16 %v12312_v0, %v12318_v18  ;;  %v12324_v4 = vmul.f32 %v12318_v18, %v12318_v18 }
 0x822   :  { %v12328_v29 = vpop.f32.mrb[44].mxu1 }
 0x823   :  { %13615 = vst [vmem:[#allocation10_spill] sm:$0xff] %v12328_v29  ;;  %v12332_v16 = vmul.f32 %v12328_v29, %v12328_v29  ;;  %v12334_v47 = vpop.f32.mrb[45].mxu1 }
 0x824   :  { %13616 = vst [vmem:[#allocation11_spill] sm:$0xff] %v12334_v47  ;;  %v12340_v33 = vmul.f32 %v12334_v47, %v12334_v47 }
 0x826   :  { %v12344_v59 = vpop.f32.mrb[46].mxu1 }
 0x827   :  { %13617 = vst [vmem:[#allocation12_spill] sm:$0xff] %v12344_v59  ;;  %v12348_v10 = vmul.f32 %v12344_v59, %v12344_v59  ;;  %v12350_v39 = vpop.f32.mrb[47].mxu1 }
 0x828   :  { %13618 = vst [vmem:[#allocation13_spill] sm:$0xff] %v12350_v39  ;;  %v12356_v6 = vmul.f32 %v12350_v39, %v12350_v39 }
 0x82a   :  { %v12360_v8 = vpop.f32.mrb[48].mxu1 }
 0x82b   :  { %13619 = vst [vmem:[#allocation14_spill] sm:$0xff] %v12360_v8  ;;  %v12364_v12 = vmul.f32 %v12360_v8, %v12360_v8  ;;  %v12366_v19 = vpop.f32.mrb[49].mxu1 }
 0x82c   :  { %13620 = vst [vmem:[#allocation15_spill] sm:$0xff] %v12366_v19  ;;  %v12372_v13 = vmul.f32 %v12366_v19, %v12366_v19 }
 0x82e   :  { %v12376_v32 = vpop.f32.mrb[50].mxu1 }
 0x82f   :  { %13621 = vst [vmem:[#allocation16_spill] sm:$0xff] %v12376_v32  ;;  %v12380_v28 = vmul.f32 %v12376_v32, %v12376_v32  ;;  %v12382_v15 = vpop.f32.mrb[51].mxu1 }
 0x830   :  { %13622 = vst [vmem:[#allocation17_spill] sm:$0xff] %v12382_v15  ;;  %v7870_v44 = vpack.c.bf16 %v12376_v32, %v12382_v15  ;;  %v12388_v51 = vmul.f32 %v12382_v15, %v12382_v15 }
 0x832   :  { %v12390_v25 = vpop.f32.mrb[52].mxu1  ;;  %7871 = vmatprep.subr.bf16.mxu1 %v7870_v44 }
 0x833   :  { %13623 = vst [vmem:[#allocation18_spill] sm:$0xff] %v12390_v25  ;;  %v12396_v48 = vmul.f32 %v12390_v25, %v12390_v25  ;;  %v12398_v2 = vpop.f32.mrb[53].mxu1  ;;  %7873 = vmatpush3.bf16.msra.mxu1 %v7872_v54 }
 0x834   :  { %13624 = vst [vmem:[#allocation19_spill] sm:$0xff] %v12398_v2  ;;  %v7874_v22 = vpack.c.bf16 %v12390_v25, %v12398_v2  ;;  %v12404_v24 = vmul.f32 %v12398_v2, %v12398_v2  ;;  %v13644_v2 = vmov 0.0|0.0  }
 0x836   :  { %v12406_v63 = vpop.f32.mrb[54].mxu1  ;;  %7875 = vmatprep.subr.bf16.mxu1 %v7874_v22 }
 0x837   :  { %13625 = vst [vmem:[#allocation20_spill] sm:$0xff] %v12406_v63  ;;  %v12412_v44 = vmul.f32 %v12406_v63, %v12406_v63  ;;  %v12414_v55 = vpop.f32.mrb[55].mxu1  ;;  %7877 = vmatpush3.bf16.msra.mxu1 %v7876_v41 }
 0x838   :  { %13626 = vst [vmem:[#allocation21_spill] sm:$0xff] %v12414_v55  ;;  %v7878_v54 = vpack.c.bf16 %v12406_v63, %v12414_v55  ;;  %v12420_v53 = vmul.f32 %v12414_v55, %v12414_v55 }
 0x83a   :  { %v12422_v27 = vpop.f32.mrb[56].mxu1  ;;  %7879 = vmatprep.subr.bf16.mxu1 %v7878_v54 }
 0x83b   :  { %13627 = vst [vmem:[#allocation22_spill] sm:$0xff] %v12422_v27  ;;  %v12428_v7 = vmul.f32 %v12422_v27, %v12422_v27  ;;  %v12430_v46 = vpop.f32.mrb[57].mxu1  ;;  %7881 = vmatpush3.bf16.msra.mxu1 %v7880_v49 }
 0x83c   :  { %13628 = vst [vmem:[#allocation23_spill] sm:$0xff] %v12430_v46  ;;  %v7882_v41 = vpack.c.bf16 %v12422_v27, %v12430_v46  ;;  %v12436_v26 = vmul.f32 %v12430_v46, %v12430_v46 }
 0x83e   :  { %v12438_v60 = vpop.f32.mrb[58].mxu1  ;;  %7883 = vmatprep.subr.bf16.mxu1 %v7882_v41 }
 0x83f   :  { %13629 = vst [vmem:[#allocation24_spill] sm:$0xff] %v12438_v60  ;;  %v12444_v22 = vmul.f32 %v12438_v60, %v12438_v60  ;;  %v12446_v62 = vpop.f32.mrb[59].mxu1  ;;  %7885 = vmatpush3.bf16.msra.mxu1 %v7884_v17 }
 0x840   :  { %13630 = vst [vmem:[#allocation25_spill] sm:$0xff] %v12446_v62  ;;  %v7886_v49 = vpack.c.bf16 %v12438_v60, %v12446_v62  ;;  %v12452_v36 = vmul.f32 %v12446_v62, %v12446_v62 }
 0x842   :  { %v12454_v43 = vpop.f32.mrb[60].mxu1  ;;  %7887 = vmatprep.subr.bf16.mxu1 %v7886_v49  ;;  %v13640_v49 = vld [vmem:[#allocation36_spill] sm:$0xff] }
 0x843   :  { %13631 = vst [vmem:[#allocation26_spill] sm:$0xff] %v12454_v43  ;;  %v12460_v54 = vmul.f32 %v12454_v43, %v12454_v43  ;;  %v12462_v21 = vpop.f32.mrb[61].mxu1  ;;  %7889 = vmatpush3.bf16.msra.mxu1 %v7888_v20  ;;  %v13635_v20 = vpack.c.bf16 %v12328_v29, %v12334_v47  ;;  %v12512_v46 = vrot.slane %v12240_v31, %v13640_v49 }
 0x844   :  { %13632 = vst [vmem:[#allocation27_spill] sm:$0xff] %v12462_v21  ;;  %v7890_v17 = vpack.c.bf16 %v12454_v43, %v12462_v21  ;;  %v12468_v50 = vmul.f32 %v12462_v21, %v12462_v21 }
 0x846   :  { %v12470_v11 = vpop.f32.mrb[62].mxu1  ;;  %7891 = vmatprep.subr.bf16.mxu1 %v7890_v17 }
 0x847   :  { %13633 = vst [vmem:[#allocation28_spill] sm:$0xff] %v12470_v11  ;;  %v12476_v41 = vmul.f32 %v12470_v11, %v12470_v11  ;;  %v12478_v60 = vpop.f32.mrb[63].mxu1  ;;  %7893 = vmatpush3.bf16.msra.mxu1 %v13635_v20  ;;  %v13638_v20 = vpack.c.bf16 %v12344_v59, %v12350_v39 }
 0x848   :  { %13634 = vst [vmem:[#allocation29_spill] sm:$0xff] %v12478_v60  ;;  %v7894_v43 = vpack.c.bf16 %v12470_v11, %v12478_v60  ;;  %v12487_v21 = vmul.f32 %v12478_v60, %v12478_v60 }
 0x84a   :  { %v12489_v17 = vpop.f32.mrb[64].mxu1  ;;  %7895 = vmatprep.subr.bf16.mxu1 %v7894_v43 }
 0x84b   :  { %13636 = vst [vmem:[#allocation30_spill] sm:$0xff] %v12489_v17  ;;  %v12495_v62 = vmul.f32 %v12489_v17, %v12489_v17  ;;  %v12497_v27 = vpop.f32.mrb[65].mxu1  ;;  %7897 = vmatpush3.bf16.msra.mxu1 %v13638_v20 }
 0x84c   :  { %13637 = vst [vmem:[#allocation31_spill] sm:$0xff] %v12497_v27  ;;  %v7898_v11 = vpack.c.bf16 %v12489_v17, %v12497_v27  ;;  %v12506_v60 = vmul.f32 %v12497_v27, %v12497_v27  ;;  %v13642_v17 = vpack.c.bf16 %v12360_v8, %v12366_v19  ;;  %v13643_v27 = vsub.s32 3, %v13603_v34 }
 0x84e   :  { %v12508_v43 = vpop.f32.mrb[66].mxu1  ;;  %7899 = vmatprep.subr.bf16.mxu1 %v7898_v11  ;;  %v12528_v11 = vrot.slane %v12240_v31, %v13643_v27 }
 0x84f   :  { %13639 = vst [vmem:[#allocation32_spill] sm:$0xff] %v12508_v43  ;;  %v12518_v20 = vmul.f32 %v12508_v43, %v12508_v43  ;;  %v12520_v55 = vpop.f32.mrb[67].mxu1  ;;  %7901 = vmatpush3.bf16.msra.mxu1 %v13642_v17 }
 0x850   :  { %13641 = vst [vmem:[#allocation33_spill] sm:$0xff] %v12520_v55  ;;  %v7903_v25 = vpack.c.bf16 %v12508_v43, %v12520_v55  ;;  %v12534_v63 = vmul.f32 %v12520_v55, %v12520_v55  ;;  %7902 = vmatprep.subr.bf16.mxu1 %v13644_v2 }
 0x852   :  { %v12539_v15 = vpop.f32.mrb[68].mxu1  ;;  %5470 = vmatmul.mubr.f32.vlgmr.msra.gmra.mrb[90].mxu1 %v12512_v46 }
 0x853   :  { %13645 = vst [vmem:[#allocation34_spill] sm:$0xff] %v12539_v15  ;;  %v12544_v27 = vmul.f32 %v12539_v15, %v12539_v15  ;;  %v12546_v17 = vpop.f32.mrb[69].mxu1  ;;  %7904 = vmatpush1.bf16.msra.mxu1 %v7903_v25  ;;  %6359 = vmatprep.mubr.msk.f32.mxu1 %vm5402_vm5, %v12528_v11 }
 0x854   :  { %13646 = vst [vmem:[#allocation35_spill] sm:$0xff] %v12546_v17  ;;  %v7906_v43 = vpack.c.bf16 %v12539_v15, %v12546_v17  ;;  %v12554_v32 = vmul.f32 %v12546_v17, %v12546_v17  ;;  %7905 = vmatprep.subr.bf16.mxu1 %v13644_v2 }
 0x856   :  { %v12559_v8 = vpop.f32.mrb[70].mxu1 }
 0x857   :  { %13647 = vst [vmem:[#allocation37_spill] sm:$0xff] %v12559_v8  ;;  %v12563_v25 = vmul.f32 %v12559_v8, %v12559_v8  ;;  %v12565_v19 = vpop.f32.mrb[71].mxu1  ;;  %7907 = vmatpush1.bf16.msra.mxu1 %v7906_v43 }
 0x858   :  { %13648 = vst [vmem:[#allocation38_spill] sm:$0xff] %v12565_v19  ;;  %v7909_v15 = vpack.c.bf16 %v12559_v8, %v12565_v19  ;;  %v12571_v17 = vmul.f32 %v12565_v19, %v12565_v19  ;;  %7908 = vmatprep.subr.bf16.mxu1 %v13644_v2 }
 0x85a   :  { %v12576_v59 = vpop.f32.mrb[72].mxu1 }
 0x85b   :  { %13649 = vst [vmem:[#allocation40_spill] sm:$0xff] %v12576_v59  ;;  %v12580_v39 = vmul.f32 %v12576_v59, %v12576_v59  ;;  %v12582_v29 = vpop.f32.mrb[73].mxu1  ;;  %7910 = vmatpush1.bf16.msra.mxu1 %v7909_v15 }
 0x85c   :  { %13650 = vst [vmem:[#allocation42_spill] sm:$0xff] %v12582_v29  ;;  %v7912_v43 = vpack.c.bf16 %v12576_v59, %v12582_v29  ;;  %v12588_v8 = vmul.f32 %v12582_v29, %v12582_v29  ;;  %7911 = vmatprep.subr.bf16.mxu1 %v13644_v2 }
 0x85e   :  { %v12593_v19 = vpop.f32.mrb[74].mxu1 }
 0x85f   :  { %13651 = vst [vmem:[#allocation43_spill] sm:$0xff] %v12593_v19  ;;  %v12597_v47 = vmul.f32 %v12593_v19, %v12593_v19  ;;  %v12599_v0 = vpop.f32.mrb[75].mxu1  ;;  %7913 = vmatpush1.bf16.msra.mxu1 %v7912_v43 }
 0x860   :  { %13652 = vst [vmem:[#allocation46_spill] sm:$0xff] %v12599_v0  ;;  %v7915_v15 = vpack.c.bf16 %v12593_v19, %v12599_v0  ;;  %v12605_v59 = vmul.f32 %v12599_v0, %v12599_v0  ;;  %7914 = vmatprep.subr.bf16.mxu1 %v13644_v2 }
 0x862   :  { %v12610_v29 = vpop.f32.mrb[76].mxu1 }
 0x863   :  { %13653 = vst [vmem:[#allocation47_spill] sm:$0xff] %v12610_v29  ;;  %v12614_v18 = vmul.f32 %v12610_v29, %v12610_v29  ;;  %v12616_v5 = vpop.f32.mrb[77].mxu1  ;;  %7916 = vmatpush1.bf16.msra.mxu1 %v7915_v15 }
 0x864   :  { %13654 = vst [vmem:[#allocation50_spill] sm:$0xff] %v12616_v5  ;;  %v7918_v43 = vpack.c.bf16 %v12610_v29, %v12616_v5  ;;  %v12622_v19 = vmul.f32 %v12616_v5, %v12616_v5  ;;  %7917 = vmatprep.subr.bf16.mxu1 %v13644_v2 }
 0x866   :  { %v12627_v0 = vpop.f32.mrb[78].mxu1 }
 0x867   :  { %13655 = vst [vmem:[#allocation51_spill] sm:$0xff] %v12627_v0  ;;  %v12631_v37 = vmul.f32 %v12627_v0, %v12627_v0  ;;  %v12633_v57 = vpop.f32.mrb[79].mxu1  ;;  %7919 = vmatpush1.bf16.msra.mxu1 %v7918_v43 }
 0x868   :  { %13656 = vst [vmem:[#allocation54_spill] sm:$0xff] %v12633_v57  ;;  %v7921_v15 = vpack.c.bf16 %v12627_v0, %v12633_v57  ;;  %v12639_v29 = vmul.f32 %v12633_v57, %v12633_v57  ;;  %7920 = vmatprep.subr.bf16.mxu1 %v13644_v2 }
 0x86a   :  { %v12644_v5 = vpop.f32.mrb[80].mxu1 }
 0x86b   :  { %13657 = vst [vmem:[#allocation55_spill] sm:$0xff] %v12644_v5  ;;  %v12648_v35 = vmul.f32 %v12644_v5, %v12644_v5  ;;  %v12650_v52 = vpop.f32.mrb[81].mxu1  ;;  %7922 = vmatpush1.bf16.msra.mxu1 %v7921_v15 }
 0x86c   :  { %13659 = vst [vmem:[#allocation59_spill] sm:$0xff] %v12650_v52  ;;  %v7924_v43 = vpack.c.bf16 %v12644_v5, %v12650_v52  ;;  %v12656_v0 = vmul.f32 %v12650_v52, %v12650_v52  ;;  %7923 = vmatprep.subr.bf16.mxu1 %v13644_v2 }
 0x86d   :  { %13658 = vst [vmem:[#allocation58_spill] sm:$0xff] %v12648_v35  ;;  %v13671_v35 = vsub.s32 2, %v13603_v34  ;;  %v13675_v34 = vpack.c.bf16 %v12268_v38, %v12276_v14  ;;  %v13681_v38 = vpack.c.bf16 %v12316_v1, %v12324_v4  ;;  %v13682_v14 = vpack.c.bf16 %v12460_v54, %v12468_v50 }
 0x86e   :  { %13660 = vst [vmem:[#allocation62_spill] sm:$0xff] %v12656_v0  ;;  %v12661_v57 = vpop.f32.mrb[82].mxu1  ;;  %v13692_v1 = vpack.c.bf16 %v12597_v47, %v12605_v59  ;;  %v13693_v4 = vpack.c.bf16 %v12614_v18, %v12622_v19 }
 0x86f   :  { %13661 = vst [vmem:[#allocation63_spill] sm:$0xff] %v12661_v57  ;;  %v12665_v23 = vmul.f32 %v12661_v57, %v12661_v57  ;;  %v12667_v9 = vpop.f32.mrb[83].mxu1  ;;  %7925 = vmatpush1.bf16.msra.mxu1 %v7924_v43 }
 0x870   :  { %13663 = vst [vmem:[#allocation67_spill] sm:$0xff] %v12667_v9  ;;  %v7927_v15 = vpack.c.bf16 %v12661_v57, %v12667_v9  ;;  %v12673_v5 = vmul.f32 %v12667_v9, %v12667_v9  ;;  %7926 = vmatprep.subr.bf16.mxu1 %v13644_v2 }
 0x871   :  { %13662 = vst [vmem:[#allocation66_spill] sm:$0xff] %v12665_v23 }
 0x872   :  { %13664 = vst [vmem:[#allocation68_spill] sm:$0xff] %v12673_v5  ;;  %v12678_v52 = vpop.f32.mrb[84].mxu1 }
 0x873   :  { %13665 = vst [vmem:[#allocation69_spill] sm:$0xff] %v12678_v52  ;;  %v12682_v61 = vmul.f32 %v12678_v52, %v12678_v52  ;;  %v12684_v49 = vpop.f32.mrb[85].mxu1  ;;  %7928 = vmatpush1.bf16.msra.mxu1 %v7927_v15 }
 0x874   :  { %13666 = vst [vmem:[#allocation70_spill] sm:$0xff] %v12684_v49  ;;  %v7930_v43 = vpack.c.bf16 %v12678_v52, %v12684_v49  ;;  %v5595_v57 = vmul.f32 %v12684_v49, %v12684_v49  ;;  %7929 = vmatprep.subr.bf16.mxu1 %v13644_v2 }
 0x876   :  { %v7998_v9 = vpack.c.bf16 %v12682_v61, %v5595_v57  ;;  %v12692_v55 = vpop.f32.mrb[86].mxu1 }
 0x877   :  { %13667 = vst [vmem:[#allocation71_spill] sm:$0xff] %v12692_v55  ;;  %v5598_v5 = vmul.f32 %v12692_v55, %v12692_v55  ;;  %v12696_v23 = vpop.f32.mrb[87].mxu1  ;;  %7931 = vmatpush1.bf16.msra.mxu1 %v7930_v43 }
 0x878   :  { %13668 = vst [vmem:[#allocation72_spill] sm:$0xff] %v12696_v23  ;;  %v7933_v15 = vpack.c.bf16 %v12692_v55, %v12696_v23  ;;  %v5597_v52 = vmul.f32 %v12696_v23, %v12696_v23  ;;  %7932 = vmatprep.subr.bf16.mxu1 %v13644_v2  ;;  %v13698_v47 = vld [vmem:[#allocation66_spill] sm:$0xff] }
 0x879   :  { %v13699_v59 = vld [vmem:[#allocation68_spill] sm:$0xff] }
 0x87a   :  { %v8001_v49 = vpack.c.bf16 %v5598_v5, %v5597_v52  ;;  %v12703_v0 = vpop.f32.mrb[88].mxu1  ;;  %v5394_v52 = vrot.slane %v12240_v31, %v13671_v35  ;;  %v13672_v5 = vpack.c.bf16 %v12380_v28, %v12388_v51  ;;  %v13676_v31 = vpack.c.bf16 %v12412_v44, %v12420_v53 }
 0x87b   :  { %13669 = vst [vmem:[#allocation41_spill] sm:$0xff] %v12703_v0  ;;  %v5600_v61 = vmul.f32 %v12703_v0, %v12703_v0  ;;  %v12707_v57 = vpop.f32.mrb[89].mxu1  ;;  %7934 = vmatpush1.bf16.msra.mxu1 %v7933_v15  ;;  %v13673_v15 = vpack.c.bf16 %v12252_v56, %v12260_v30  ;;  %v13677_v35 = vpack.c.bf16 %v12284_v58, %v12292_v45 }
 0x87c   :  { %13670 = vst [vmem:[#allocation39_spill] sm:$0xff] %v12707_v57  ;;  %v7936_v43 = vpack.c.bf16 %v12703_v0, %v12707_v57  ;;  %v5599_v55 = vmul.f32 %v12707_v57, %v12707_v57  ;;  %7935 = vmatprep.subr.bf16.mxu1 %v13644_v2  ;;  %v13674_v0 = vpack.c.bf16 %v12396_v48, %v12404_v24  ;;  %v13753_v57 = vld [vmem:[#allocation69_spill] sm:$0xff] }
 0x87d   :  { %v13678_v56 = vpack.c.bf16 %v12428_v7, %v12436_v26  ;;  %v13680_v30 = vpack.c.bf16 %v12444_v22, %v12452_v36  ;;  %v13683_v58 = vpack.c.bf16 %v12332_v16, %v12340_v33  ;;  %v13684_v45 = vpack.c.bf16 %v12476_v41, %v12487_v21  ;;  %v13695_v16 = vld [vmem:[#allocation58_spill] sm:$0xff]  ;;  %v13701_v22 = vld [vmem:[#allocation36_spill] sm:$0xff] }
 0x87e   :  { %v8004_v23 = vpack.c.bf16 %v5600_v61, %v5599_v55  ;;  %v13685_v36 = vpack.c.bf16 %v12348_v10, %v12356_v6  ;;  %v13686_v26 = vpack.c.bf16 %v12495_v62, %v12506_v60  ;;  %v13689_v60 = vpack.c.bf16 %v12544_v27, %v12554_v32  ;;  %v13696_v33 = vld [vmem:[#allocation62_spill] sm:$0xff]  ;;  %v5381_v62 = vld [vmem:[%s13272_s8] sm:$0x1]  ;;  %v13705_v61 = vld [vmem:[#allocation60_spill] sm:$0xff] }
 0x87f   :  { %7937 = vmatpush1.bf16.msra.mxu1 %v7936_v43  ;;  %v13694_v7 = vpack.c.bf16 %v12631_v37, %v12639_v29  ;;  %v13697_v10 = vpack.c.bf16 %v13695_v16, %v13696_v33  ;;  %v13718_v33 = vld [vmem:[#allocation17_spill] sm:$0xff] }
 0x880   :  { %7939 = vmatprep.subr.bf16.mxu1 %v13672_v5 }
 0x882   :  { %5540 = vmatmul.mubr.f32.vlgmr.msra.gmra.mrb[92].mxu1 %v5394_v52 }
 0x883   :  { %7941 = vmatpush3.bf16.msra.mxu1 %v13673_v15  ;;  %5665 = vmatprep.mubr.f32.mxu1 %v12245_v42  ;;  %v13679_v42 = vpack.c.bf16 %v12300_v40, %v12308_v3  ;;  %v13687_v40 = vpack.c.bf16 %v12364_v12, %v12372_v13  ;;  %v13688_v3 = vpack.c.bf16 %v12518_v20, %v12534_v63  ;;  %v13707_v15 = vld [vmem:[#allocation64_spill] sm:$0xff] }
 0x884   :  { %7943 = vmatprep.subr.bf16.mxu1 %v13674_v0  ;;  %v13690_v0 = vpack.c.bf16 %v12563_v25, %v12571_v17  ;;  %v13704_v17 = vld [vmem:[#allocation65_spill] sm:$0xff] }
 0x887   :  { %7945 = vmatpush3.bf16.msra.mxu1 %v13675_v34 }
 0x888   :  { %7947 = vmatprep.subr.bf16.mxu1 %v13676_v31  ;;  %v13708_v31 = vld [vmem:[#allocation7_spill] sm:$0xff] }
 0x88b   :  { %7949 = vmatpush3.bf16.msra.mxu1 %v13677_v35 }
 0x88c   :  { %7951 = vmatprep.subr.bf16.mxu1 %v13678_v56  ;;  %v13709_v56 = vld [vmem:[#allocation6_spill] sm:$0xff] }
 0x88f   :  { %7953 = vmatpush3.bf16.msra.mxu1 %v13679_v42 }
 0x890   :  { %7955 = vmatprep.subr.bf16.mxu1 %v13680_v30  ;;  %v13710_v30 = vld [vmem:[#allocation9_spill] sm:$0xff] }
 0x893   :  { %7957 = vmatpush3.bf16.msra.mxu1 %v13681_v38 }
 0x894   :  { %7959 = vmatprep.subr.bf16.mxu1 %v13682_v14  ;;  %v13711_v14 = vld [vmem:[#allocation8_spill] sm:$0xff] }
 0x897   :  { %7961 = vmatpush3.bf16.msra.mxu1 %v13683_v58 }
 0x898   :  { %7963 = vmatprep.subr.bf16.mxu1 %v13684_v45  ;;  %v13712_v45 = vld [vmem:[#allocation11_spill] sm:$0xff] }
 0x89b   :  { %7965 = vmatpush3.bf16.msra.mxu1 %v13685_v36 }
 0x89c   :  { %7967 = vmatprep.subr.bf16.mxu1 %v13686_v26  ;;  %v13713_v26 = vld [vmem:[#allocation10_spill] sm:$0xff] }
 0x89f   :  { %7969 = vmatpush3.bf16.msra.mxu1 %v13687_v40 }
 0x8a0   :  { %7970 = vmatprep.subr.bf16.mxu1 %v13644_v2 }
 0x8a2   :  { %5666 = vmatmul.mubr.f32.vlgmr.msra.gmra.mrb[94].mxu1 %v12512_v46  ;;  %v13691_v46 = vpack.c.bf16 %v12580_v39, %v12588_v8  ;;  %v13700_v39 = vpack.c.bf16 %v13698_v47, %v13699_v59  ;;  %v13719_v47 = vld [vmem:[#allocation16_spill] sm:$0xff] }
 0x8a3   :  { %7972 = vmatpush1.bf16.msra.mxu1 %v13688_v3  ;;  %6360 = vmatprep.mubr.msk.f32.mxu1 %vm5402_vm5, %v12528_v11  ;;  %v13703_v11 = vld [vmem:[#allocation56_spill] sm:$0xff]  ;;  %v13714_v3 = vld [vmem:[#allocation13_spill] sm:$0xff] }
 0x8a4   :  { %7973 = vmatprep.subr.bf16.mxu1 %v13644_v2 }
 0x8a7   :  { %7975 = vmatpush1.bf16.msra.mxu1 %v13689_v60 }
 0x8a8   :  { %7976 = vmatprep.subr.bf16.mxu1 %v13644_v2 }
 0x8ab   :  { %7978 = vmatpush1.bf16.msra.mxu1 %v13690_v0  ;;  %v13715_v0 = vld [vmem:[#allocation12_spill] sm:$0xff] }
 0x8ac   :  { %7979 = vmatprep.subr.bf16.mxu1 %v13644_v2 }
 0x8af   :  { %7981 = vmatpush1.bf16.msra.mxu1 %v13691_v46 }
 0x8b0   :  { %7982 = vmatprep.subr.bf16.mxu1 %v13644_v2 }
 0x8b3   :  { %7984 = vmatpush1.bf16.msra.mxu1 %v13692_v1  ;;  %v13716_v1 = vld [vmem:[#allocation15_spill] sm:$0xff] }
 0x8b4   :  { %7985 = vmatprep.subr.bf16.mxu1 %v13644_v2 }
 0x8b7   :  { %7987 = vmatpush1.bf16.msra.mxu1 %v13693_v4 }
 0x8b8   :  { %7988 = vmatprep.subr.bf16.mxu1 %v13644_v2 }
 0x8bb   :  { %7990 = vmatpush1.bf16.msra.mxu1 %v13694_v7  ;;  %v13717_v7 = vld [vmem:[#allocation14_spill] sm:$0xff] }
 0x8bc   :  { %7991 = vmatprep.subr.bf16.mxu1 %v13644_v2 }
 0x8bf   :  { %7993 = vmatpush1.bf16.msra.mxu1 %v13697_v10 }
 0x8c0   :  { %7994 = vmatprep.subr.bf16.mxu1 %v13644_v2 }
 0x8c3   :  { %7996 = vmatpush1.bf16.msra.mxu1 %v13700_v39  ;;  %v13720_v39 = vld [vmem:[#allocation19_spill] sm:$0xff] }
 0x8c4   :  { %7997 = vmatprep.subr.bf16.mxu1 %v13644_v2 }
 0x8c7   :  { %7999 = vmatpush1.bf16.msra.mxu1 %v7998_v9 }
 0x8c8   :  { %8000 = vmatprep.subr.bf16.mxu1 %v13644_v2 }
 0x8cb   :  { %8002 = vmatpush1.bf16.msra.mxu1 %v8001_v49  ;;  %v13702_v49 = vld [vmem:[#allocation61_spill] sm:$0xff] }
 0x8cc   :  { %8003 = vmatprep.subr.bf16.mxu1 %v13644_v2 }
 0x8cf   :  { %8005 = vmatpush1.bf16.msra.mxu1 %v8004_v23  ;;  %v5380_v23 = vld [vmem:[%s13271_s7] sm:$0x1] }
 0x8d2   :  { %5736 = vmatmul.mubr.f32.vlgmr.msra.gmra.mrb[96].mxu1 %v5394_v52  ;;  %v13706_v52 = vld [vmem:[#allocation4_spill] sm:$0xff] }
 0x925   :  { %v6829_v37 = vpop.f32.mrb[90].mxu1 }
 0x926   :  { %v6830_v18 = vpop.f32.mrb[91].mxu1 }
 0x927   :  { %v6831_v29 = vadd.f32 %v6830_v18, %v6829_v37  ;;  %v13721_v18 = vld [vmem:[#allocation18_spill] sm:$0xff] }
 0x955   :  { %v5541_v50 = vpop.f32.mrb[92].mxu1 }
 0x956   :  { %v5542_v6 = vadd.f32 %v6831_v29, %v5541_v50  ;;  %v5543_v53 = vpop.f32.mrb[93].mxu1  ;;  %v13722_v50 = vld [vmem:[#allocation21_spill] sm:$0xff] }
 0x957   :  { %v13723_v53 = vld [vmem:[#allocation20_spill] sm:$0xff] }
 0x958   :  { %v5741_v21 = vmul.f32 0.0034722222, %v5542_v6 }
 0x95a   :  { %v5743_v32 = vmul.f32 %v5741_v21, %v5741_v21 }
 0x975   :  { %v6864_v8 = vpop.f32.mrb[94].mxu1 }
 0x976   :  { %v6865_v12 = vpop.f32.mrb[95].mxu1 }
 0x977   :  { %v6866_v19 = vadd.f32 %v6865_v12, %v6864_v8  ;;  %v13724_v12 = vld [vmem:[#allocation23_spill] sm:$0xff] }
 0x9a5   :  { %v5737_v13 = vpop.f32.mrb[96].mxu1 }
 0x9a6   :  { %v5738_v55 = vadd.f32 %v6866_v19, %v5737_v13  ;;  %v5739_v9 = vpop.f32.mrb[97].mxu1 }
 0x9a8   :  { %v5742_v28 = vmul.f32 0.0034722222, %v5738_v55  ;;  %v13726_v55 = vld [vmem:[#allocation25_spill] sm:$0xff] }
 0x9aa   :  { %v5744_v51 = vsub.f32 %v5742_v28, %v5743_v32  ;;  %v13727_v32 = vld [vmem:[#allocation24_spill] sm:$0xff] }
 0x9ac   :  { %v5745_v48 = vmax.f32 %v5744_v51, 0.0  ;;  %v13728_v51 = vld [vmem:[#allocation27_spill] sm:$0xff] }
 0x9ae   :  { %v5746_v2 = vadd.f32 1e-05, %v5745_v48 }
 0x9b0   :  { %8360 = vrsqrt.f32 %v5746_v2  ;;  %v13729_v2 = vld [vmem:[#allocation26_spill] sm:$0xff] }
 0x9ba   :  { %v8361_v24 = vpop.eup %8360 }
 0x9bb   :  { %v5748_v63 = vmul.f32 %v8361_v24, %v5380_v23  ;;  %v13730_v24 = vld [vmem:[#allocation29_spill] sm:$0xff] }
 0x9bd   :  { %v5749_v44 = vmul.f32 %v5748_v63, %v5741_v21  ;;  %v5755_v54 = vrot.slane %v5748_v63, %v13701_v22  ;;  %v13725_v21 = vld [vmem:[#allocation22_spill] sm:$0xff] }
 0x9be   :  { %v13752_v22 = vld [vmem:[#allocation70_spill] sm:$0xff] }
 0x9bf   :  { %v5750_v41 = vsub.f32 %v5381_v62, %v5749_v44  ;;  %v5757_v20 = vmul.f32 %v5755_v54, %v13702_v49  ;;  %v5758_v27 = vmul.f32 %v13703_v11, %v5755_v54  ;;  %v5759_v25 = vmul.f32 %v5755_v54, %v13704_v17  ;;  %v13731_v62 = vld [vmem:[#allocation28_spill] sm:$0xff]  ;;  %v13732_v49 = vld [vmem:[#allocation31_spill] sm:$0xff]  ;;  %v13733_v17 = vld [vmem:[#allocation30_spill] sm:$0xff] }
 0x9c0   :  { %v5760_v43 = vmul.f32 %v13705_v61, %v5755_v54  ;;  %v5761_v5 = vmul.f32 %v5755_v54, %v13706_v52  ;;  %v5762_v34 = vmul.f32 %v13707_v15, %v5755_v54  ;;  %v5763_v35 = vmul.f32 %v5755_v54, %v13708_v31  ;;  %v13734_v52 = vld [vmem:[#allocation33_spill] sm:$0xff]  ;;  %v13735_v31 = vld [vmem:[#allocation32_spill] sm:$0xff] }
 0x9c1   :  { %v5764_v42 = vmul.f32 %v13709_v56, %v5755_v54  ;;  %v5765_v38 = vmul.f32 %v5755_v54, %v13710_v30  ;;  %v5766_v58 = vmul.f32 %v13711_v14, %v5755_v54  ;;  %v5767_v36 = vmul.f32 %v5755_v54, %v13712_v45  ;;  %v13736_v30 = vld [vmem:[#allocation35_spill] sm:$0xff]  ;;  %v13737_v45 = vld [vmem:[#allocation34_spill] sm:$0xff] }
 0x9c2   :  { %v5768_v40 = vmul.f32 %v13713_v26, %v5755_v54  ;;  %v5769_v60 = vmul.f32 %v5755_v54, %v13714_v3  ;;  %v5770_v46 = vmul.f32 %v13715_v0, %v5755_v54  ;;  %v5771_v4 = vmul.f32 %v5755_v54, %v13716_v1  ;;  %v13738_v3 = vld [vmem:[#allocation38_spill] sm:$0xff]  ;;  %v13739_v1 = vld [vmem:[#allocation37_spill] sm:$0xff] }
 0x9c3   :  { %v5772_v16 = vmul.f32 %v13717_v7, %v5755_v54  ;;  %v5773_v10 = vmul.f32 %v5755_v54, %v13718_v33  ;;  %v5774_v59 = vmul.f32 %v13719_v47, %v5755_v54  ;;  %v5775_v37 = vmul.f32 %v5755_v54, %v13720_v39  ;;  %v13740_v33 = vld [vmem:[#allocation42_spill] sm:$0xff]  ;;  %v13741_v39 = vld [vmem:[#allocation40_spill] sm:$0xff] }
 0x9c4   :  { %v5776_v29 = vmul.f32 %v13721_v18, %v5755_v54  ;;  %v5777_v6 = vmul.f32 %v5755_v54, %v13722_v50  ;;  %v5778_v8 = vmul.f32 %v13723_v53, %v5755_v54  ;;  %v5779_v19 = vmul.f32 %v5755_v54, %v13724_v12  ;;  %v13742_v50 = vld [vmem:[#allocation46_spill] sm:$0xff]  ;;  %v13743_v12 = vld [vmem:[#allocation43_spill] sm:$0xff] }
 0x9c5   :  { %v5780_v13 = vmul.f32 %v13725_v21, %v5755_v54  ;;  %v5781_v9 = vmul.f32 %v5755_v54, %v13726_v55  ;;  %v5782_v28 = vmul.f32 %v13727_v32, %v5755_v54  ;;  %v5783_v48 = vmul.f32 %v5755_v54, %v13728_v51  ;;  %v13744_v55 = vld [vmem:[#allocation50_spill] sm:$0xff]  ;;  %v13745_v51 = vld [vmem:[#allocation47_spill] sm:$0xff] }
 0x9c6   :  { %v5784_v23 = vmul.f32 %v13729_v2, %v5755_v54  ;;  %v5785_v63 = vmul.f32 %v5755_v54, %v13730_v24  ;;  %v5786_v44 = vmul.f32 %v13731_v62, %v5755_v54  ;;  %v5787_v11 = vmul.f32 %v5755_v54, %v13732_v49  ;;  %v13746_v24 = vld [vmem:[#allocation54_spill] sm:$0xff]  ;;  %v13747_v49 = vld [vmem:[#allocation51_spill] sm:$0xff] }
 0x9c7   :  { %v5788_v61 = vmul.f32 %v13733_v17, %v5755_v54  ;;  %v5789_v15 = vmul.f32 %v5755_v54, %v13734_v52  ;;  %v5790_v56 = vmul.f32 %v13735_v31, %v5755_v54  ;;  %v5791_v14 = vmul.f32 %v5755_v54, %v13736_v30  ;;  %v13748_v52 = vld [vmem:[#allocation59_spill] sm:$0xff] }
 0x9c8   :  { %v5792_v26 = vmul.f32 %v13737_v45, %v5755_v54  ;;  %v5793_v0 = vmul.f32 %v5755_v54, %v13738_v3  ;;  %v5794_v7 = vmul.f32 %v13739_v1, %v5755_v54  ;;  %v5795_v47 = vmul.f32 %v5755_v54, %v13740_v33  ;;  %v13749_v30 = vld [vmem:[#allocation55_spill] sm:$0xff] }
 0x9c9   :  { %v5796_v18 = vmul.f32 %v13741_v39, %v5755_v54  ;;  %v5797_v53 = vmul.f32 %v5755_v54, %v13742_v50  ;;  %v5798_v21 = vmul.f32 %v13743_v12, %v5755_v54  ;;  %v5799_v32 = vmul.f32 %v5755_v54, %v13744_v55  ;;  %v13750_v3 = vld [vmem:[#allocation67_spill] sm:$0xff]  ;;  %v13754_v55 = vld [vmem:[#allocation72_spill] sm:$0xff] }
 0x9ca   :  { %v5800_v2 = vmul.f32 %v13745_v51, %v5755_v54  ;;  %v5801_v62 = vmul.f32 %v5755_v54, %v13746_v24  ;;  %v5802_v17 = vmul.f32 %v13747_v49, %v5755_v54  ;;  %v5803_v31 = vmul.f32 %v5755_v54, %v13748_v52  ;;  %v13751_v33 = vld [vmem:[#allocation63_spill] sm:$0xff] }
 0x9cb   :  { %v5804_v45 = vmul.f32 %v13749_v30, %v5755_v54  ;;  %v5805_v1 = vmul.f32 %v5755_v54, %v13750_v3  ;;  %v5806_v39 = vmul.f32 %v13751_v33, %v5755_v54  ;;  %v5807_v50 = vmul.f32 %v5755_v54, %v13752_v22  ;;  %v13755_v24 = vld [vmem:[#allocation71_spill] sm:$0xff]  ;;  %v13757_v3 = vld [vmem:[#allocation41_spill] sm:$0xff]  ;;  %v13758_v22 = vld [vmem:[#allocation36_spill] sm:$0xff] }
 0x9cc   :  { %v5808_v12 = vmul.f32 %v13753_v57, %v5755_v54  ;;  %v5809_v51 = vmul.f32 %v5755_v54, %v13754_v55  ;;  %v5810_v49 = vmul.f32 %v13755_v24, %v5755_v54  ;;  %v13756_v52 = vld [vmem:[#allocation39_spill] sm:$0xff]  ;;  %v5812_v33 = vmul.f32 %v13757_v3, %v5755_v54 }
 0x9cd   :  { %v5811_v30 = vmul.f32 %v5755_v54, %v13756_v52  ;;  %v5817_v57 = vrot.slane %v5750_v41, %v13758_v22 }
 0x9cf   :  { %v12872_v55 = vadd.f32 %v5817_v57, %v5757_v20  ;;  %v12874_v24 = vadd.f32 %v5817_v57, %v5758_v27  ;;  %v12876_v52 = vadd.f32 %v5817_v57, %v5759_v25  ;;  %v12878_v3 = vadd.f32 %v5817_v57, %v5760_v43 }
 0x9d0   :  { %v12880_v54 = vadd.f32 %v5817_v57, %v5761_v5  ;;  %v12882_v22 = vadd.f32 %v5817_v57, %v5762_v34  ;;  %v12884_v41 = vadd.f32 %v5817_v57, %v5763_v35  ;;  %v12886_v20 = vadd.f32 %v5817_v57, %v5764_v42 }
 0x9d1   :  { %13759 = vst [vmem:[#allocation45_spill] sm:$0xff] %v12872_v55  ;;  %13760 = vst [vmem:[#allocation44_spill] sm:$0xff] %v12874_v24  ;;  %v12888_v55 = vadd.f32 %v5817_v57, %v5765_v38  ;;  %v12890_v27 = vadd.f32 %v5817_v57, %v5766_v58  ;;  %v12892_v24 = vadd.f32 %v5817_v57, %v5767_v36 }
 0x9d2   :  { %13761 = vst [vmem:[#allocation49_spill] sm:$0xff] %v12876_v52  ;;  %v12894_v25 = vadd.f32 %v5817_v57, %v5768_v40  ;;  %v12896_v52 = vadd.f32 %v5817_v57, %v5769_v60  ;;  %v12898_v43 = vadd.f32 %v5817_v57, %v5770_v46  ;;  %v12900_v5 = vadd.f32 %v5817_v57, %v5771_v4 }
 0x9d3   :  { %v12902_v34 = vadd.f32 %v5817_v57, %v5772_v16  ;;  %v12904_v35 = vadd.f32 %v5817_v57, %v5773_v10  ;;  %v12906_v42 = vadd.f32 %v5817_v57, %v5774_v59  ;;  %v12908_v38 = vadd.f32 %v5817_v57, %v5775_v37 }
 0x9d4   :  { %v12910_v58 = vadd.f32 %v5817_v57, %v5776_v29  ;;  %v12912_v36 = vadd.f32 %v5817_v57, %v5777_v6  ;;  %v12914_v40 = vadd.f32 %v5817_v57, %v5778_v8  ;;  %v12916_v60 = vadd.f32 %v5817_v57, %v5779_v19 }
 0x9d5   :  { %v12918_v46 = vadd.f32 %v5817_v57, %v5780_v13  ;;  %v12920_v4 = vadd.f32 %v5817_v57, %v5781_v9  ;;  %v12922_v16 = vadd.f32 %v5817_v57, %v5782_v28  ;;  %v12924_v10 = vadd.f32 %v5817_v57, %v5783_v48 }
 0x9d6   :  { %v12926_v59 = vadd.f32 %v5817_v57, %v5784_v23  ;;  %v12928_v37 = vadd.f32 %v5817_v57, %v5785_v63  ;;  %v12930_v29 = vadd.f32 %v5817_v57, %v5786_v44  ;;  %v12932_v6 = vadd.f32 %v5817_v57, %v5787_v11 }
 0x9d7   :  { %v12934_v8 = vadd.f32 %v5817_v57, %v5788_v61  ;;  %v12936_v19 = vadd.f32 %v5817_v57, %v5789_v15  ;;  %v12938_v13 = vadd.f32 %v5817_v57, %v5790_v56  ;;  %v12940_v9 = vadd.f32 %v5817_v57, %v5791_v14 }
 0x9d8   :  { %v12942_v28 = vadd.f32 %v5817_v57, %v5792_v26  ;;  %v12944_v48 = vadd.f32 %v5817_v57, %v5793_v0  ;;  %v12946_v23 = vadd.f32 %v5817_v57, %v5794_v7  ;;  %v12948_v63 = vadd.f32 %v5817_v57, %v5795_v47 }
 0x9d9   :  { %v12950_v44 = vadd.f32 %v5817_v57, %v5796_v18  ;;  %v12952_v11 = vadd.f32 %v5817_v57, %v5797_v53  ;;  %v12954_v61 = vadd.f32 %v5817_v57, %v5798_v21  ;;  %v12956_v15 = vadd.f32 %v5817_v57, %v5799_v32 }
 0x9da   :  { %v12958_v56 = vadd.f32 %v5817_v57, %v5800_v2  ;;  %v12960_v14 = vadd.f32 %v5817_v57, %v5801_v62  ;;  %v12962_v26 = vadd.f32 %v5817_v57, %v5802_v17  ;;  %v12964_v0 = vadd.f32 %v5817_v57, %v5803_v31  ;;  %v13765_v31 = vld [vmem:[#allocation45_spill] sm:$0xff] }
 0x9db   :  { %v12966_v7 = vadd.f32 %v5817_v57, %v5804_v45  ;;  %v12968_v47 = vadd.f32 %v5817_v57, %v5805_v1  ;;  %v12970_v18 = vadd.f32 %v5817_v57, %v5806_v39  ;;  %v12972_v53 = vadd.f32 %v5817_v57, %v5807_v50  ;;  %v13766_v45 = vld [vmem:[#allocation44_spill] sm:$0xff]  ;;  %v13767_v1 = vld [vmem:[#allocation49_spill] sm:$0xff] }
 0x9dc   :  { %13762 = vst [vmem:[#allocation48_spill] sm:$0xff] %v12964_v0  ;;  %v12974_v21 = vadd.f32 %v5817_v57, %v5808_v12  ;;  %v12976_v32 = vadd.f32 %v5817_v57, %v5809_v51  ;;  %v12978_v2 = vadd.f32 %v5817_v57, %v5810_v49  ;;  %v12980_v62 = vadd.f32 %v5817_v57, %v5811_v30 }
 0x9dd   :  { %13763 = vst [vmem:[#allocation53_spill] sm:$0xff] %v12966_v7  ;;  %13764 = vst [vmem:[#allocation52_spill] sm:$0xff] %v12968_v47  ;;  %v12982_v17 = vadd.f32 %v5817_v57, %v5812_v33  ;;  %v5875_v0 = vmax.f32 %v13765_v31, 0.0  ;;  %v5876_v7 = vmax.f32 %v13766_v45, 0.0  ;;  %v5877_v47 = vmax.f32 %v13767_v1, 0.0 }
 0x9de   :  { %v5878_v39 = vmax.f32 %v12878_v3, 0.0  ;;  %v5879_v50 = vmax.f32 %v12880_v54, 0.0  ;;  %v5880_v12 = vmax.f32 %v12882_v22, 0.0  ;;  %v5881_v51 = vmax.f32 %v12884_v41, 0.0 }
 0x9df   :  { %v5882_v49 = vmax.f32 %v12886_v20, 0.0  ;;  %v5883_v30 = vmax.f32 %v12888_v55, 0.0  ;;  %v5884_v33 = vmax.f32 %v12890_v27, 0.0  ;;  %v5885_v57 = vmax.f32 %v12892_v24, 0.0  ;;  %5931 = vst.msk [vmem:[%s13273_s9] sm:$0xff] %vm3204_vm13, %v5875_v0  ;;  %5932 = vst.msk [vmem:[%s13273_s9 + $0x8] sm:$0xff] %vm3204_vm13, %v5876_v7 }
 0x9e0   :  { %v5886_v31 = vmax.f32 %v12894_v25, 0.0  ;;  %5933 = vst.msk [vmem:[%s13273_s9 + $0x10] sm:$0xff] %vm3204_vm13, %v5877_v47  ;;  %5934 = vst.msk [vmem:[%s13273_s9 + $0x18] sm:$0xff] %vm3204_vm13, %v5878_v39  ;;  %v5887_v55 = vmax.f32 %v12896_v52, 0.0  ;;  %v5888_v24 = vmax.f32 %v12898_v43, 0.0  ;;  %v5889_v3 = vmax.f32 %v12900_v5, 0.0 }
 0x9e1   :  { %v5890_v54 = vmax.f32 %v12902_v34, 0.0  ;;  %5935 = vst.msk [vmem:[%s13273_s9 + $0x20] sm:$0xff] %vm3204_vm13, %v5879_v50  ;;  %5936 = vst.msk [vmem:[%s13273_s9 + $0x28] sm:$0xff] %vm3204_vm13, %v5880_v12  ;;  %v5891_v52 = vmax.f32 %v12904_v35, 0.0  ;;  %v5892_v22 = vmax.f32 %v12906_v42, 0.0  ;;  %v5893_v41 = vmax.f32 %v12908_v38, 0.0 }
 0x9e2   :  { %5937 = vst.msk [vmem:[%s13273_s9 + $0x30] sm:$0xff] %vm3204_vm13, %v5881_v51  ;;  %5938 = vst.msk [vmem:[%s13273_s9 + $0x38] sm:$0xff] %vm3204_vm13, %v5882_v49  ;;  %v5894_v20 = vmax.f32 %v12910_v58, 0.0  ;;  %v5895_v27 = vmax.f32 %v12912_v36, 0.0  ;;  %v5896_v25 = vmax.f32 %v12914_v40, 0.0  ;;  %v5897_v43 = vmax.f32 %v12916_v60, 0.0 }
 0x9e3   :  { %5939 = vst.msk [vmem:[%s13273_s9 + $0x40] sm:$0xff] %vm3204_vm13, %v5883_v30  ;;  %5940 = vst.msk [vmem:[%s13273_s9 + $0x48] sm:$0xff] %vm3204_vm13, %v5884_v33  ;;  %v5898_v5 = vmax.f32 %v12918_v46, 0.0  ;;  %v5899_v34 = vmax.f32 %v12920_v4, 0.0  ;;  %v5900_v35 = vmax.f32 %v12922_v16, 0.0  ;;  %v5901_v42 = vmax.f32 %v12924_v10, 0.0 }
 0x9e4   :  { %5941 = vst.msk [vmem:[%s13273_s9 + $0x50] sm:$0xff] %vm3204_vm13, %v5885_v57  ;;  %5942 = vst.msk [vmem:[%s13273_s9 + $0x58] sm:$0xff] %vm3204_vm13, %v5886_v31  ;;  %v5902_v38 = vmax.f32 %v12926_v59, 0.0  ;;  %v5903_v58 = vmax.f32 %v12928_v37, 0.0  ;;  %v5904_v36 = vmax.f32 %v12930_v29, 0.0  ;;  %v5905_v40 = vmax.f32 %v12932_v6, 0.0 }
 0x9e5   :  { %5943 = vst.msk [vmem:[%s13273_s9 + $0x60] sm:$0xff] %vm3204_vm13, %v5887_v55  ;;  %5944 = vst.msk [vmem:[%s13273_s9 + $0x68] sm:$0xff] %vm3204_vm13, %v5888_v24  ;;  %v5906_v60 = vmax.f32 %v12934_v8, 0.0  ;;  %v5907_v46 = vmax.f32 %v12936_v19, 0.0  ;;  %v5908_v4 = vmax.f32 %v12938_v13, 0.0  ;;  %v5909_v16 = vmax.f32 %v12940_v9, 0.0 }
 0x9e6   :  { %5945 = vst.msk [vmem:[%s13273_s9 + $0x70] sm:$0xff] %vm3204_vm13, %v5889_v3  ;;  %5946 = vst.msk [vmem:[%s13273_s9 + $0x78] sm:$0xff] %vm3204_vm13, %v5890_v54  ;;  %v5910_v10 = vmax.f32 %v12942_v28, 0.0  ;;  %v5911_v59 = vmax.f32 %v12944_v48, 0.0  ;;  %v5912_v37 = vmax.f32 %v12946_v23, 0.0  ;;  %v5913_v29 = vmax.f32 %v12948_v63, 0.0 }
 0x9e7   :  { %5947 = vst.msk [vmem:[%s13273_s9 + $0x80] sm:$0xff] %vm3204_vm13, %v5891_v52  ;;  %5948 = vst.msk [vmem:[%s13273_s9 + $0x88] sm:$0xff] %vm3204_vm13, %v5892_v22  ;;  %v5914_v6 = vmax.f32 %v12950_v44, 0.0  ;;  %v5915_v8 = vmax.f32 %v12952_v11, 0.0  ;;  %v5916_v19 = vmax.f32 %v12954_v61, 0.0  ;;  %v5917_v13 = vmax.f32 %v12956_v15, 0.0 }
 0x9e8   :  { %5949 = vst.msk [vmem:[%s13273_s9 + $0x90] sm:$0xff] %vm3204_vm13, %v5893_v41  ;;  %5950 = vst.msk [vmem:[%s13273_s9 + $0x98] sm:$0xff] %vm3204_vm13, %v5894_v20  ;;  %v5918_v9 = vmax.f32 %v12958_v56, 0.0  ;;  %v5919_v28 = vmax.f32 %v12960_v14, 0.0  ;;  %v5920_v48 = vmax.f32 %v12962_v26, 0.0  ;;  %v13768_v23 = vld [vmem:[#allocation48_spill] sm:$0xff] }
 0x9e9   :  { %5951 = vst.msk [vmem:[%s13273_s9 + $0xa0] sm:$0xff] %vm3204_vm13, %v5895_v27  ;;  %5952 = vst.msk [vmem:[%s13273_s9 + $0xa8] sm:$0xff] %vm3204_vm13, %v5896_v25  ;;  %v5921_v63 = vmax.f32 %v13768_v23, 0.0  ;;  %v13769_v44 = vld [vmem:[#allocation53_spill] sm:$0xff]  ;;  %v13770_v61 = vld [vmem:[#allocation52_spill] sm:$0xff]  ;;  %v5924_v56 = vmax.f32 %v12970_v18, 0.0 }
 0x9ea   :  { %5953 = vst.msk [vmem:[%s13273_s9 + $0xb0] sm:$0xff] %vm3204_vm13, %v5897_v43  ;;  %5954 = vst.msk [vmem:[%s13273_s9 + $0xb8] sm:$0xff] %vm3204_vm13, %v5898_v5  ;;  %v5922_v11 = vmax.f32 %v13769_v44, 0.0  ;;  %v5923_v15 = vmax.f32 %v13770_v61, 0.0  ;;  %v5925_v14 = vmax.f32 %v12972_v53, 0.0  ;;  %v5926_v26 = vmax.f32 %v12974_v21, 0.0 }
 0x9eb   :  { %5955 = vst.msk [vmem:[%s13273_s9 + $0xc0] sm:$0xff] %vm3204_vm13, %v5899_v34  ;;  %5956 = vst.msk [vmem:[%s13273_s9 + $0xc8] sm:$0xff] %vm3204_vm13, %v5900_v35  ;;  %v5927_v0 = vmax.f32 %v12976_v32, 0.0  ;;  %v5928_v7 = vmax.f32 %v12978_v2, 0.0  ;;  %v5929_v47 = vmax.f32 %v12980_v62, 0.0  ;;  %v5930_v18 = vmax.f32 %v12982_v17, 0.0 }
 0x9ec   :  { %5957 = vst.msk [vmem:[%s13273_s9 + $0xd0] sm:$0xff] %vm3204_vm13, %v5901_v42  ;;  %5958 = vst.msk [vmem:[%s13273_s9 + $0xd8] sm:$0xff] %vm3204_vm13, %v5902_v38 }
 0x9ed   :  { %5959 = vst.msk [vmem:[%s13273_s9 + $0xe0] sm:$0xff] %vm3204_vm13, %v5903_v58  ;;  %5960 = vst.msk [vmem:[%s13273_s9 + $0xe8] sm:$0xff] %vm3204_vm13, %v5904_v36 }
 0x9ee   :  { %5961 = vst.msk [vmem:[%s13273_s9 + $0xf0] sm:$0xff] %vm3204_vm13, %v5905_v40  ;;  %5962 = vst.msk [vmem:[%s13273_s9 + $0xf8] sm:$0xff] %vm3204_vm13, %v5906_v60 }
 0x9ef   :  { %5963 = vst.msk [vmem:[%s13273_s9 + $0x100] sm:$0xff] %vm3204_vm13, %v5907_v46  ;;  %5964 = vst.msk [vmem:[%s13273_s9 + $0x108] sm:$0xff] %vm3204_vm13, %v5908_v4 }
 0x9f0   :  { %5965 = vst.msk [vmem:[%s13273_s9 + $0x110] sm:$0xff] %vm3204_vm13, %v5909_v16  ;;  %5966 = vst.msk [vmem:[%s13273_s9 + $0x118] sm:$0xff] %vm3204_vm13, %v5910_v10 }
 0x9f1   :  { %5967 = vst.msk [vmem:[%s13273_s9 + $0x120] sm:$0xff] %vm3204_vm13, %v5911_v59  ;;  %5968 = vst.msk [vmem:[%s13273_s9 + $0x128] sm:$0xff] %vm3204_vm13, %v5912_v37 }
 0x9f2   :  { %5969 = vst.msk [vmem:[%s13273_s9 + $0x130] sm:$0xff] %vm3204_vm13, %v5913_v29  ;;  %5970 = vst.msk [vmem:[%s13273_s9 + $0x138] sm:$0xff] %vm3204_vm13, %v5914_v6 }
 0x9f3   :  { %5971 = vst.msk [vmem:[%s13273_s9 + $0x140] sm:$0xff] %vm3204_vm13, %v5915_v8  ;;  %5972 = vst.msk [vmem:[%s13273_s9 + $0x148] sm:$0xff] %vm3204_vm13, %v5916_v19 }
 0x9f4   :  { %5973 = vst.msk [vmem:[%s13273_s9 + $0x150] sm:$0xff] %vm3204_vm13, %v5917_v13  ;;  %5974 = vst.msk [vmem:[%s13273_s9 + $0x158] sm:$0xff] %vm3204_vm13, %v5918_v9 }
 0x9f5   :  { %5975 = vst.msk [vmem:[%s13273_s9 + $0x160] sm:$0xff] %vm3204_vm13, %v5919_v28  ;;  %5976 = vst.msk [vmem:[%s13273_s9 + $0x168] sm:$0xff] %vm3204_vm13, %v5920_v48 }
 0x9f6   :  { %5977 = vst.msk [vmem:[%s13273_s9 + $0x170] sm:$0xff] %vm3204_vm13, %v5921_v63  ;;  %5978 = vst.msk [vmem:[%s13273_s9 + $0x178] sm:$0xff] %vm3204_vm13, %v5922_v11 }
 0x9f7   :  { %5979 = vst.msk [vmem:[%s13273_s9 + $0x180] sm:$0xff] %vm3204_vm13, %v5923_v15  ;;  %5980 = vst.msk [vmem:[%s13273_s9 + $0x188] sm:$0xff] %vm3204_vm13, %v5924_v56 }
 0x9f8   :  { %5981 = vst.msk [vmem:[%s13273_s9 + $0x190] sm:$0xff] %vm3204_vm13, %v5925_v14  ;;  %5982 = vst.msk [vmem:[%s13273_s9 + $0x198] sm:$0xff] %vm3204_vm13, %v5926_v26 }
 0x9f9   :  { %5983 = vst.msk [vmem:[%s13273_s9 + $0x1a0] sm:$0xff] %vm3204_vm13, %v5927_v0  ;;  %5984 = vst.msk [vmem:[%s13273_s9 + $0x1a8] sm:$0xff] %vm3204_vm13, %v5928_v7 }
 0x9fa   :  { %5985 = vst.msk [vmem:[%s13273_s9 + $0x1b0] sm:$0xff] %vm3204_vm13, %v5929_v47  ;;  %5986 = vst.msk [vmem:[%s13273_s9 + $0x1b8] sm:$0xff] %vm3204_vm13, %v5930_v18 }

</bundles_post_ra>
